<compile_context>
chip_gen: v6e
topology: v6e:2x2x1
jax: 0.10.0
libtpu: 0.0.40
codegen_flags: <defaults>
</compile_context>

<pallas_src>
import functools

import numpy as np

import jax
import jax.numpy as jnp
from jax import lax
from jax.experimental import pallas as pl
from jax.experimental.pallas import tpu as pltpu

EPS = 1e-5
INSTANCES_PER_STEP = 8   # fills the 8 sublanes of a vreg


def _tap_masks(H, W, N, radius):
    """(taps, 1, N*H*W) validity masks for zero-padded conv taps.

    The per-image data is flattened as (n, h, w); in-bounds taps never cross
    the image boundary on the flattened axis, so cyclic wrap produced by a
    lane roll only ever lands on positions this mask zeroes out.
    """
    HW = H * W
    rows = np.arange(HW) // W
    cols = np.arange(HW) % W
    k = 2 * radius + 1
    m = np.zeros((k * k, 1, N * HW), dtype=np.float32)
    for dh in range(-radius, radius + 1):
        for dw in range(-radius, radius + 1):
            ok = ((rows + dh >= 0) & (rows + dh < H)
                  & (cols + dw >= 0) & (cols + dw < W)).astype(np.float32)
            m[(dh + radius) * k + (dw + radius), 0, :] = np.tile(ok, N)
    return m


def _tree_sum(terms):
    """Pairwise tree reduction (VALU ILP instead of a serial add chain)."""
    while len(terms) > 1:
        nxt = [terms[i] + terms[i + 1] for i in range(0, len(terms) - 1, 2)]
        if len(terms) % 2:
            nxt.append(terms[-1])
        terms = nxt
    return terms[0]


def _attention_iter_kernel(
    x_ref,        # (C, G, NHW)    VMEM f32  row = one invocation's channel, (n,h,w) flat
    bn_g_ref,     # (C, 1, 1)      VMEM f32  BatchNorm2d(C) gamma
    bn_b_ref,     # (C, 1, 1)      VMEM f32  BatchNorm2d(C) beta
    umask_ref,    # (9, 1, NHW)    VMEM f32  3x3 tap validity masks
    spwm_ref,     # (K*K, 1, NHW)  VMEM f32  spConv weight * tap validity mask (pre-fused)
    u_w_ref,      # (9*C,)         SMEM f32  U conv weight, [tap*C + c]
    u_b_ref,      # (1,)           SMEM f32  U conv bias
    sp_b_ref,     # (1,)           SMEM f32  shared spConv bias
    spbn_g_ref,   # (IterSize,)    SMEM f32  per-iteration BN(1) gamma
    spbn_b_ref,   # (IterSize,)    SMEM f32  per-iteration BN(1) beta
    y_ref,        # (C, G, NHW)    VMEM f32  output
    *,
    width: int,
    lrn_size: int,
    iter_size: int,
):
    C, G, NHW = x_ref.shape
    W = width
    K = lrn_size
    P = K // 2
    inv = 1.0 / float(NHW)

    def rolled(z, off):
        # result[..., p] = z[..., (p + off) % NHW]; pltpu.roll == jnp.roll convention.
        if off == 0:
            return z
        return pltpu.roll(z, (-off) % NHW, z.ndim - 1)

    # ---- x = BatchNorm2d(C)(x): per-(channel, invocation) batch stats -------
    # Two-pass variance: the centered tensor is needed for normalization anyway.
    x = x_ref[...]                                             # (C,G,NHW)
    mean = jnp.sum(x, axis=2, keepdims=True) * inv             # (C,G,1)
    xc = x - mean
    var = jnp.sum(xc * xc, axis=2, keepdims=True) * inv
    xn = xc * (bn_g_ref[...] * lax.rsqrt(var + EPS)) + bn_b_ref[...]

    # ---- u = U(xn): Conv2d(C, 1, 3, stride 1, pad 1) --------------------------
    # Contract channels per tap first (scalar FMAs on (G,NHW)), then roll + mask.
    u_bias = u_b_ref[0]
    u_terms = []
    for kh in range(3):
        for kw in range(3):
            t = kh * 3 + kw
            off = (kh - 1) * W + (kw - 1)
            ws = xn[0] * u_w_ref[t * C + 0]                    # (G,NHW)
            for c in range(1, C):
                ws = ws + xn[c] * u_w_ref[t * C + c]
            term = rolled(ws, off)
            if (kh, kw) != (1, 1):                             # center tap mask == 1
                term = term * umask_ref[t]                     # (1,NHW) broadcast
            u_terms.append(term)
    u = _tree_sum(u_terms) + u_bias                            # (G, NHW)

    # ---- attention refinement iterations --------------------------------------
    # Hoist fused weight*mask loads and biases out of the hot loop.
    spwm = [spwm_ref[t] for t in range(K * K)]                 # each (1, NHW)
    sp_bias = sp_b_ref[0]

    out = u
    for it in range(iter_size):
        g_it = spbn_g_ref[it]
        b_it = spbn_b_ref[it]

        # BatchNorm2d(1), per-invocation batch stats, two-pass
        m = jnp.sum(out, axis=1, keepdims=True) * inv          # (G,1)
        oc = out - m
        v = jnp.sum(oc * oc, axis=1, keepdims=True) * inv
        ob = oc * (g_it * lax.rsqrt(v + EPS)) + b_it

        # shared Conv2d(1, 1, K, stride 1, pad K//2), weight pre-fused with mask
        conv_terms = []
        for kh in range(K):
            for kw in range(K):
                t = kh * K + kw
                off = (kh - P) * W + (kw - P)
                conv_terms.append(rolled(ob, off) * spwm[t])
        out = u + jax.nn.sigmoid(_tree_sum(conv_terms) + sp_bias)

    # ---- y = bn(x) * out.expand_as(x): one dense broadcast store --------------
    y_ref[...] = xn * out                                      # (C,G,NHW)*(G,NHW)


def attention_iter(x, params, lrn_size, iter_size):
    """AttentionIter forward.

    x: (N, C, H, W) for one module invocation, or (B, N, C, H, W) for a batch
       of B independent invocations (each keeps its own BatchNorm batch stats).
    """
    assert lrn_size % 2 == 1, "LRNSize must be odd to preserve spatial shape"
    single = x.ndim == 4
    if single:
        x = x[None]
    B, N, C, H, W = x.shape
    NHW = N * H * W
    K = lrn_size
    G = INSTANCES_PER_STEP

    # Pad the invocation batch to a multiple of G (padded rows are discarded).
    Bp = ((B + G - 1) // G) * G
    if Bp != B:
        x = jnp.concatenate(
            [x, jnp.zeros((Bp - B, N, C, H, W), x.dtype)], axis=0)
    nblk = Bp // G

    # (Bp,N,C,H,W) -> (nblk, C, G, N*H*W): one sublane row per (invocation, channel).
    xk = jnp.transpose(x, (0, 2, 1, 3, 4)).reshape(Bp, C, NHW)
    xk = jnp.transpose(xk.reshape(nblk, G, C, NHW), (0, 2, 1, 3)).astype(jnp.float32)

    bn_g = params["bn_g"].reshape(C, 1, 1).astype(jnp.float32)
    bn_b = params["bn_b"].reshape(C, 1, 1).astype(jnp.float32)
    # U conv weight (1, C, 3, 3) -> flat [tap*C + c]
    u_w_flat = jnp.transpose(params["u_w"][0], (1, 2, 0)).reshape(9 * C).astype(jnp.float32)
    u_masks = jnp.asarray(_tap_masks(H, W, N, 1))                        # (9, 1, NHW)
    sp_masks = jnp.asarray(_tap_masks(H, W, N, K // 2))                  # (K*K, 1, NHW)
    sp_w_masked = params["sp_w"].reshape(K * K, 1, 1).astype(jnp.float32) * sp_masks

    kernel = functools.partial(
        _attention_iter_kernel, width=W, lrn_size=K, iter_size=iter_size)

    def const(*shape):
        return pl.BlockSpec(shape, lambda i, _s=shape: (0,) * len(_s))

    def smem(*shape):
        return pl.BlockSpec(shape, lambda i, _s=shape: (0,) * len(_s),
                            memory_space=pltpu.MemorySpace.SMEM)

    y_k = pl.pallas_call(
        kernel,
        grid=(nblk,),
        in_specs=[
            pl.BlockSpec((None, C, G, NHW), lambda i: (i, 0, 0, 0)),    # x
            const(C, 1, 1),                                             # bn gamma
            const(C, 1, 1),                                             # bn beta
            const(9, 1, NHW),                                           # U tap masks
            const(K * K, 1, NHW),                                       # spConv w*mask
            smem(9 * C),                                                # U weight
            smem(1),                                                    # U bias
            smem(1),                                                    # spConv bias
            smem(iter_size),                                            # per-iter BN gamma
            smem(iter_size),                                            # per-iter BN beta
        ],
        out_specs=pl.BlockSpec((None, C, G, NHW), lambda i: (i, 0, 0, 0)),
        out_shape=jax.ShapeDtypeStruct((nblk, C, G, NHW), jnp.float32),
        compiler_params=pltpu.CompilerParams(
            dimension_semantics=("parallel",)),
    )(
        xk, bn_g, bn_b, u_masks, sp_w_masked,
        u_w_flat,
        params["u_b"].astype(jnp.float32),
        params["sp_b"].astype(jnp.float32),
        params["spbn_g"].astype(jnp.float32),
        params["spbn_b"].astype(jnp.float32),
    )

    # (nblk, C, G, NHW) -> (Bp, N, C, H, W) -> slice away padding.
    y = jnp.transpose(y_k, (0, 2, 1, 3)).reshape(Bp, C, N, H, W)
    y = jnp.transpose(y, (0, 2, 1, 3, 4))[:B]
    return y[0] if single else y


def reference_forward(x, params, lrn_size, iter_size):
    """Pure-JAX reference mirroring the PyTorch forward (training-mode BN)."""
    P = lrn_size // 2
    dn = ("NCHW", "OIHW", "NCHW")
    hp = lax.Precision.HIGHEST

    mean = jnp.mean(x, axis=(0, 2, 3), keepdims=True)
    var = jnp.mean((x - mean) ** 2, axis=(0, 2, 3), keepdims=True)
    xn = (x - mean) / jnp.sqrt(var + EPS) * params["bn_g"] + params["bn_b"]

    u = lax.conv_general_dilated(
        xn, params["u_w"], (1, 1), [(1, 1), (1, 1)],
        dimension_numbers=dn, precision=hp) + params["u_b"][0]

    out = u
    for it in range(iter_size):
        m = jnp.mean(out)
        v = jnp.mean((out - m) ** 2)
        ob = (out - m) / jnp.sqrt(v + EPS) * params["spbn_g"][it] + params["spbn_b"][it]
        conv = lax.conv_general_dilated(
            ob, params["sp_w"], (1, 1), [(P, P), (P, P)],
            dimension_numbers=dn, precision=hp) + params["sp_b"][0]
        out = u + jax.nn.sigmoid(conv)

    return xn * out   # broadcast over channels == out.expand_as(x)


if __name__ == "__main__":
    # Shapes consistent with AttentionIter(nChannels=4, LRNSize=3, IterSize=3)
    N, C, H, W = 2, 4, 16, 16
    LRN, ITER = 3, 3

    key = jax.random.PRNGKey(0)
    ks = jax.random.split(key, 10)

    x = jax.random.normal(ks[0], (N, C, H, W), dtype=jnp.float32)

    params = {
        "bn_g": (1.0 + 0.1 * jax.random.normal(ks[1], (1, C, 1, 1))).astype(jnp.float32),
        "bn_b": (0.1 * jax.random.normal(ks[2], (1, C, 1, 1))).astype(jnp.float32),
        "u_w": (0.2 * jax.random.normal(ks[3], (1, C, 3, 3))).astype(jnp.float32),
        "u_b": (0.1 * jax.random.normal(ks[4], (1,))).astype(jnp.float32),
        "sp_w": (0.2 * jax.random.normal(ks[5], (1, 1, LRN, LRN))).astype(jnp.float32),
        "sp_b": (0.1 * jax.random.normal(ks[6], (1,))).astype(jnp.float32),
        "spbn_g": (1.0 + 0.1 * jax.random.normal(ks[7], (ITER,))).astype(jnp.float32),
        "spbn_b": (0.1 * jax.random.normal(ks[8], (ITER,))).astype(jnp.float32),
    }

    # 1) Single module invocation (matches the PyTorch forward signature).
    y = jax.block_until_ready(attention_iter(x, params, LRN, ITER))
    y_ref = reference_forward(x, params, LRN, ITER)
    err = float(jnp.max(jnp.abs(y - y_ref)))
    assert err < 1e-3, f"single-invocation max abs error vs reference: {err}"

    # 2) Batched: 16 independent invocations through one pallas_call (grid=(2,),
    #    "parallel" grid axis -> both TensorCores on v7x).
    xb = jax.random.normal(ks[9], (16, N, C, H, W), dtype=jnp.float32)
    yb = jax.block_until_ready(attention_iter(xb, params, LRN, ITER))
    yb_ref = jax.vmap(lambda xx: reference_forward(xx, params, LRN, ITER))(xb)
    errb = float(jnp.max(jnp.abs(yb - yb_ref)))
    assert errb < 1e-3, f"batched max abs error vs reference: {errb}"

    print("KERNEL_OK")
</pallas_src>

<mosaic_0001>
module attributes {stable_mosaic.version = 11 : i64} {
  func.func @_attention_iter_kernel(%arg0: i32, %arg1: memref<1x4x8x512xf32, #tpu.memory_space<vmem>>, %arg2: memref<4x1x1xf32, #tpu.memory_space<vmem>>, %arg3: memref<4x1x1xf32, #tpu.memory_space<vmem>>, %arg4: memref<9x1x512xf32, #tpu.memory_space<vmem>>, %arg5: memref<9x1x512xf32, #tpu.memory_space<vmem>>, %arg6: memref<36xf32, #tpu.memory_space<smem>>, %arg7: memref<1xf32, #tpu.memory_space<smem>>, %arg8: memref<1xf32, #tpu.memory_space<smem>>, %arg9: memref<3xf32, #tpu.memory_space<smem>>, %arg10: memref<3xf32, #tpu.memory_space<smem>>, %arg11: memref<1x4x8x512xf32, #tpu.memory_space<vmem>>) attributes {dimension_semantics = [#tpu.dimension_semantics<parallel>], iteration_bounds = array<i64: 1>, scalar_prefetch = 0 : i64, scratch_operands = 0 : i64, tpu.core_type = #tpu.core_type<tc>, window_params = [{transform_indices = @transform_0, window_bounds = array<i64: 1, 4, 8, 512>}, {pipeline_mode = #tpu.pipeline_mode<synchronous>, transform_indices = @transform_1, window_bounds = array<i64: 4, 1, 1>}, {pipeline_mode = #tpu.pipeline_mode<synchronous>, transform_indices = @transform_2, window_bounds = array<i64: 4, 1, 1>}, {pipeline_mode = #tpu.pipeline_mode<synchronous>, transform_indices = @transform_3, window_bounds = array<i64: 9, 1, 512>}, {pipeline_mode = #tpu.pipeline_mode<synchronous>, transform_indices = @transform_4, window_bounds = array<i64: 9, 1, 512>}, {transform_indices = @transform_5, window_bounds = array<i64: 36>}, {transform_indices = @transform_6, window_bounds = array<i64: 1>}, {transform_indices = @transform_7, window_bounds = array<i64: 1>}, {transform_indices = @transform_8, window_bounds = array<i64: 3>}, {transform_indices = @transform_9, window_bounds = array<i64: 3>}, {transform_indices = @transform_10, window_bounds = array<i64: 1, 4, 8, 512>}]} {
    %c0 = arith.constant 0 : index
    %c0_0 = arith.constant 0 : index
    %c0_1 = arith.constant 0 : index
    %c0_2 = arith.constant 0 : index
    %0 = vector.load %arg1[%c0, %c0_0, %c0_1, %c0_2] : memref<1x4x8x512xf32, #tpu.memory_space<vmem>>, vector<1x4x8x512xf32>
    %1 = vector.shape_cast %0 : vector<1x4x8x512xf32> to vector<4x8x512xf32>
    %cst = arith.constant dense<0.000000e+00> : vector<4x8xf32>
    %2 = vector.multi_reduction <add>, %1, %cst [2] : vector<4x8x512xf32> to vector<4x8xf32>
    %3 = vector.shape_cast %2 : vector<4x8xf32> to vector<4x8x1xf32>
    %cst_3 = arith.constant 0.001953125 : f32
    %4 = vector.broadcast %cst_3 : f32 to vector<4x8x1xf32>
    %5 = arith.mulf %3, %4 : vector<4x8x1xf32>
    %6 = vector.broadcast %5 : vector<4x8x1xf32> to vector<4x8x512xf32>
    %7 = arith.subf %1, %6 : vector<4x8x512xf32>
    %8 = arith.mulf %7, %7 : vector<4x8x512xf32>
    %cst_4 = arith.constant dense<0.000000e+00> : vector<4x8xf32>
    %9 = vector.multi_reduction <add>, %8, %cst_4 [2] : vector<4x8x512xf32> to vector<4x8xf32>
    %10 = vector.shape_cast %9 : vector<4x8xf32> to vector<4x8x1xf32>
    %cst_5 = arith.constant 0.001953125 : f32
    %11 = vector.broadcast %cst_5 : f32 to vector<4x8x1xf32>
    %12 = arith.mulf %10, %11 : vector<4x8x1xf32>
    %c0_6 = arith.constant 0 : index
    %c0_7 = arith.constant 0 : index
    %c0_8 = arith.constant 0 : index
    %13 = vector.load %arg2[%c0_6, %c0_7, %c0_8] : memref<4x1x1xf32, #tpu.memory_space<vmem>>, vector<4x1x1xf32>
    %cst_9 = arith.constant 9.99999974E-6 : f32
    %14 = vector.broadcast %cst_9 : f32 to vector<4x8x1xf32>
    %15 = arith.addf %12, %14 : vector<4x8x1xf32>
    %16 = math.rsqrt %15 : vector<4x8x1xf32>
    %17 = vector.broadcast %13 : vector<4x1x1xf32> to vector<4x8x1xf32>
    %18 = arith.mulf %17, %16 : vector<4x8x1xf32>
    %19 = vector.broadcast %18 : vector<4x8x1xf32> to vector<4x8x512xf32>
    %20 = arith.mulf %7, %19 : vector<4x8x512xf32>
    %c0_10 = arith.constant 0 : index
    %c0_11 = arith.constant 0 : index
    %c0_12 = arith.constant 0 : index
    %21 = vector.load %arg3[%c0_10, %c0_11, %c0_12] : memref<4x1x1xf32, #tpu.memory_space<vmem>>, vector<4x1x1xf32>
    %22 = vector.broadcast %21 : vector<4x1x1xf32> to vector<4x8x512xf32>
    %23 = arith.addf %20, %22 : vector<4x8x512xf32>
    %c0_13 = arith.constant 0 : index
    %24 = memref.load %arg7[%c0_13] : memref<1xf32, #tpu.memory_space<smem>>
    %25 = vector.extract_strided_slice %23 {offsets = [0, 0, 0], sizes = [1, 8, 512], strides = [1, 1, 1]} : vector<4x8x512xf32> to vector<1x8x512xf32>
    %26 = vector.shape_cast %25 : vector<1x8x512xf32> to vector<8x512xf32>
    %c0_14 = arith.constant 0 : index
    %27 = memref.load %arg6[%c0_14] : memref<36xf32, #tpu.memory_space<smem>>
    %28 = vector.broadcast %27 : f32 to vector<8x512xf32>
    %29 = arith.mulf %26, %28 : vector<8x512xf32>
    %30 = vector.extract_strided_slice %23 {offsets = [1, 0, 0], sizes = [1, 8, 512], strides = [1, 1, 1]} : vector<4x8x512xf32> to vector<1x8x512xf32>
    %31 = vector.shape_cast %30 : vector<1x8x512xf32> to vector<8x512xf32>
    %c1 = arith.constant 1 : index
    %32 = memref.load %arg6[%c1] : memref<36xf32, #tpu.memory_space<smem>>
    %33 = vector.broadcast %32 : f32 to vector<8x512xf32>
    %34 = arith.mulf %31, %33 : vector<8x512xf32>
    %35 = arith.addf %29, %34 : vector<8x512xf32>
    %36 = vector.extract_strided_slice %23 {offsets = [2, 0, 0], sizes = [1, 8, 512], strides = [1, 1, 1]} : vector<4x8x512xf32> to vector<1x8x512xf32>
    %37 = vector.shape_cast %36 : vector<1x8x512xf32> to vector<8x512xf32>
    %c2 = arith.constant 2 : index
    %38 = memref.load %arg6[%c2] : memref<36xf32, #tpu.memory_space<smem>>
    %39 = vector.broadcast %38 : f32 to vector<8x512xf32>
    %40 = arith.mulf %37, %39 : vector<8x512xf32>
    %41 = arith.addf %35, %40 : vector<8x512xf32>
    %42 = vector.extract_strided_slice %23 {offsets = [3, 0, 0], sizes = [1, 8, 512], strides = [1, 1, 1]} : vector<4x8x512xf32> to vector<1x8x512xf32>
    %43 = vector.shape_cast %42 : vector<1x8x512xf32> to vector<8x512xf32>
    %c3 = arith.constant 3 : index
    %44 = memref.load %arg6[%c3] : memref<36xf32, #tpu.memory_space<smem>>
    %45 = vector.broadcast %44 : f32 to vector<8x512xf32>
    %46 = arith.mulf %43, %45 : vector<8x512xf32>
    %47 = arith.addf %41, %46 : vector<8x512xf32>
    %c17_i32 = arith.constant 17 : i32
    %48 = tpu.dynamic_rotate %47 by %c17_i32 dim 1 : vector<8x512xf32>, i32 -> vector<8x512xf32>
    %c0_15 = arith.constant 0 : index
    %c0_16 = arith.constant 0 : index
    %c0_17 = arith.constant 0 : index
    %49 = vector.load %arg4[%c0_15, %c0_16, %c0_17] : memref<9x1x512xf32, #tpu.memory_space<vmem>>, vector<1x1x512xf32>
    %50 = vector.shape_cast %49 : vector<1x1x512xf32> to vector<1x512xf32>
    %51 = vector.broadcast %50 : vector<1x512xf32> to vector<8x512xf32>
    %52 = arith.mulf %48, %51 : vector<8x512xf32>
    %53 = vector.extract_strided_slice %23 {offsets = [0, 0, 0], sizes = [1, 8, 512], strides = [1, 1, 1]} : vector<4x8x512xf32> to vector<1x8x512xf32>
    %54 = vector.shape_cast %53 : vector<1x8x512xf32> to vector<8x512xf32>
    %c4 = arith.constant 4 : index
    %55 = memref.load %arg6[%c4] : memref<36xf32, #tpu.memory_space<smem>>
    %56 = vector.broadcast %55 : f32 to vector<8x512xf32>
    %57 = arith.mulf %54, %56 : vector<8x512xf32>
    %58 = vector.extract_strided_slice %23 {offsets = [1, 0, 0], sizes = [1, 8, 512], strides = [1, 1, 1]} : vector<4x8x512xf32> to vector<1x8x512xf32>
    %59 = vector.shape_cast %58 : vector<1x8x512xf32> to vector<8x512xf32>
    %c5 = arith.constant 5 : index
    %60 = memref.load %arg6[%c5] : memref<36xf32, #tpu.memory_space<smem>>
    %61 = vector.broadcast %60 : f32 to vector<8x512xf32>
    %62 = arith.mulf %59, %61 : vector<8x512xf32>
    %63 = arith.addf %57, %62 : vector<8x512xf32>
    %64 = vector.extract_strided_slice %23 {offsets = [2, 0, 0], sizes = [1, 8, 512], strides = [1, 1, 1]} : vector<4x8x512xf32> to vector<1x8x512xf32>
    %65 = vector.shape_cast %64 : vector<1x8x512xf32> to vector<8x512xf32>
    %c6 = arith.constant 6 : index
    %66 = memref.load %arg6[%c6] : memref<36xf32, #tpu.memory_space<smem>>
    %67 = vector.broadcast %66 : f32 to vector<8x512xf32>
    %68 = arith.mulf %65, %67 : vector<8x512xf32>
    %69 = arith.addf %63, %68 : vector<8x512xf32>
    %70 = vector.extract_strided_slice %23 {offsets = [3, 0, 0], sizes = [1, 8, 512], strides = [1, 1, 1]} : vector<4x8x512xf32> to vector<1x8x512xf32>
    %71 = vector.shape_cast %70 : vector<1x8x512xf32> to vector<8x512xf32>
    %c7 = arith.constant 7 : index
    %72 = memref.load %arg6[%c7] : memref<36xf32, #tpu.memory_space<smem>>
    %73 = vector.broadcast %72 : f32 to vector<8x512xf32>
    %74 = arith.mulf %71, %73 : vector<8x512xf32>
    %75 = arith.addf %69, %74 : vector<8x512xf32>
    %c16_i32 = arith.constant 16 : i32
    %76 = tpu.dynamic_rotate %75 by %c16_i32 dim 1 : vector<8x512xf32>, i32 -> vector<8x512xf32>
    %c1_18 = arith.constant 1 : index
    %c0_19 = arith.constant 0 : index
    %c0_20 = arith.constant 0 : index
    %77 = vector.load %arg4[%c1_18, %c0_19, %c0_20] : memref<9x1x512xf32, #tpu.memory_space<vmem>>, vector<1x1x512xf32>
    %78 = vector.shape_cast %77 : vector<1x1x512xf32> to vector<1x512xf32>
    %79 = vector.broadcast %78 : vector<1x512xf32> to vector<8x512xf32>
    %80 = arith.mulf %76, %79 : vector<8x512xf32>
    %81 = vector.extract_strided_slice %23 {offsets = [0, 0, 0], sizes = [1, 8, 512], strides = [1, 1, 1]} : vector<4x8x512xf32> to vector<1x8x512xf32>
    %82 = vector.shape_cast %81 : vector<1x8x512xf32> to vector<8x512xf32>
    %c8 = arith.constant 8 : index
    %83 = memref.load %arg6[%c8] : memref<36xf32, #tpu.memory_space<smem>>
    %84 = vector.broadcast %83 : f32 to vector<8x512xf32>
    %85 = arith.mulf %82, %84 : vector<8x512xf32>
    %86 = vector.extract_strided_slice %23 {offsets = [1, 0, 0], sizes = [1, 8, 512], strides = [1, 1, 1]} : vector<4x8x512xf32> to vector<1x8x512xf32>
    %87 = vector.shape_cast %86 : vector<1x8x512xf32> to vector<8x512xf32>
    %c9 = arith.constant 9 : index
    %88 = memref.load %arg6[%c9] : memref<36xf32, #tpu.memory_space<smem>>
    %89 = vector.broadcast %88 : f32 to vector<8x512xf32>
    %90 = arith.mulf %87, %89 : vector<8x512xf32>
    %91 = arith.addf %85, %90 : vector<8x512xf32>
    %92 = vector.extract_strided_slice %23 {offsets = [2, 0, 0], sizes = [1, 8, 512], strides = [1, 1, 1]} : vector<4x8x512xf32> to vector<1x8x512xf32>
    %93 = vector.shape_cast %92 : vector<1x8x512xf32> to vector<8x512xf32>
    %c10 = arith.constant 10 : index
    %94 = memref.load %arg6[%c10] : memref<36xf32, #tpu.memory_space<smem>>
    %95 = vector.broadcast %94 : f32 to vector<8x512xf32>
    %96 = arith.mulf %93, %95 : vector<8x512xf32>
    %97 = arith.addf %91, %96 : vector<8x512xf32>
    %98 = vector.extract_strided_slice %23 {offsets = [3, 0, 0], sizes = [1, 8, 512], strides = [1, 1, 1]} : vector<4x8x512xf32> to vector<1x8x512xf32>
    %99 = vector.shape_cast %98 : vector<1x8x512xf32> to vector<8x512xf32>
    %c11 = arith.constant 11 : index
    %100 = memref.load %arg6[%c11] : memref<36xf32, #tpu.memory_space<smem>>
    %101 = vector.broadcast %100 : f32 to vector<8x512xf32>
    %102 = arith.mulf %99, %101 : vector<8x512xf32>
    %103 = arith.addf %97, %102 : vector<8x512xf32>
    %c15_i32 = arith.constant 15 : i32
    %104 = tpu.dynamic_rotate %103 by %c15_i32 dim 1 : vector<8x512xf32>, i32 -> vector<8x512xf32>
    %c2_21 = arith.constant 2 : index
    %c0_22 = arith.constant 0 : index
    %c0_23 = arith.constant 0 : index
    %105 = vector.load %arg4[%c2_21, %c0_22, %c0_23] : memref<9x1x512xf32, #tpu.memory_space<vmem>>, vector<1x1x512xf32>
    %106 = vector.shape_cast %105 : vector<1x1x512xf32> to vector<1x512xf32>
    %107 = vector.broadcast %106 : vector<1x512xf32> to vector<8x512xf32>
    %108 = arith.mulf %104, %107 : vector<8x512xf32>
    %109 = vector.extract_strided_slice %23 {offsets = [0, 0, 0], sizes = [1, 8, 512], strides = [1, 1, 1]} : vector<4x8x512xf32> to vector<1x8x512xf32>
    %110 = vector.shape_cast %109 : vector<1x8x512xf32> to vector<8x512xf32>
    %c12 = arith.constant 12 : index
    %111 = memref.load %arg6[%c12] : memref<36xf32, #tpu.memory_space<smem>>
    %112 = vector.broadcast %111 : f32 to vector<8x512xf32>
    %113 = arith.mulf %110, %112 : vector<8x512xf32>
    %114 = vector.extract_strided_slice %23 {offsets = [1, 0, 0], sizes = [1, 8, 512], strides = [1, 1, 1]} : vector<4x8x512xf32> to vector<1x8x512xf32>
    %115 = vector.shape_cast %114 : vector<1x8x512xf32> to vector<8x512xf32>
    %c13 = arith.constant 13 : index
    %116 = memref.load %arg6[%c13] : memref<36xf32, #tpu.memory_space<smem>>
    %117 = vector.broadcast %116 : f32 to vector<8x512xf32>
    %118 = arith.mulf %115, %117 : vector<8x512xf32>
    %119 = arith.addf %113, %118 : vector<8x512xf32>
    %120 = vector.extract_strided_slice %23 {offsets = [2, 0, 0], sizes = [1, 8, 512], strides = [1, 1, 1]} : vector<4x8x512xf32> to vector<1x8x512xf32>
    %121 = vector.shape_cast %120 : vector<1x8x512xf32> to vector<8x512xf32>
    %c14 = arith.constant 14 : index
    %122 = memref.load %arg6[%c14] : memref<36xf32, #tpu.memory_space<smem>>
    %123 = vector.broadcast %122 : f32 to vector<8x512xf32>
    %124 = arith.mulf %121, %123 : vector<8x512xf32>
    %125 = arith.addf %119, %124 : vector<8x512xf32>
    %126 = vector.extract_strided_slice %23 {offsets = [3, 0, 0], sizes = [1, 8, 512], strides = [1, 1, 1]} : vector<4x8x512xf32> to vector<1x8x512xf32>
    %127 = vector.shape_cast %126 : vector<1x8x512xf32> to vector<8x512xf32>
    %c15 = arith.constant 15 : index
    %128 = memref.load %arg6[%c15] : memref<36xf32, #tpu.memory_space<smem>>
    %129 = vector.broadcast %128 : f32 to vector<8x512xf32>
    %130 = arith.mulf %127, %129 : vector<8x512xf32>
    %131 = arith.addf %125, %130 : vector<8x512xf32>
    %c1_i32 = arith.constant 1 : i32
    %132 = tpu.dynamic_rotate %131 by %c1_i32 dim 1 : vector<8x512xf32>, i32 -> vector<8x512xf32>
    %c3_24 = arith.constant 3 : index
    %c0_25 = arith.constant 0 : index
    %c0_26 = arith.constant 0 : index
    %133 = vector.load %arg4[%c3_24, %c0_25, %c0_26] : memref<9x1x512xf32, #tpu.memory_space<vmem>>, vector<1x1x512xf32>
    %134 = vector.shape_cast %133 : vector<1x1x512xf32> to vector<1x512xf32>
    %135 = vector.broadcast %134 : vector<1x512xf32> to vector<8x512xf32>
    %136 = arith.mulf %132, %135 : vector<8x512xf32>
    %137 = vector.extract_strided_slice %23 {offsets = [0, 0, 0], sizes = [1, 8, 512], strides = [1, 1, 1]} : vector<4x8x512xf32> to vector<1x8x512xf32>
    %138 = vector.shape_cast %137 : vector<1x8x512xf32> to vector<8x512xf32>
    %c16 = arith.constant 16 : index
    %139 = memref.load %arg6[%c16] : memref<36xf32, #tpu.memory_space<smem>>
    %140 = vector.broadcast %139 : f32 to vector<8x512xf32>
    %141 = arith.mulf %138, %140 : vector<8x512xf32>
    %142 = vector.extract_strided_slice %23 {offsets = [1, 0, 0], sizes = [1, 8, 512], strides = [1, 1, 1]} : vector<4x8x512xf32> to vector<1x8x512xf32>
    %143 = vector.shape_cast %142 : vector<1x8x512xf32> to vector<8x512xf32>
    %c17 = arith.constant 17 : index
    %144 = memref.load %arg6[%c17] : memref<36xf32, #tpu.memory_space<smem>>
    %145 = vector.broadcast %144 : f32 to vector<8x512xf32>
    %146 = arith.mulf %143, %145 : vector<8x512xf32>
    %147 = arith.addf %141, %146 : vector<8x512xf32>
    %148 = vector.extract_strided_slice %23 {offsets = [2, 0, 0], sizes = [1, 8, 512], strides = [1, 1, 1]} : vector<4x8x512xf32> to vector<1x8x512xf32>
    %149 = vector.shape_cast %148 : vector<1x8x512xf32> to vector<8x512xf32>
    %c18 = arith.constant 18 : index
    %150 = memref.load %arg6[%c18] : memref<36xf32, #tpu.memory_space<smem>>
    %151 = vector.broadcast %150 : f32 to vector<8x512xf32>
    %152 = arith.mulf %149, %151 : vector<8x512xf32>
    %153 = arith.addf %147, %152 : vector<8x512xf32>
    %154 = vector.extract_strided_slice %23 {offsets = [3, 0, 0], sizes = [1, 8, 512], strides = [1, 1, 1]} : vector<4x8x512xf32> to vector<1x8x512xf32>
    %155 = vector.shape_cast %154 : vector<1x8x512xf32> to vector<8x512xf32>
    %c19 = arith.constant 19 : index
    %156 = memref.load %arg6[%c19] : memref<36xf32, #tpu.memory_space<smem>>
    %157 = vector.broadcast %156 : f32 to vector<8x512xf32>
    %158 = arith.mulf %155, %157 : vector<8x512xf32>
    %159 = arith.addf %153, %158 : vector<8x512xf32>
    %160 = vector.extract_strided_slice %23 {offsets = [0, 0, 0], sizes = [1, 8, 512], strides = [1, 1, 1]} : vector<4x8x512xf32> to vector<1x8x512xf32>
    %161 = vector.shape_cast %160 : vector<1x8x512xf32> to vector<8x512xf32>
    %c20 = arith.constant 20 : index
    %162 = memref.load %arg6[%c20] : memref<36xf32, #tpu.memory_space<smem>>
    %163 = vector.broadcast %162 : f32 to vector<8x512xf32>
    %164 = arith.mulf %161, %163 : vector<8x512xf32>
    %165 = vector.extract_strided_slice %23 {offsets = [1, 0, 0], sizes = [1, 8, 512], strides = [1, 1, 1]} : vector<4x8x512xf32> to vector<1x8x512xf32>
    %166 = vector.shape_cast %165 : vector<1x8x512xf32> to vector<8x512xf32>
    %c21 = arith.constant 21 : index
    %167 = memref.load %arg6[%c21] : memref<36xf32, #tpu.memory_space<smem>>
    %168 = vector.broadcast %167 : f32 to vector<8x512xf32>
    %169 = arith.mulf %166, %168 : vector<8x512xf32>
    %170 = arith.addf %164, %169 : vector<8x512xf32>
    %171 = vector.extract_strided_slice %23 {offsets = [2, 0, 0], sizes = [1, 8, 512], strides = [1, 1, 1]} : vector<4x8x512xf32> to vector<1x8x512xf32>
    %172 = vector.shape_cast %171 : vector<1x8x512xf32> to vector<8x512xf32>
    %c22 = arith.constant 22 : index
    %173 = memref.load %arg6[%c22] : memref<36xf32, #tpu.memory_space<smem>>
    %174 = vector.broadcast %173 : f32 to vector<8x512xf32>
    %175 = arith.mulf %172, %174 : vector<8x512xf32>
    %176 = arith.addf %170, %175 : vector<8x512xf32>
    %177 = vector.extract_strided_slice %23 {offsets = [3, 0, 0], sizes = [1, 8, 512], strides = [1, 1, 1]} : vector<4x8x512xf32> to vector<1x8x512xf32>
    %178 = vector.shape_cast %177 : vector<1x8x512xf32> to vector<8x512xf32>
    %c23 = arith.constant 23 : index
    %179 = memref.load %arg6[%c23] : memref<36xf32, #tpu.memory_space<smem>>
    %180 = vector.broadcast %179 : f32 to vector<8x512xf32>
    %181 = arith.mulf %178, %180 : vector<8x512xf32>
    %182 = arith.addf %176, %181 : vector<8x512xf32>
    %c511_i32 = arith.constant 511 : i32
    %183 = tpu.dynamic_rotate %182 by %c511_i32 dim 1 : vector<8x512xf32>, i32 -> vector<8x512xf32>
    %c5_27 = arith.constant 5 : index
    %c0_28 = arith.constant 0 : index
    %c0_29 = arith.constant 0 : index
    %184 = vector.load %arg4[%c5_27, %c0_28, %c0_29] : memref<9x1x512xf32, #tpu.memory_space<vmem>>, vector<1x1x512xf32>
    %185 = vector.shape_cast %184 : vector<1x1x512xf32> to vector<1x512xf32>
    %186 = vector.broadcast %185 : vector<1x512xf32> to vector<8x512xf32>
    %187 = arith.mulf %183, %186 : vector<8x512xf32>
    %188 = vector.extract_strided_slice %23 {offsets = [0, 0, 0], sizes = [1, 8, 512], strides = [1, 1, 1]} : vector<4x8x512xf32> to vector<1x8x512xf32>
    %189 = vector.shape_cast %188 : vector<1x8x512xf32> to vector<8x512xf32>
    %c24 = arith.constant 24 : index
    %190 = memref.load %arg6[%c24] : memref<36xf32, #tpu.memory_space<smem>>
    %191 = vector.broadcast %190 : f32 to vector<8x512xf32>
    %192 = arith.mulf %189, %191 : vector<8x512xf32>
    %193 = vector.extract_strided_slice %23 {offsets = [1, 0, 0], sizes = [1, 8, 512], strides = [1, 1, 1]} : vector<4x8x512xf32> to vector<1x8x512xf32>
    %194 = vector.shape_cast %193 : vector<1x8x512xf32> to vector<8x512xf32>
    %c25 = arith.constant 25 : index
    %195 = memref.load %arg6[%c25] : memref<36xf32, #tpu.memory_space<smem>>
    %196 = vector.broadcast %195 : f32 to vector<8x512xf32>
    %197 = arith.mulf %194, %196 : vector<8x512xf32>
    %198 = arith.addf %192, %197 : vector<8x512xf32>
    %199 = vector.extract_strided_slice %23 {offsets = [2, 0, 0], sizes = [1, 8, 512], strides = [1, 1, 1]} : vector<4x8x512xf32> to vector<1x8x512xf32>
    %200 = vector.shape_cast %199 : vector<1x8x512xf32> to vector<8x512xf32>
    %c26 = arith.constant 26 : index
    %201 = memref.load %arg6[%c26] : memref<36xf32, #tpu.memory_space<smem>>
    %202 = vector.broadcast %201 : f32 to vector<8x512xf32>
    %203 = arith.mulf %200, %202 : vector<8x512xf32>
    %204 = arith.addf %198, %203 : vector<8x512xf32>
    %205 = vector.extract_strided_slice %23 {offsets = [3, 0, 0], sizes = [1, 8, 512], strides = [1, 1, 1]} : vector<4x8x512xf32> to vector<1x8x512xf32>
    %206 = vector.shape_cast %205 : vector<1x8x512xf32> to vector<8x512xf32>
    %c27 = arith.constant 27 : index
    %207 = memref.load %arg6[%c27] : memref<36xf32, #tpu.memory_space<smem>>
    %208 = vector.broadcast %207 : f32 to vector<8x512xf32>
    %209 = arith.mulf %206, %208 : vector<8x512xf32>
    %210 = arith.addf %204, %209 : vector<8x512xf32>
    %c497_i32 = arith.constant 497 : i32
    %211 = tpu.dynamic_rotate %210 by %c497_i32 dim 1 : vector<8x512xf32>, i32 -> vector<8x512xf32>
    %c6_30 = arith.constant 6 : index
    %c0_31 = arith.constant 0 : index
    %c0_32 = arith.constant 0 : index
    %212 = vector.load %arg4[%c6_30, %c0_31, %c0_32] : memref<9x1x512xf32, #tpu.memory_space<vmem>>, vector<1x1x512xf32>
    %213 = vector.shape_cast %212 : vector<1x1x512xf32> to vector<1x512xf32>
    %214 = vector.broadcast %213 : vector<1x512xf32> to vector<8x512xf32>
    %215 = arith.mulf %211, %214 : vector<8x512xf32>
    %216 = vector.extract_strided_slice %23 {offsets = [0, 0, 0], sizes = [1, 8, 512], strides = [1, 1, 1]} : vector<4x8x512xf32> to vector<1x8x512xf32>
    %217 = vector.shape_cast %216 : vector<1x8x512xf32> to vector<8x512xf32>
    %c28 = arith.constant 28 : index
    %218 = memref.load %arg6[%c28] : memref<36xf32, #tpu.memory_space<smem>>
    %219 = vector.broadcast %218 : f32 to vector<8x512xf32>
    %220 = arith.mulf %217, %219 : vector<8x512xf32>
    %221 = vector.extract_strided_slice %23 {offsets = [1, 0, 0], sizes = [1, 8, 512], strides = [1, 1, 1]} : vector<4x8x512xf32> to vector<1x8x512xf32>
    %222 = vector.shape_cast %221 : vector<1x8x512xf32> to vector<8x512xf32>
    %c29 = arith.constant 29 : index
    %223 = memref.load %arg6[%c29] : memref<36xf32, #tpu.memory_space<smem>>
    %224 = vector.broadcast %223 : f32 to vector<8x512xf32>
    %225 = arith.mulf %222, %224 : vector<8x512xf32>
    %226 = arith.addf %220, %225 : vector<8x512xf32>
    %227 = vector.extract_strided_slice %23 {offsets = [2, 0, 0], sizes = [1, 8, 512], strides = [1, 1, 1]} : vector<4x8x512xf32> to vector<1x8x512xf32>
    %228 = vector.shape_cast %227 : vector<1x8x512xf32> to vector<8x512xf32>
    %c30 = arith.constant 30 : index
    %229 = memref.load %arg6[%c30] : memref<36xf32, #tpu.memory_space<smem>>
    %230 = vector.broadcast %229 : f32 to vector<8x512xf32>
    %231 = arith.mulf %228, %230 : vector<8x512xf32>
    %232 = arith.addf %226, %231 : vector<8x512xf32>
    %233 = vector.extract_strided_slice %23 {offsets = [3, 0, 0], sizes = [1, 8, 512], strides = [1, 1, 1]} : vector<4x8x512xf32> to vector<1x8x512xf32>
    %234 = vector.shape_cast %233 : vector<1x8x512xf32> to vector<8x512xf32>
    %c31 = arith.constant 31 : index
    %235 = memref.load %arg6[%c31] : memref<36xf32, #tpu.memory_space<smem>>
    %236 = vector.broadcast %235 : f32 to vector<8x512xf32>
    %237 = arith.mulf %234, %236 : vector<8x512xf32>
    %238 = arith.addf %232, %237 : vector<8x512xf32>
    %c496_i32 = arith.constant 496 : i32
    %239 = tpu.dynamic_rotate %238 by %c496_i32 dim 1 : vector<8x512xf32>, i32 -> vector<8x512xf32>
    %c7_33 = arith.constant 7 : index
    %c0_34 = arith.constant 0 : index
    %c0_35 = arith.constant 0 : index
    %240 = vector.load %arg4[%c7_33, %c0_34, %c0_35] : memref<9x1x512xf32, #tpu.memory_space<vmem>>, vector<1x1x512xf32>
    %241 = vector.shape_cast %240 : vector<1x1x512xf32> to vector<1x512xf32>
    %242 = vector.broadcast %241 : vector<1x512xf32> to vector<8x512xf32>
    %243 = arith.mulf %239, %242 : vector<8x512xf32>
    %244 = vector.extract_strided_slice %23 {offsets = [0, 0, 0], sizes = [1, 8, 512], strides = [1, 1, 1]} : vector<4x8x512xf32> to vector<1x8x512xf32>
    %245 = vector.shape_cast %244 : vector<1x8x512xf32> to vector<8x512xf32>
    %c32 = arith.constant 32 : index
    %246 = memref.load %arg6[%c32] : memref<36xf32, #tpu.memory_space<smem>>
    %247 = vector.broadcast %246 : f32 to vector<8x512xf32>
    %248 = arith.mulf %245, %247 : vector<8x512xf32>
    %249 = vector.extract_strided_slice %23 {offsets = [1, 0, 0], sizes = [1, 8, 512], strides = [1, 1, 1]} : vector<4x8x512xf32> to vector<1x8x512xf32>
    %250 = vector.shape_cast %249 : vector<1x8x512xf32> to vector<8x512xf32>
    %c33 = arith.constant 33 : index
    %251 = memref.load %arg6[%c33] : memref<36xf32, #tpu.memory_space<smem>>
    %252 = vector.broadcast %251 : f32 to vector<8x512xf32>
    %253 = arith.mulf %250, %252 : vector<8x512xf32>
    %254 = arith.addf %248, %253 : vector<8x512xf32>
    %255 = vector.extract_strided_slice %23 {offsets = [2, 0, 0], sizes = [1, 8, 512], strides = [1, 1, 1]} : vector<4x8x512xf32> to vector<1x8x512xf32>
    %256 = vector.shape_cast %255 : vector<1x8x512xf32> to vector<8x512xf32>
    %c34 = arith.constant 34 : index
    %257 = memref.load %arg6[%c34] : memref<36xf32, #tpu.memory_space<smem>>
    %258 = vector.broadcast %257 : f32 to vector<8x512xf32>
    %259 = arith.mulf %256, %258 : vector<8x512xf32>
    %260 = arith.addf %254, %259 : vector<8x512xf32>
    %261 = vector.extract_strided_slice %23 {offsets = [3, 0, 0], sizes = [1, 8, 512], strides = [1, 1, 1]} : vector<4x8x512xf32> to vector<1x8x512xf32>
    %262 = vector.shape_cast %261 : vector<1x8x512xf32> to vector<8x512xf32>
    %c35 = arith.constant 35 : index
    %263 = memref.load %arg6[%c35] : memref<36xf32, #tpu.memory_space<smem>>
    %264 = vector.broadcast %263 : f32 to vector<8x512xf32>
    %265 = arith.mulf %262, %264 : vector<8x512xf32>
    %266 = arith.addf %260, %265 : vector<8x512xf32>
    %c495_i32 = arith.constant 495 : i32
    %267 = tpu.dynamic_rotate %266 by %c495_i32 dim 1 : vector<8x512xf32>, i32 -> vector<8x512xf32>
    %c8_36 = arith.constant 8 : index
    %c0_37 = arith.constant 0 : index
    %c0_38 = arith.constant 0 : index
    %268 = vector.load %arg4[%c8_36, %c0_37, %c0_38] : memref<9x1x512xf32, #tpu.memory_space<vmem>>, vector<1x1x512xf32>
    %269 = vector.shape_cast %268 : vector<1x1x512xf32> to vector<1x512xf32>
    %270 = vector.broadcast %269 : vector<1x512xf32> to vector<8x512xf32>
    %271 = arith.mulf %267, %270 : vector<8x512xf32>
    %272 = arith.addf %52, %80 : vector<8x512xf32>
    %273 = arith.addf %108, %136 : vector<8x512xf32>
    %274 = arith.addf %159, %187 : vector<8x512xf32>
    %275 = arith.addf %215, %243 : vector<8x512xf32>
    %276 = arith.addf %272, %273 : vector<8x512xf32>
    %277 = arith.addf %274, %275 : vector<8x512xf32>
    %278 = arith.addf %276, %277 : vector<8x512xf32>
    %279 = arith.addf %278, %271 : vector<8x512xf32>
    %280 = vector.broadcast %24 : f32 to vector<8x512xf32>
    %281 = arith.addf %279, %280 : vector<8x512xf32>
    %c0_39 = arith.constant 0 : index
    %c0_40 = arith.constant 0 : index
    %c0_41 = arith.constant 0 : index
    %282 = vector.load %arg5[%c0_39, %c0_40, %c0_41] : memref<9x1x512xf32, #tpu.memory_space<vmem>>, vector<1x1x512xf32>
    %283 = vector.shape_cast %282 : vector<1x1x512xf32> to vector<1x512xf32>
    %c1_42 = arith.constant 1 : index
    %c0_43 = arith.constant 0 : index
    %c0_44 = arith.constant 0 : index
    %284 = vector.load %arg5[%c1_42, %c0_43, %c0_44] : memref<9x1x512xf32, #tpu.memory_space<vmem>>, vector<1x1x512xf32>
    %285 = vector.shape_cast %284 : vector<1x1x512xf32> to vector<1x512xf32>
    %c2_45 = arith.constant 2 : index
    %c0_46 = arith.constant 0 : index
    %c0_47 = arith.constant 0 : index
    %286 = vector.load %arg5[%c2_45, %c0_46, %c0_47] : memref<9x1x512xf32, #tpu.memory_space<vmem>>, vector<1x1x512xf32>
    %287 = vector.shape_cast %286 : vector<1x1x512xf32> to vector<1x512xf32>
    %c3_48 = arith.constant 3 : index
    %c0_49 = arith.constant 0 : index
    %c0_50 = arith.constant 0 : index
    %288 = vector.load %arg5[%c3_48, %c0_49, %c0_50] : memref<9x1x512xf32, #tpu.memory_space<vmem>>, vector<1x1x512xf32>
    %289 = vector.shape_cast %288 : vector<1x1x512xf32> to vector<1x512xf32>
    %c4_51 = arith.constant 4 : index
    %c0_52 = arith.constant 0 : index
    %c0_53 = arith.constant 0 : index
    %290 = vector.load %arg5[%c4_51, %c0_52, %c0_53] : memref<9x1x512xf32, #tpu.memory_space<vmem>>, vector<1x1x512xf32>
    %291 = vector.shape_cast %290 : vector<1x1x512xf32> to vector<1x512xf32>
    %c5_54 = arith.constant 5 : index
    %c0_55 = arith.constant 0 : index
    %c0_56 = arith.constant 0 : index
    %292 = vector.load %arg5[%c5_54, %c0_55, %c0_56] : memref<9x1x512xf32, #tpu.memory_space<vmem>>, vector<1x1x512xf32>
    %293 = vector.shape_cast %292 : vector<1x1x512xf32> to vector<1x512xf32>
    %c6_57 = arith.constant 6 : index
    %c0_58 = arith.constant 0 : index
    %c0_59 = arith.constant 0 : index
    %294 = vector.load %arg5[%c6_57, %c0_58, %c0_59] : memref<9x1x512xf32, #tpu.memory_space<vmem>>, vector<1x1x512xf32>
    %295 = vector.shape_cast %294 : vector<1x1x512xf32> to vector<1x512xf32>
    %c7_60 = arith.constant 7 : index
    %c0_61 = arith.constant 0 : index
    %c0_62 = arith.constant 0 : index
    %296 = vector.load %arg5[%c7_60, %c0_61, %c0_62] : memref<9x1x512xf32, #tpu.memory_space<vmem>>, vector<1x1x512xf32>
    %297 = vector.shape_cast %296 : vector<1x1x512xf32> to vector<1x512xf32>
    %c8_63 = arith.constant 8 : index
    %c0_64 = arith.constant 0 : index
    %c0_65 = arith.constant 0 : index
    %298 = vector.load %arg5[%c8_63, %c0_64, %c0_65] : memref<9x1x512xf32, #tpu.memory_space<vmem>>, vector<1x1x512xf32>
    %299 = vector.shape_cast %298 : vector<1x1x512xf32> to vector<1x512xf32>
    %c0_66 = arith.constant 0 : index
    %300 = memref.load %arg8[%c0_66] : memref<1xf32, #tpu.memory_space<smem>>
    %c0_67 = arith.constant 0 : index
    %301 = memref.load %arg9[%c0_67] : memref<3xf32, #tpu.memory_space<smem>>
    %c0_68 = arith.constant 0 : index
    %302 = memref.load %arg10[%c0_68] : memref<3xf32, #tpu.memory_space<smem>>
    %cst_69 = arith.constant dense<0.000000e+00> : vector<8xf32>
    %303 = vector.multi_reduction <add>, %281, %cst_69 [1] : vector<8x512xf32> to vector<8xf32>
    %304 = vector.shape_cast %303 : vector<8xf32> to vector<8x1xf32>
    %cst_70 = arith.constant 0.001953125 : f32
    %305 = vector.broadcast %cst_70 : f32 to vector<8x1xf32>
    %306 = arith.mulf %304, %305 : vector<8x1xf32>
    %307 = vector.broadcast %306 : vector<8x1xf32> to vector<8x512xf32>
    %308 = arith.subf %281, %307 : vector<8x512xf32>
    %309 = arith.mulf %308, %308 : vector<8x512xf32>
    %cst_71 = arith.constant dense<0.000000e+00> : vector<8xf32>
    %310 = vector.multi_reduction <add>, %309, %cst_71 [1] : vector<8x512xf32> to vector<8xf32>
    %311 = vector.shape_cast %310 : vector<8xf32> to vector<8x1xf32>
    %cst_72 = arith.constant 0.001953125 : f32
    %312 = vector.broadcast %cst_72 : f32 to vector<8x1xf32>
    %313 = arith.mulf %311, %312 : vector<8x1xf32>
    %cst_73 = arith.constant 9.99999974E-6 : f32
    %314 = vector.broadcast %cst_73 : f32 to vector<8x1xf32>
    %315 = arith.addf %313, %314 : vector<8x1xf32>
    %316 = math.rsqrt %315 : vector<8x1xf32>
    %317 = vector.broadcast %301 : f32 to vector<8x1xf32>
    %318 = arith.mulf %317, %316 : vector<8x1xf32>
    %319 = vector.broadcast %318 : vector<8x1xf32> to vector<8x512xf32>
    %320 = arith.mulf %308, %319 : vector<8x512xf32>
    %321 = vector.broadcast %302 : f32 to vector<8x512xf32>
    %322 = arith.addf %320, %321 : vector<8x512xf32>
    %c17_i32_74 = arith.constant 17 : i32
    %323 = tpu.dynamic_rotate %322 by %c17_i32_74 dim 1 : vector<8x512xf32>, i32 -> vector<8x512xf32>
    %324 = vector.broadcast %283 : vector<1x512xf32> to vector<8x512xf32>
    %325 = arith.mulf %323, %324 : vector<8x512xf32>
    %c16_i32_75 = arith.constant 16 : i32
    %326 = tpu.dynamic_rotate %322 by %c16_i32_75 dim 1 : vector<8x512xf32>, i32 -> vector<8x512xf32>
    %327 = vector.broadcast %285 : vector<1x512xf32> to vector<8x512xf32>
    %328 = arith.mulf %326, %327 : vector<8x512xf32>
    %c15_i32_76 = arith.constant 15 : i32
    %329 = tpu.dynamic_rotate %322 by %c15_i32_76 dim 1 : vector<8x512xf32>, i32 -> vector<8x512xf32>
    %330 = vector.broadcast %287 : vector<1x512xf32> to vector<8x512xf32>
    %331 = arith.mulf %329, %330 : vector<8x512xf32>
    %c1_i32_77 = arith.constant 1 : i32
    %332 = tpu.dynamic_rotate %322 by %c1_i32_77 dim 1 : vector<8x512xf32>, i32 -> vector<8x512xf32>
    %333 = vector.broadcast %289 : vector<1x512xf32> to vector<8x512xf32>
    %334 = arith.mulf %332, %333 : vector<8x512xf32>
    %335 = vector.broadcast %291 : vector<1x512xf32> to vector<8x512xf32>
    %336 = arith.mulf %322, %335 : vector<8x512xf32>
    %c511_i32_78 = arith.constant 511 : i32
    %337 = tpu.dynamic_rotate %322 by %c511_i32_78 dim 1 : vector<8x512xf32>, i32 -> vector<8x512xf32>
    %338 = vector.broadcast %293 : vector<1x512xf32> to vector<8x512xf32>
    %339 = arith.mulf %337, %338 : vector<8x512xf32>
    %c497_i32_79 = arith.constant 497 : i32
    %340 = tpu.dynamic_rotate %322 by %c497_i32_79 dim 1 : vector<8x512xf32>, i32 -> vector<8x512xf32>
    %341 = vector.broadcast %295 : vector<1x512xf32> to vector<8x512xf32>
    %342 = arith.mulf %340, %341 : vector<8x512xf32>
    %c496_i32_80 = arith.constant 496 : i32
    %343 = tpu.dynamic_rotate %322 by %c496_i32_80 dim 1 : vector<8x512xf32>, i32 -> vector<8x512xf32>
    %344 = vector.broadcast %297 : vector<1x512xf32> to vector<8x512xf32>
    %345 = arith.mulf %343, %344 : vector<8x512xf32>
    %c495_i32_81 = arith.constant 495 : i32
    %346 = tpu.dynamic_rotate %322 by %c495_i32_81 dim 1 : vector<8x512xf32>, i32 -> vector<8x512xf32>
    %347 = vector.broadcast %299 : vector<1x512xf32> to vector<8x512xf32>
    %348 = arith.mulf %346, %347 : vector<8x512xf32>
    %349 = arith.addf %325, %328 : vector<8x512xf32>
    %350 = arith.addf %331, %334 : vector<8x512xf32>
    %351 = arith.addf %336, %339 : vector<8x512xf32>
    %352 = arith.addf %342, %345 : vector<8x512xf32>
    %353 = arith.addf %349, %350 : vector<8x512xf32>
    %354 = arith.addf %351, %352 : vector<8x512xf32>
    %355 = arith.addf %353, %354 : vector<8x512xf32>
    %356 = arith.addf %355, %348 : vector<8x512xf32>
    %357 = vector.broadcast %300 : f32 to vector<8x512xf32>
    %358 = arith.addf %356, %357 : vector<8x512xf32>
    %359 = arith.negf %358 : vector<8x512xf32>
    %360 = math.exp %359 : vector<8x512xf32>
    %cst_82 = arith.constant 1.000000e+00 : f32
    %361 = vector.broadcast %cst_82 : f32 to vector<8x512xf32>
    %362 = arith.addf %361, %360 : vector<8x512xf32>
    %363 = arith.divf %361, %362 : vector<8x512xf32>
    %364 = arith.addf %281, %363 : vector<8x512xf32>
    %c1_83 = arith.constant 1 : index
    %365 = memref.load %arg9[%c1_83] : memref<3xf32, #tpu.memory_space<smem>>
    %c1_84 = arith.constant 1 : index
    %366 = memref.load %arg10[%c1_84] : memref<3xf32, #tpu.memory_space<smem>>
    %cst_85 = arith.constant dense<0.000000e+00> : vector<8xf32>
    %367 = vector.multi_reduction <add>, %364, %cst_85 [1] : vector<8x512xf32> to vector<8xf32>
    %368 = vector.shape_cast %367 : vector<8xf32> to vector<8x1xf32>
    %cst_86 = arith.constant 0.001953125 : f32
    %369 = vector.broadcast %cst_86 : f32 to vector<8x1xf32>
    %370 = arith.mulf %368, %369 : vector<8x1xf32>
    %371 = vector.broadcast %370 : vector<8x1xf32> to vector<8x512xf32>
    %372 = arith.subf %364, %371 : vector<8x512xf32>
    %373 = arith.mulf %372, %372 : vector<8x512xf32>
    %cst_87 = arith.constant dense<0.000000e+00> : vector<8xf32>
    %374 = vector.multi_reduction <add>, %373, %cst_87 [1] : vector<8x512xf32> to vector<8xf32>
    %375 = vector.shape_cast %374 : vector<8xf32> to vector<8x1xf32>
    %cst_88 = arith.constant 0.001953125 : f32
    %376 = vector.broadcast %cst_88 : f32 to vector<8x1xf32>
    %377 = arith.mulf %375, %376 : vector<8x1xf32>
    %cst_89 = arith.constant 9.99999974E-6 : f32
    %378 = vector.broadcast %cst_89 : f32 to vector<8x1xf32>
    %379 = arith.addf %377, %378 : vector<8x1xf32>
    %380 = math.rsqrt %379 : vector<8x1xf32>
    %381 = vector.broadcast %365 : f32 to vector<8x1xf32>
    %382 = arith.mulf %381, %380 : vector<8x1xf32>
    %383 = vector.broadcast %382 : vector<8x1xf32> to vector<8x512xf32>
    %384 = arith.mulf %372, %383 : vector<8x512xf32>
    %385 = vector.broadcast %366 : f32 to vector<8x512xf32>
    %386 = arith.addf %384, %385 : vector<8x512xf32>
    %c17_i32_90 = arith.constant 17 : i32
    %387 = tpu.dynamic_rotate %386 by %c17_i32_90 dim 1 : vector<8x512xf32>, i32 -> vector<8x512xf32>
    %388 = vector.broadcast %283 : vector<1x512xf32> to vector<8x512xf32>
    %389 = arith.mulf %387, %388 : vector<8x512xf32>
    %c16_i32_91 = arith.constant 16 : i32
    %390 = tpu.dynamic_rotate %386 by %c16_i32_91 dim 1 : vector<8x512xf32>, i32 -> vector<8x512xf32>
    %391 = vector.broadcast %285 : vector<1x512xf32> to vector<8x512xf32>
    %392 = arith.mulf %390, %391 : vector<8x512xf32>
    %c15_i32_92 = arith.constant 15 : i32
    %393 = tpu.dynamic_rotate %386 by %c15_i32_92 dim 1 : vector<8x512xf32>, i32 -> vector<8x512xf32>
    %394 = vector.broadcast %287 : vector<1x512xf32> to vector<8x512xf32>
    %395 = arith.mulf %393, %394 : vector<8x512xf32>
    %c1_i32_93 = arith.constant 1 : i32
    %396 = tpu.dynamic_rotate %386 by %c1_i32_93 dim 1 : vector<8x512xf32>, i32 -> vector<8x512xf32>
    %397 = vector.broadcast %289 : vector<1x512xf32> to vector<8x512xf32>
    %398 = arith.mulf %396, %397 : vector<8x512xf32>
    %399 = vector.broadcast %291 : vector<1x512xf32> to vector<8x512xf32>
    %400 = arith.mulf %386, %399 : vector<8x512xf32>
    %c511_i32_94 = arith.constant 511 : i32
    %401 = tpu.dynamic_rotate %386 by %c511_i32_94 dim 1 : vector<8x512xf32>, i32 -> vector<8x512xf32>
    %402 = vector.broadcast %293 : vector<1x512xf32> to vector<8x512xf32>
    %403 = arith.mulf %401, %402 : vector<8x512xf32>
    %c497_i32_95 = arith.constant 497 : i32
    %404 = tpu.dynamic_rotate %386 by %c497_i32_95 dim 1 : vector<8x512xf32>, i32 -> vector<8x512xf32>
    %405 = vector.broadcast %295 : vector<1x512xf32> to vector<8x512xf32>
    %406 = arith.mulf %404, %405 : vector<8x512xf32>
    %c496_i32_96 = arith.constant 496 : i32
    %407 = tpu.dynamic_rotate %386 by %c496_i32_96 dim 1 : vector<8x512xf32>, i32 -> vector<8x512xf32>
    %408 = vector.broadcast %297 : vector<1x512xf32> to vector<8x512xf32>
    %409 = arith.mulf %407, %408 : vector<8x512xf32>
    %c495_i32_97 = arith.constant 495 : i32
    %410 = tpu.dynamic_rotate %386 by %c495_i32_97 dim 1 : vector<8x512xf32>, i32 -> vector<8x512xf32>
    %411 = vector.broadcast %299 : vector<1x512xf32> to vector<8x512xf32>
    %412 = arith.mulf %410, %411 : vector<8x512xf32>
    %413 = arith.addf %389, %392 : vector<8x512xf32>
    %414 = arith.addf %395, %398 : vector<8x512xf32>
    %415 = arith.addf %400, %403 : vector<8x512xf32>
    %416 = arith.addf %406, %409 : vector<8x512xf32>
    %417 = arith.addf %413, %414 : vector<8x512xf32>
    %418 = arith.addf %415, %416 : vector<8x512xf32>
    %419 = arith.addf %417, %418 : vector<8x512xf32>
    %420 = arith.addf %419, %412 : vector<8x512xf32>
    %421 = vector.broadcast %300 : f32 to vector<8x512xf32>
    %422 = arith.addf %420, %421 : vector<8x512xf32>
    %423 = arith.negf %422 : vector<8x512xf32>
    %424 = math.exp %423 : vector<8x512xf32>
    %cst_98 = arith.constant 1.000000e+00 : f32
    %425 = vector.broadcast %cst_98 : f32 to vector<8x512xf32>
    %426 = arith.addf %425, %424 : vector<8x512xf32>
    %427 = arith.divf %425, %426 : vector<8x512xf32>
    %428 = arith.addf %281, %427 : vector<8x512xf32>
    %c2_99 = arith.constant 2 : index
    %429 = memref.load %arg9[%c2_99] : memref<3xf32, #tpu.memory_space<smem>>
    %c2_100 = arith.constant 2 : index
    %430 = memref.load %arg10[%c2_100] : memref<3xf32, #tpu.memory_space<smem>>
    %cst_101 = arith.constant dense<0.000000e+00> : vector<8xf32>
    %431 = vector.multi_reduction <add>, %428, %cst_101 [1] : vector<8x512xf32> to vector<8xf32>
    %432 = vector.shape_cast %431 : vector<8xf32> to vector<8x1xf32>
    %cst_102 = arith.constant 0.001953125 : f32
    %433 = vector.broadcast %cst_102 : f32 to vector<8x1xf32>
    %434 = arith.mulf %432, %433 : vector<8x1xf32>
    %435 = vector.broadcast %434 : vector<8x1xf32> to vector<8x512xf32>
    %436 = arith.subf %428, %435 : vector<8x512xf32>
    %437 = arith.mulf %436, %436 : vector<8x512xf32>
    %cst_103 = arith.constant dense<0.000000e+00> : vector<8xf32>
    %438 = vector.multi_reduction <add>, %437, %cst_103 [1] : vector<8x512xf32> to vector<8xf32>
    %439 = vector.shape_cast %438 : vector<8xf32> to vector<8x1xf32>
    %cst_104 = arith.constant 0.001953125 : f32
    %440 = vector.broadcast %cst_104 : f32 to vector<8x1xf32>
    %441 = arith.mulf %439, %440 : vector<8x1xf32>
    %cst_105 = arith.constant 9.99999974E-6 : f32
    %442 = vector.broadcast %cst_105 : f32 to vector<8x1xf32>
    %443 = arith.addf %441, %442 : vector<8x1xf32>
    %444 = math.rsqrt %443 : vector<8x1xf32>
    %445 = vector.broadcast %429 : f32 to vector<8x1xf32>
    %446 = arith.mulf %445, %444 : vector<8x1xf32>
    %447 = vector.broadcast %446 : vector<8x1xf32> to vector<8x512xf32>
    %448 = arith.mulf %436, %447 : vector<8x512xf32>
    %449 = vector.broadcast %430 : f32 to vector<8x512xf32>
    %450 = arith.addf %448, %449 : vector<8x512xf32>
    %c17_i32_106 = arith.constant 17 : i32
    %451 = tpu.dynamic_rotate %450 by %c17_i32_106 dim 1 : vector<8x512xf32>, i32 -> vector<8x512xf32>
    %452 = vector.broadcast %283 : vector<1x512xf32> to vector<8x512xf32>
    %453 = arith.mulf %451, %452 : vector<8x512xf32>
    %c16_i32_107 = arith.constant 16 : i32
    %454 = tpu.dynamic_rotate %450 by %c16_i32_107 dim 1 : vector<8x512xf32>, i32 -> vector<8x512xf32>
    %455 = vector.broadcast %285 : vector<1x512xf32> to vector<8x512xf32>
    %456 = arith.mulf %454, %455 : vector<8x512xf32>
    %c15_i32_108 = arith.constant 15 : i32
    %457 = tpu.dynamic_rotate %450 by %c15_i32_108 dim 1 : vector<8x512xf32>, i32 -> vector<8x512xf32>
    %458 = vector.broadcast %287 : vector<1x512xf32> to vector<8x512xf32>
    %459 = arith.mulf %457, %458 : vector<8x512xf32>
    %c1_i32_109 = arith.constant 1 : i32
    %460 = tpu.dynamic_rotate %450 by %c1_i32_109 dim 1 : vector<8x512xf32>, i32 -> vector<8x512xf32>
    %461 = vector.broadcast %289 : vector<1x512xf32> to vector<8x512xf32>
    %462 = arith.mulf %460, %461 : vector<8x512xf32>
    %463 = vector.broadcast %291 : vector<1x512xf32> to vector<8x512xf32>
    %464 = arith.mulf %450, %463 : vector<8x512xf32>
    %c511_i32_110 = arith.constant 511 : i32
    %465 = tpu.dynamic_rotate %450 by %c511_i32_110 dim 1 : vector<8x512xf32>, i32 -> vector<8x512xf32>
    %466 = vector.broadcast %293 : vector<1x512xf32> to vector<8x512xf32>
    %467 = arith.mulf %465, %466 : vector<8x512xf32>
    %c497_i32_111 = arith.constant 497 : i32
    %468 = tpu.dynamic_rotate %450 by %c497_i32_111 dim 1 : vector<8x512xf32>, i32 -> vector<8x512xf32>
    %469 = vector.broadcast %295 : vector<1x512xf32> to vector<8x512xf32>
    %470 = arith.mulf %468, %469 : vector<8x512xf32>
    %c496_i32_112 = arith.constant 496 : i32
    %471 = tpu.dynamic_rotate %450 by %c496_i32_112 dim 1 : vector<8x512xf32>, i32 -> vector<8x512xf32>
    %472 = vector.broadcast %297 : vector<1x512xf32> to vector<8x512xf32>
    %473 = arith.mulf %471, %472 : vector<8x512xf32>
    %c495_i32_113 = arith.constant 495 : i32
    %474 = tpu.dynamic_rotate %450 by %c495_i32_113 dim 1 : vector<8x512xf32>, i32 -> vector<8x512xf32>
    %475 = vector.broadcast %299 : vector<1x512xf32> to vector<8x512xf32>
    %476 = arith.mulf %474, %475 : vector<8x512xf32>
    %477 = arith.addf %453, %456 : vector<8x512xf32>
    %478 = arith.addf %459, %462 : vector<8x512xf32>
    %479 = arith.addf %464, %467 : vector<8x512xf32>
    %480 = arith.addf %470, %473 : vector<8x512xf32>
    %481 = arith.addf %477, %478 : vector<8x512xf32>
    %482 = arith.addf %479, %480 : vector<8x512xf32>
    %483 = arith.addf %481, %482 : vector<8x512xf32>
    %484 = arith.addf %483, %476 : vector<8x512xf32>
    %485 = vector.broadcast %300 : f32 to vector<8x512xf32>
    %486 = arith.addf %484, %485 : vector<8x512xf32>
    %487 = arith.negf %486 : vector<8x512xf32>
    %488 = math.exp %487 : vector<8x512xf32>
    %cst_114 = arith.constant 1.000000e+00 : f32
    %489 = vector.broadcast %cst_114 : f32 to vector<8x512xf32>
    %490 = arith.addf %489, %488 : vector<8x512xf32>
    %491 = arith.divf %489, %490 : vector<8x512xf32>
    %492 = arith.addf %281, %491 : vector<8x512xf32>
    %493 = vector.shape_cast %492 : vector<8x512xf32> to vector<1x8x512xf32>
    %494 = vector.broadcast %493 : vector<1x8x512xf32> to vector<4x8x512xf32>
    %495 = arith.mulf %23, %494 : vector<4x8x512xf32>
    %c0_115 = arith.constant 0 : index
    %c0_116 = arith.constant 0 : index
    %c0_117 = arith.constant 0 : index
    %c0_118 = arith.constant 0 : index
    %496 = vector.load %arg11[%c0_115, %c0_116, %c0_117, %c0_118] : memref<1x4x8x512xf32, #tpu.memory_space<vmem>>, vector<1x4x8x512xf32>
    %497 = vector.shape_cast %496 : vector<1x4x8x512xf32> to vector<4x8x512xf32>
    %498 = vector.shape_cast %495 : vector<4x8x512xf32> to vector<1x4x8x512xf32>
    tpu.vector_store %arg11[%c0_115, %c0_116, %c0_117, %c0_118], %498 {strides = array<i32>} : memref<1x4x8x512xf32, #tpu.memory_space<vmem>>, vector<1x4x8x512xf32>,
    return
  }
  func.func @transform_0(%arg0: i32) -> (i32, i32, i32, i32) {
    %c0_i32 = arith.constant 0 : i32
    %c0_i32_0 = arith.constant 0 : i32
    %c0_i32_1 = arith.constant 0 : i32
    %c0_i32_2 = arith.constant 0 : i32
    return %arg0, %c0_i32, %c0_i32_0, %c0_i32_1 : i32, i32, i32, i32
  }
  func.func @transform_1(%arg0: i32) -> (i32, i32, i32) {
    %c0_i32 = arith.constant 0 : i32
    %c0_i32_0 = arith.constant 0 : i32
    %c0_i32_1 = arith.constant 0 : i32
    %c0_i32_2 = arith.constant 0 : i32
    return %c0_i32, %c0_i32_0, %c0_i32_1 : i32, i32, i32
  }
  func.func @transform_2(%arg0: i32) -> (i32, i32, i32) {
    %c0_i32 = arith.constant 0 : i32
    %c0_i32_0 = arith.constant 0 : i32
    %c0_i32_1 = arith.constant 0 : i32
    %c0_i32_2 = arith.constant 0 : i32
    return %c0_i32, %c0_i32_0, %c0_i32_1 : i32, i32, i32
  }
  func.func @transform_3(%arg0: i32) -> (i32, i32, i32) {
    %c0_i32 = arith.constant 0 : i32
    %c0_i32_0 = arith.constant 0 : i32
    %c0_i32_1 = arith.constant 0 : i32
    %c0_i32_2 = arith.constant 0 : i32
    return %c0_i32, %c0_i32_0, %c0_i32_1 : i32, i32, i32
  }
  func.func @transform_4(%arg0: i32) -> (i32, i32, i32) {
    %c0_i32 = arith.constant 0 : i32
    %c0_i32_0 = arith.constant 0 : i32
    %c0_i32_1 = arith.constant 0 : i32
    %c0_i32_2 = arith.constant 0 : i32
    return %c0_i32, %c0_i32_0, %c0_i32_1 : i32, i32, i32
  }
  func.func @transform_5(%arg0: i32) -> i32 {
    %c0_i32 = arith.constant 0 : i32
    %c0_i32_0 = arith.constant 0 : i32
    return %c0_i32 : i32
  }
  func.func @transform_6(%arg0: i32) -> i32 {
    %c0_i32 = arith.constant 0 : i32
    %c0_i32_0 = arith.constant 0 : i32
    return %c0_i32 : i32
  }
  func.func @transform_7(%arg0: i32) -> i32 {
    %c0_i32 = arith.constant 0 : i32
    %c0_i32_0 = arith.constant 0 : i32
    return %c0_i32 : i32
  }
  func.func @transform_8(%arg0: i32) -> i32 {
    %c0_i32 = arith.constant 0 : i32
    %c0_i32_0 = arith.constant 0 : i32
    return %c0_i32 : i32
  }
  func.func @transform_9(%arg0: i32) -> i32 {
    %c0_i32 = arith.constant 0 : i32
    %c0_i32_0 = arith.constant 0 : i32
    return %c0_i32 : i32
  }
  func.func @transform_10(%arg0: i32) -> (i32, i32, i32, i32) {
    %c0_i32 = arith.constant 0 : i32
    %c0_i32_0 = arith.constant 0 : i32
    %c0_i32_1 = arith.constant 0 : i32
    %c0_i32_2 = arith.constant 0 : i32
    return %arg0, %c0_i32, %c0_i32_0, %c0_i32_1 : i32, i32, i32, i32
  }
}

</mosaic_0001>

<bundles_post_ra>
// kernel: tpu_custom_call.1
= control target key start
LH: loop header
LB: loop body
LE: loop exit
PB: predicated region body
PF: predicated region fallthrough
CT: control target
= control target key end

     0   :  { %17 = vsyncpa [#allocation5], 0  ;;  %s4094_s0 = inlined_call_operand.hbm [shape: f32[1,4,8,512], index: 0, kind: input, shape index: {}]   ;;  %s4095_s1 = inlined_call_operand.vmem [shape: f32[4,1,1], index: 1, kind: input, shape index: {}]   ;;  %s4096_s2 = inlined_call_operand.vmem [shape: f32[4,1,1], index: 2, kind: input, shape index: {}]   ;;  %s4097_s3 = inlined_call_operand.hbm [shape: f32[9,1,512], index: 3, kind: input, shape index: {}]   ;;  %s4098_s4 = inlined_call_operand.hbm [shape: f32[9,1,512], index: 4, kind: input, shape index: {}]   ;;  %s4099_s5 = inlined_call_operand.vmem [shape: f32[36], index: 5, kind: input, shape index: {}]   ;;  %s4100_s6 = inlined_call_operand.<no memory space> [shape: f32[1], index: 6, kind: input, shape index: {}]   ;;  %s4101_s7 = inlined_call_operand.<no memory space> [shape: f32[1], index: 7, kind: input, shape index: {}]   ;;  %s4102_s8 = inlined_call_operand.vmem [shape: f32[3], index: 8, kind: input, shape index: {}]   ;;  %s4103_s9 = inlined_call_operand.vmem [shape: f32[3], index: 9, kind: input, shape index: {}]   ;;  %s4104_s10 = inlined_call_operand.hbm [shape: f32[1,4,8,512], index: 10, kind: output, shape index: {}]  }
   0x1   :  { %18 = vsyncpa [#allocation9], 0 }
   0x2   :  { %19 = vsyncpa [#allocation7], 0 }
   0x3   :  { %20 = vsyncpa [#allocation13], 0 }
   0x4   :  { %21 = vsyncpa [#allocation6], 0  ;;  %s2248_s13 = smov [#allocation8]   ;;  %s82_s17 = sshll.u32 %s4102_s8, 4  ;;  %s83_s17 = int_to_ptr.vmem [resolvable:$true] %s82_s17 }
   0x5   :  { %s43_s14 = sshll.u32 %s2248_s13, 4  ;;  %s44_s14 = int_to_ptr.vmem [resolvable:$true] %s43_s14 }
   0x6   :  { %s2130_s18 = scalar_lea.vmem %s44_s14, 576  ;;  %p2135_p1 = scmp.lt.s32.totalorder %s44_s14, %s44_s14 }
   0x7   :  { %p2131_p0 = scmp.ne.s32.totalorder %s44_s14, %s2130_s18  ;;  %p2136_p2 = scmp.lt.s32.totalorder %s2130_s18, %s2130_s18 }
   0x9   :  { %p2137_p3 = por %p2136_p2, %p2135_p1 }
   0xb   :  { %p2138_p4 = pnand %p2137_p3, %p2131_p0 }
   0xd   :  { %2141 = shalt.err (!%p2138_p4)
}
   0xe   :  { %s2249_s19 = smov 64   ;;  %s2250_s20 = smov 4  }
   0xf   :  { %49 = dma.hbm_to_vmem [thread:$0]  %s4097_s3, 576, %s44_s14, [#allocation9], %s2249_s19, %s2249_s19, %s2250_s20  }
  0x10   :  { %s2142_s23 = scalar_lea.vmem %s83_s17, 16  ;;  %p2147_p6 = scmp.lt.s32.totalorder %s83_s17, %s83_s17 }
  0x11   :  { %p2143_p5 = scmp.ne.s32.totalorder %s83_s17, %s2142_s23  ;;  %p2148_p7 = scmp.lt.s32.totalorder %s2142_s23, %s2142_s23 }
  0x13   :  { %p2149_p8 = por %p2148_p7, %p2147_p6 }
  0x15   :  { %p2150_p9 = pnand %p2149_p8, %p2143_p5 }
  0x17   :  { %2153 = shalt.err (!%p2150_p9)
}
  0x18   :  { %s2251_s8 = smov [#allocation12]   ;;  %s2252_s24 = smov [#allocation4]  }
  0x19   :  { %85 = dma.vmem_to_smem %s83_s17, 16, %s2251_s8, [#allocation13]  }
  0x1a   :  { %s27_s25 = sshll.u32 %s2252_s24, 4  ;;  %s28_s25 = int_to_ptr.vmem [resolvable:$true] %s27_s25 }
  0x1b   :  { %s2162_s26 = scalar_lea.vmem %s28_s25, 2048  ;;  %p2167_p11 = scmp.lt.s32.totalorder %s28_s25, %s28_s25 }
  0x1c   :  { %p2163_p10 = scmp.ne.s32.totalorder %s28_s25, %s2162_s26  ;;  %p2168_p12 = scmp.lt.s32.totalorder %s2162_s26, %s2162_s26 }
  0x1e   :  { %p2169_p13 = por %p2168_p12, %p2167_p11 }
  0x20   :  { %p2170_p0 = pnand %p2169_p13, %p2163_p10 }
  0x22   :  { %2173 = shalt.err (!%p2170_p0)
}
  0x23   :  { %s2253_s3 = smov 512   ;;  %s2254_s27 = smov 32  }
  0x24   :  { %33 = dma.hbm_to_vmem [thread:$0]  %s4094_s0, 2048, %s28_s25, [#allocation5], %s2253_s3, %s2253_s3, %s2254_s27  }
  0x25   :  { %s2255_s30 = smov [#allocation10]   ;;  %s68_s14 = sshll.u32 %s4099_s5, 4  ;;  %s69_s14 = int_to_ptr.vmem [resolvable:$true] %s68_s14 }
  0x26   :  { %s55_s11 = sshll.u32 %s2255_s30, 4  ;;  %s56_s11 = int_to_ptr.vmem [resolvable:$true] %s55_s11 }
  0x27   :  { %s2182_s15 = scalar_lea.vmem %s56_s11, 576  ;;  %p2187_p2 = scmp.lt.s32.totalorder %s56_s11, %s56_s11 }
  0x28   :  { %p2183_p1 = scmp.ne.s32.totalorder %s56_s11, %s2182_s15  ;;  %p2188_p3 = scmp.lt.s32.totalorder %s2182_s15, %s2182_s15 }
  0x2a   :  { %p2189_p4 = por %p2188_p3, %p2187_p2 }
  0x2c   :  { %p2190_p5 = pnand %p2189_p4, %p2183_p1 }
  0x2e   :  { %2193 = shalt.err (!%p2190_p5)
}
  0x2f   :  { %61 = dma.hbm_to_vmem [thread:$0]  %s4098_s4, 576, %s56_s11, [#allocation9], %s2249_s19, %s2249_s19, %s2250_s20  }
  0x30   :  { %s92_s5 = sshll.u32 %s4103_s9, 4  ;;  %s2194_s21 = scalar_lea.vmem %s69_s14, 16  ;;  %s93_s5 = int_to_ptr.vmem [resolvable:$true] %s92_s5 }
  0x31   :  { %p2195_p6 = scmp.ne.s32.totalorder %s69_s14, %s2194_s21  ;;  %p2199_p7 = scmp.lt.s32.totalorder %s69_s14, %s69_s14 }
  0x32   :  { %p2200_p8 = scmp.lt.s32.totalorder %s2194_s21, %s2194_s21 }
  0x34   :  { %p2201_p9 = por %p2200_p8, %p2199_p7 }
  0x36   :  { %p2202_p10 = pnand %p2201_p9, %p2195_p6 }
  0x38   :  { %2205 = shalt.err (!%p2202_p10)
}
  0x39   :  { %s2256_s22 = smov [#allocation11]   ;;  %s2206_s23 = scalar_lea.vmem %s93_s5, 16 }
  0x3a   :  { %71 = dma.vmem_to_smem %s69_s14, 16, %s2256_s22, [#allocation7]  }
  0x3b   :  { %p2207_p11 = scmp.ne.s32.totalorder %s93_s5, %s2206_s23  ;;  %p2211_p12 = scmp.lt.s32.totalorder %s93_s5, %s93_s5 }
  0x3c   :  { %p2212_p13 = scmp.lt.s32.totalorder %s2206_s23, %s2206_s23 }
  0x3e   :  { %p2213_p0 = por %p2212_p13, %p2211_p12 }
  0x40   :  { %p2214_p1 = pnand %p2213_p0, %p2207_p11 }
  0x42   :  { %2217 = shalt.err (!%p2214_p1)
}
  0x43   :  { %s2257_s4 = smov [#allocation14]  }
  0x44   :  { %95 = dma.vmem_to_smem %s93_s5, 16, %s2257_s4, [#allocation13]  }
  0x45   :  { %2238 = dma.done.wait [#allocation5], 2048  }
  0x46   :  { %2239 = vsyncadd [#allocation5], 4294965248 }
  0x47   :  { %2240 = dma.done.wait [#allocation9], 1152  }
  0x48   :  { %2241 = vsyncadd [#allocation9], 4294966144 }
  0x49   :  { %2242 = dma.done.wait [#allocation7], 16  }
  0x4a   :  { %2243 = vsyncadd [#allocation7], 4294967280 }
  0x4b   :  { %2244 = dma.done.wait [#allocation13], 32  }
  0x4c   :  { %2245 = vsyncadd [#allocation13], 4294967264 }
  0x4d   :  { %114 = sfence }
  0x4e   :  { %v115_v0 = vld [vmem:[#allocation4] sm:$0xff]  ;;  %v116_v1 = vld [vmem:[#allocation4 + $0x8] sm:$0xff]  ;;  %v117_v2 = vld [vmem:[#allocation4 + $0x10] sm:$0xff]  ;;  %s344_s0 = sld [smem:[#allocation11]]  ;;  %s2259_s12 = smov 17  }
  0x4f   :  { %v131_v3 = vadd.f32 %v116_v1, %v115_v0  ;;  %v123_v4 = vld [vmem:[#allocation4 + $0x40] sm:$0xff]  ;;  %v124_v5 = vld [vmem:[#allocation4 + $0x48] sm:$0xff]  ;;  %v118_v6 = vld [vmem:[#allocation4 + $0x18] sm:$0xff]  ;;  %s1990_s17 = sld [smem:[#allocation11 + $0x4]]  ;;  %s2260_s14 = smov 16  }
  0x50   :  { %v125_v7 = vld [vmem:[#allocation4 + $0x50] sm:$0xff]  ;;  %v141_v8 = vadd.f32 %v124_v5, %v123_v4  ;;  %v119_v9 = vld [vmem:[#allocation4 + $0x20] sm:$0xff]  ;;  %v126_v11 = vld [vmem:[#allocation4 + $0x58] sm:$0xff]  ;;  %s1987_s18 = sld [smem:[#allocation11 + $0x1]] }
  0x51   :  { %v132_v10 = vadd.f32 %v131_v3, %v117_v2  ;;  %v120_v12 = vld [vmem:[#allocation4 + $0x28] sm:$0xff]  ;;  %v121_v13 = vld [vmem:[#allocation4 + $0x30] sm:$0xff]  ;;  %v127_v16 = vld [vmem:[#allocation4 + $0x60] sm:$0xff]  ;;  %s1991_s5 = sld [smem:[#allocation11 + $0x5]] }
  0x52   :  { %v142_v14 = vadd.f32 %v141_v8, %v125_v7  ;;  %v136_v15 = vadd.f32 %v120_v12, %v119_v9  ;;  %v128_v17 = vld [vmem:[#allocation4 + $0x68] sm:$0xff]  ;;  %v129_v18 = vld [vmem:[#allocation4 + $0x70] sm:$0xff]  ;;  %v122_v20 = vld [vmem:[#allocation4 + $0x38] sm:$0xff]  ;;  %s1994_s21 = sld [smem:[#allocation11 + $0x8]] }
  0x53   :  { %v133_v19 = vadd.f32 %v132_v10, %v118_v6  ;;  %v146_v21 = vadd.f32 %v128_v17, %v127_v16  ;;  %v130_v24 = vld [vmem:[#allocation4 + $0x78] sm:$0xff]  ;;  %s1988_s22 = sld [smem:[#allocation11 + $0x2]] }
  0x54   :  { %v143_v22 = vadd.f32 %v142_v14, %v126_v11  ;;  %v137_v23 = vadd.f32 %v136_v15, %v121_v13  ;;  %s1992_s23 = sld [smem:[#allocation11 + $0x6]] }
  0x55   :  { %134 = vadd.xlane.f32.xlu0 %v133_v19  ;;  %v147_v25 = vadd.f32 %v146_v21, %v129_v18  ;;  %v1985_v19 = vld [vmem:[%s4096_s2 + $0x2] ss:$0 sm:$0xff]  ;;  %s1995_s4 = sld [smem:[#allocation11 + $0x9]] }
  0x56   :  { %144 = vadd.xlane.f32.xlu1 %v143_v22  ;;  %v138_v26 = vadd.f32 %v137_v23, %v122_v20  ;;  %s1989_s9 = sld [smem:[#allocation11 + $0x3]] }
  0x57   :  { %v148_v27 = vadd.f32 %v147_v25, %v130_v24  ;;  %s1993_s19 = sld [smem:[#allocation11 + $0x7]] }
  0x58   :  { %s1999_s20 = sld [smem:[#allocation11 + $0xd]] }
  0x59   :  { %139 = vadd.xlane.f32.xlu0 %v138_v26  ;;  %s1996_s8 = sld [smem:[#allocation11 + $0xa]] }
  0x5a   :  { %149 = vadd.xlane.f32.xlu1 %v148_v27  ;;  %s2444_s24 = sld [smem:[#allocation11 + $0xe]] }
  0x5b   :  { %s2446_s25 = sld [smem:[#allocation11 + $0xb]] }
  0x5c   :  { %s2448_s26 = sld [smem:[#allocation11 + $0x18]] }
  0x5d   :  { %s2460_s28 = sld [smem:[#allocation11 + $0x15]] }
  0x5e   :  { %s2470_s29 = sld [smem:[#allocation11 + $0xf]] }
  0x5f   :  { %s2564_s30 = sld [smem:[#allocation11 + $0x16]] }
  0x60   :  { %s2595_s11 = sld [smem:[#allocation11 + $0x19]] }
  0x61   :  { %s2618_s13 = sld [smem:[#allocation11 + $0x1a]] }
  0x62   :  { %s2643_s15 = sld [smem:[#allocation11 + $0x17]] }
  0x63   :  { %s2671_s16 = sld [smem:[#allocation11 + $0x1b]] }
  0xde   :  { %v135_v28 = vpop.xlane.xlu0 %134 }
  0xdf   :  { %v151_v29 = vmul.f32 0.001953125, %v135_v28  ;;  %v145_v30 = vpop.xlane.xlu1 %144 }
  0xe0   :  { %v153_v31 = vmul.f32 0.001953125, %v145_v30 }
  0xe1   :  { %v2350_v32 = vsub.f32 %v115_v0, %v151_v29  ;;  %v2352_v33 = vsub.f32 %v116_v1, %v151_v29  ;;  %v2354_v34 = vsub.f32 %v117_v2, %v151_v29  ;;  %v2356_v35 = vsub.f32 %v118_v6, %v151_v29 }
  0xe2   :  { %v140_v36 = vpop.xlane.xlu0 %139  ;;  %v2358_v37 = vsub.f32 %v123_v4, %v153_v31  ;;  %v2360_v38 = vsub.f32 %v124_v5, %v153_v31  ;;  %v2362_v39 = vsub.f32 %v125_v7, %v153_v31  ;;  %v2364_v40 = vsub.f32 %v126_v11, %v153_v31 }
  0xe3   :  { %v152_v41 = vmul.f32 0.001953125, %v140_v36  ;;  %v150_v42 = vpop.xlane.xlu1 %149  ;;  %v171_v43 = vmul.f32 %v2350_v32, %v2350_v32  ;;  %v172_v44 = vmul.f32 %v2352_v33, %v2352_v33  ;;  %v173_v46 = vmul.f32 %v2354_v34, %v2354_v34  ;;  %v1979_v36 = vld [vmem:[%s4095_s1] ss:$0 sm:$0xff] }
  0xe4   :  { %v154_v45 = vmul.f32 0.001953125, %v150_v42  ;;  %v179_v47 = vmul.f32 %v2358_v37, %v2358_v37  ;;  %v180_v48 = vmul.f32 %v2360_v38, %v2360_v38  ;;  %v174_v49 = vmul.f32 %v2356_v35, %v2356_v35 }
  0xe5   :  { %v187_v50 = vadd.f32 %v172_v44, %v171_v43  ;;  %v181_v51 = vmul.f32 %v2362_v39, %v2362_v39  ;;  %v2380_v52 = vsub.f32 %v119_v9, %v152_v41  ;;  %v182_v53 = vmul.f32 %v2364_v40, %v2364_v40  ;;  %v1980_v43 = vld [vmem:[%s4095_s1 + $0x1] ss:$0 sm:$0xff] }
  0xe6   :  { %v197_v54 = vadd.f32 %v180_v48, %v179_v47  ;;  %v2384_v55 = vsub.f32 %v120_v12, %v152_v41  ;;  %v2386_v56 = vsub.f32 %v121_v13, %v152_v41  ;;  %v2390_v59 = vsub.f32 %v127_v16, %v154_v45  ;;  %v1981_v47 = vld [vmem:[%s4095_s1 + $0x2] ss:$0 sm:$0xff] }
  0xe7   :  { %v188_v57 = vadd.f32 %v187_v50, %v173_v46  ;;  %v175_v58 = vmul.f32 %v2380_v52, %v2380_v52  ;;  %v2392_v60 = vsub.f32 %v128_v17, %v154_v45  ;;  %v2394_v62 = vsub.f32 %v122_v20, %v152_v41  ;;  %v1983_v17 = vld [vmem:[%s4096_s2] ss:$0 sm:$0xff]  ;;  %v1982_v50 = vld [vmem:[%s4095_s1 + $0x3] ss:$0 sm:$0xff]  ;;  %s1998_s1 = sld [smem:[#allocation11 + $0xc]] }
  0xe8   :  { %v198_v61 = vadd.f32 %v197_v54, %v181_v51  ;;  %v176_v63 = vmul.f32 %v2384_v55, %v2384_v55  ;;  %v2398_v1 = vsub.f32 %v129_v18, %v154_v45  ;;  %v2400_v2 = vsub.f32 %v130_v24, %v154_v45  ;;  %v1984_v18 = vld [vmem:[%s4096_s2 + $0x1] ss:$0 sm:$0xff] }
  0xe9   :  { %v189_v0 = vadd.f32 %v188_v57, %v174_v49  ;;  %v183_v3 = vmul.f32 %v2390_v59, %v2390_v59  ;;  %v177_v4 = vmul.f32 %v2386_v56, %v2386_v56  ;;  %v184_v6 = vmul.f32 %v2392_v60, %v2392_v60 }
  0xea   :  { %v192_v5 = vadd.f32 %v176_v63, %v175_v58  ;;  %v199_v7 = vadd.f32 %v198_v61, %v182_v53  ;;  %v185_v8 = vmul.f32 %v2398_v1, %v2398_v1  ;;  %v178_v9 = vmul.f32 %v2394_v62, %v2394_v62  ;;  %v1986_v53 = vld [vmem:[%s4096_s2 + $0x3] ss:$0 sm:$0xff]  ;;  %s2442_s2 = sld [smem:[#allocation11 + $0x14]] }
  0xeb   :  { %190 = vadd.xlane.f32.xlu0 %v189_v0  ;;  %v186_v11 = vmul.f32 %v2400_v2, %v2400_v2  ;;  %v202_v12 = vadd.f32 %v184_v6, %v183_v3  ;;  %v2258_v16 = vmov 0   ;;  %v2452_v0 = vstv %s344_s0  ;;  %s2690_s0 = sld [smem:[#allocation11 + $0x1c]] }
  0xec   :  { %v193_v10 = vadd.f32 %v192_v5, %v177_v4  ;;  %2059 = vset.pattern.permute.xlu1 %v2258_v16  ;;  %2058 = vset.pattern.permute.xlu0 %v2258_v16  ;;  %v2454_v3 = vstv %s1987_s18  ;;  %v2456_v4 = vstv %s1990_s17  ;;  %v2458_v5 = vstv %s1991_s5  ;;  %s2261_s17 = smov 15   ;;  %s2699_s18 = sld [smem:[#allocation11 + $0x1d]] }
  0xed   :  { %v203_v14 = vadd.f32 %v202_v12, %v185_v8  ;;  %v2466_v8 = vstv %s1988_s22  ;;  %v2474_v12 = vstv %s1992_s23  ;;  %s2716_s5 = sld [smem:[#allocation11 + $0x1e]]  ;;  %s2263_s23 = smov 127  }
  0xee   :  { %v194_v13 = vadd.f32 %v193_v10, %v178_v9  ;;  %v2468_v9 = vstv %s1994_s21  ;;  %s2262_s21 = smov 1   ;;  %s2727_s22 = sld [smem:[#allocation11 + $0x1f]] }
  0xef   :  { %200 = vadd.xlane.f32.xlu0 %v199_v7  ;;  %v204_v15 = vadd.f32 %v203_v14, %v186_v11  ;;  %v2478_v14 = vstv %s1989_s9  ;;  %s2815_s9 = sld [smem:[#allocation11 + $0x21]] }
  0xf0   :  { %195 = vadd.xlane.f32.xlu1 %v194_v13  ;;  %v2476_v13 = vstv %s1995_s4  ;;  %s2264_s4 = smov 113  }
  0xf4   :  { %205 = vadd.xlane.f32.xlu1 %v204_v15  ;;  %v2484_v15 = vstv %s1999_s20  ;;  %s2265_s20 = smov 112  }
 0x105   :  { %312 = vperm.xlu1 %2059, %v1983_v17  }
 0x109   :  { %316 = vperm.xlu1 %2059, %v1984_v18   ;;  %v2494_v18 = vstv %s1996_s8  ;;  %s2837_s8 = sld [smem:[#allocation11 + $0x23]] }
 0x10d   :  { %320 = vperm.xlu1 %2059, %v1985_v19  }
 0x174   :  { %v191_v20 = vpop.xlane.xlu0 %190 }
 0x175   :  { %v207_v21 = vmul.f32 0.001953125, %v191_v20 }
 0x177   :  { %v215_v22 = vadd.f32 1e-05, %v207_v21 }
 0x178   :  { %v201_v23 = vpop.xlane.xlu0 %200 }
 0x179   :  { %2060 = vrsqrt.f32 %v215_v22  ;;  %v196_v24 = vpop.xlane.xlu1 %195  ;;  %v209_v25 = vmul.f32 0.001953125, %v201_v23 }
 0x17a   :  { %v208_v26 = vmul.f32 0.001953125, %v196_v24  ;;  %v2511_v24 = vstv %s2442_s2  ;;  %s2266_s2 = smov 111  }
 0x17b   :  { %v217_v28 = vadd.f32 1e-05, %v209_v25 }
 0x17c   :  { %v216_v27 = vadd.f32 1e-05, %v208_v26  ;;  %v2523_v26 = vstv %s2444_s24  ;;  %s2002_s24 = sld [smem:[#allocation11 + $0x10]] }
 0x17d   :  { %v206_v29 = vpop.xlane.xlu1 %205 }
 0x17e   :  { %2062 = vrsqrt.f32 %v216_v27  ;;  %v210_v30 = vmul.f32 0.001953125, %v206_v29  ;;  %v2536_v29 = vstv %s2448_s26  ;;  %s2004_s26 = sld [smem:[#allocation11 + $0x12]] }
 0x17f   :  { %2064 = vrsqrt.f32 %v217_v28  ;;  %v2533_v28 = vstv %s2460_s28  ;;  %s2005_s28 = sld [smem:[#allocation11 + $0x13]] }
 0x180   :  { %v218_v31 = vadd.f32 1e-05, %v210_v30 }
 0x181   :  { %v313_v54 = vpop.permute.xlu1 %312 }
 0x182   :  { %2066 = vrsqrt.f32 %v218_v31 }
 0x185   :  { %v2438_v57 = vpop.permute.xlu1 %316 }
 0x186   :  { %v2061_v41 = vpop.eup %2060 }
 0x187   :  { %v247_v42 = vmul.f32 %v2061_v41, %v1979_v36  ;;  %v2545_v41 = vstv %s2470_s29 }
 0x189   :  { %253 = vperm.xlu0 %2058, %v247_v42   ;;  %v2440_v58 = vpop.permute.xlu1 %320 }
 0x18b   :  { %v2063_v44 = vpop.eup %2062 }
 0x18c   :  { %v248_v45 = vmul.f32 %v2063_v44, %v1980_v43  ;;  %v2065_v46 = vpop.eup %2064 }
 0x18d   :  { %v249_v48 = vmul.f32 %v2065_v46, %v1981_v47 }
 0x18e   :  { %258 = vperm.xlu1 %2059, %v248_v45  }
 0x18f   :  { %v2067_v49 = vpop.eup %2066 }
 0x190   :  { %v250_v51 = vmul.f32 %v2067_v49, %v1982_v50 }
 0x192   :  { %263 = vperm.xlu1 %2059, %v249_v48  }
 0x196   :  { %268 = vperm.xlu1 %2059, %v250_v51  }
 0x19a   :  { %324 = vperm.xlu1 %2059, %v1986_v53  }
 0x204   :  { %v254_v61 = vpop.permute.xlu0 %253 }
 0x205   :  { %v271_v10 = vmul.f32 %v254_v61, %v2350_v32  ;;  %v272_v11 = vmul.f32 %v254_v61, %v2352_v33  ;;  %v273_v16 = vmul.f32 %v254_v61, %v2354_v34  ;;  %v274_v19 = vmul.f32 %v254_v61, %v2356_v35 }
 0x207   :  { %v2504_v21 = vadd.f32 %v313_v54, %v271_v10  ;;  %v2506_v22 = vadd.f32 %v313_v54, %v272_v11  ;;  %v2538_v30 = vadd.f32 %v313_v54, %v273_v16  ;;  %v2540_v31 = vadd.f32 %v313_v54, %v274_v19 }
 0x209   :  { %v2450_v63 = vpop.permute.xlu1 %258  ;;  %4169 = vst [vmem:[#allocation23_spill] sm:$0xff] %v2504_v21  ;;  %4170 = vst [vmem:[#allocation24_spill] sm:$0xff] %v2506_v22  ;;  %v347_v44 = vmul.f32 %v2452_v0, %v2506_v22  ;;  %v346_v45 = vmul.f32 %v2452_v0, %v2504_v21  ;;  %v423_v51 = vmul.f32 %v2456_v4, %v2504_v21 }
 0x20a   :  { %v275_v6 = vmul.f32 %v2450_v63, %v2380_v52  ;;  %v276_v7 = vmul.f32 %v2450_v63, %v2384_v55  ;;  %v2480_v52 = vstv %s1993_s19  ;;  %v2482_v55 = vstv %s1998_s1  ;;  %4174 = vst [vmem:[#allocation28_spill] sm:$0xff] %v2538_v30  ;;  %4175 = vst [vmem:[#allocation29_spill] sm:$0xff] %v2540_v31  ;;  %s2807_s1 = sld [smem:[#allocation11 + $0x20]] }
 0x20b   :  { %v278_v32 = vmul.f32 %v2450_v63, %v2394_v62  ;;  %v349_v10 = vmul.f32 %v2452_v0, %v2540_v31  ;;  %s2829_s19 = sld [smem:[#allocation11 + $0x22]] }
 0x20c   :  { %v2490_v33 = vadd.f32 %v2438_v57, %v276_v7  ;;  %v2498_v20 = vadd.f32 %v2438_v57, %v275_v6 }
 0x20d   :  { %v2492_v17 = vpop.permute.xlu1 %263 }
 0x20e   :  { %4167 = vst [vmem:[#allocation21_spill] sm:$0xff] %v2490_v33  ;;  %4168 = vst [vmem:[#allocation22_spill] sm:$0xff] %v2498_v20  ;;  %v279_v34 = vmul.f32 %v2492_v17, %v2358_v37  ;;  %v280_v62 = vmul.f32 %v2492_v17, %v2360_v38  ;;  %v282_v23 = vmul.f32 %v2492_v17, %v2364_v40  ;;  %v2520_v37 = vstv %s2446_s25  ;;  %s2003_s25 = sld [smem:[#allocation11 + $0x11]] }
 0x20f   :  { %v2526_v38 = vadd.f32 %v2438_v57, %v278_v32  ;;  %v353_v40 = vmul.f32 %v2454_v3, %v2490_v33  ;;  %v352_v36 = vmul.f32 %v2454_v3, %v2498_v20 }
 0x210   :  { %v2514_v35 = vadd.f32 %v2440_v58, %v279_v34  ;;  %v2517_v25 = vadd.f32 %v2440_v58, %v280_v62  ;;  %v2548_v42 = vadd.f32 %v2440_v58, %v282_v23 }
 0x211   :  { %4173 = vst [vmem:[#allocation27_spill] sm:$0xff] %v2526_v38  ;;  %v2528_v27 = vpop.permute.xlu1 %268  ;;  %v357_v50 = vadd.f32 %v353_v40, %v347_v44  ;;  %v356_v6 = vadd.f32 %v352_v36, %v346_v45  ;;  %v432_v16 = vmul.f32 %v2458_v5, %v2526_v38  ;;  %v426_v36 = vmul.f32 %v2456_v4, %v2540_v31 }
 0x212   :  { %4171 = vst [vmem:[#allocation25_spill] sm:$0xff] %v2514_v35  ;;  %4172 = vst [vmem:[#allocation26_spill] sm:$0xff] %v2517_v25  ;;  %v283_v43 = vmul.f32 %v2528_v27, %v2390_v59  ;;  %v284_v46 = vmul.f32 %v2528_v27, %v2392_v60  ;;  %v286_v47 = vmul.f32 %v2528_v27, %v2400_v2 }
 0x213   :  { %4176 = vst [vmem:[#allocation30_spill] sm:$0xff] %v2548_v42  ;;  %v363_v48 = vmul.f32 %v2466_v8, %v2517_v25  ;;  %v362_v49 = vmul.f32 %v2466_v8, %v2514_v35  ;;  %v429_v60 = vmul.f32 %v2458_v5, %v2498_v20  ;;  %v355_v2 = vmul.f32 %v2454_v3, %v2526_v38 }
 0x214   :  { %v439_v7 = vmul.f32 %v2474_v12, %v2514_v35  ;;  %v365_v11 = vmul.f32 %v2466_v8, %v2548_v42 }
 0x215   :  { %v2566_v59 = vpop.permute.xlu1 %324  ;;  %v367_v32 = vadd.f32 %v363_v48, %v357_v50  ;;  %v366_v34 = vadd.f32 %v362_v49, %v356_v6  ;;  %v433_v23 = vadd.f32 %v429_v60, %v423_v51  ;;  %v359_v40 = vadd.f32 %v355_v2, %v349_v10 }
 0x216   :  { %v2575_v53 = vadd.f32 %v2566_v59, %v283_v43  ;;  %v2578_v54 = vadd.f32 %v2566_v59, %v284_v46  ;;  %v2581_v61 = vadd.f32 %v2566_v59, %v286_v47  ;;  %v430_v43 = vmul.f32 %v2458_v5, %v2490_v33 }
 0x217   :  { %v277_v48 = vmul.f32 %v2450_v63, %v2386_v56  ;;  %v442_v49 = vmul.f32 %v2474_v12, %v2548_v42  ;;  %v424_v50 = vmul.f32 %v2456_v4, %v2506_v22  ;;  %v440_v51 = vmul.f32 %v2474_v12, %v2517_v25 }
 0x218   :  { %4177 = vst [vmem:[#allocation31_spill] sm:$0xff] %v2575_v53  ;;  %4178 = vst [vmem:[#allocation32_spill] sm:$0xff] %v2578_v54  ;;  %v373_v19 = vmul.f32 %v2478_v14, %v2578_v54  ;;  %v372_v62 = vmul.f32 %v2478_v14, %v2575_v53  ;;  %v449_v46 = vmul.f32 %v2480_v52, %v2575_v53  ;;  %v2616_v10 = vstv %s2564_s30 }
 0x219   :  { %4179 = vst [vmem:[#allocation33_spill] sm:$0xff] %v2581_v61  ;;  %v375_v47 = vmul.f32 %v2478_v14, %v2581_v61  ;;  %v443_v60 = vadd.f32 %v439_v7, %v433_v23  ;;  %v369_v2 = vadd.f32 %v365_v11, %v359_v40  ;;  %v436_v6 = vadd.f32 %v432_v16, %v426_v36 }
 0x21a   :  { %v377_v44 = vadd.f32 %v373_v19, %v367_v32  ;;  %v376_v45 = vadd.f32 %v372_v62, %v366_v34  ;;  %v452_v56 = vmul.f32 %v2480_v52, %v2581_v61  ;;  %v434_v63 = vadd.f32 %v430_v43, %v424_v50 }
 0x21b   :  { %v450_v32 = vmul.f32 %v2480_v52, %v2578_v54  ;;  %v506_v19 = vmul.f32 %v2476_v13, %v2490_v33  ;;  %v453_v34 = vadd.f32 %v449_v46, %v443_v60  ;;  %v379_v62 = vadd.f32 %v375_v47, %v369_v2 }
 0x21c   :  { %382 = vrot.lane.b32.xlu0 %v377_v44, %s2259_s12  ;;  %380 = vrot.lane.b32.xlu1 %v376_v45, %s2259_s12  ;;  %v500_v7 = vmul.f32 %v2468_v9, %v2506_v22  ;;  %v505_v11 = vmul.f32 %v2476_v13, %v2498_v20  ;;  %v446_v16 = vadd.f32 %v442_v49, %v436_v6  ;;  %v2646_v46 = vstv %s2595_s11  ;;  %s1045_s11 = sld [smem:[#allocation14]] }
 0x21d   :  { %v444_v23 = vadd.f32 %v440_v51, %v434_v63  ;;  %v516_v40 = vmul.f32 %v2494_v18, %v2517_v25  ;;  %v499_v36 = vmul.f32 %v2468_v9, %v2504_v21  ;;  %v2635_v43 = vadd.f32 %v2438_v57, %v277_v48 }
 0x21e   :  { %v515_v44 = vmul.f32 %v2494_v18, %v2514_v35  ;;  %v575_v45 = vmul.f32 %v2482_v55, %v2504_v21  ;;  %v456_v47 = vadd.f32 %v452_v56, %v446_v16  ;;  %v510_v57 = vadd.f32 %v506_v19, %v500_v7 }
 0x21f   :  { %4180 = vst [vmem:[#allocation34_spill] sm:$0xff] %v2635_v43  ;;  %v454_v49 = vadd.f32 %v450_v32, %v444_v23  ;;  %v526_v48 = vmul.f32 %v2520_v37, %v2578_v54  ;;  %v509_v50 = vadd.f32 %v505_v11, %v499_v36  ;;  %v525_v51 = vmul.f32 %v2520_v37, %v2575_v53 }
 0x220   :  { %457 = vrot.lane.b32.xlu0 %v453_v34, %s2260_s14  ;;  %386 = vrot.lane.b32.xlu1 %v379_v62, %s2259_s12  ;;  %v581_v60 = vmul.f32 %v2484_v15, %v2498_v20  ;;  %v508_v2 = vmul.f32 %v2476_v13, %v2526_v38  ;;  %v281_v6 = vmul.f32 %v2492_v17, %v2362_v39  ;;  %v2669_v7 = vstv %s2618_s13 }
 0x221   :  { %v520_v56 = vadd.f32 %v516_v40, %v510_v57  ;;  %v502_v63 = vmul.f32 %v2468_v9, %v2540_v31  ;;  %v578_v32 = vmul.f32 %v2482_v55, %v2540_v31  ;;  %v519_v19 = vadd.f32 %v515_v44, %v509_v50 }
 0x222   :  { %v591_v34 = vmul.f32 %v2523_v26, %v2514_v35  ;;  %v518_v62 = vmul.f32 %v2494_v18, %v2548_v42  ;;  %v601_v17 = vmul.f32 %v2545_v41, %v2575_v53  ;;  %v528_v11 = vmul.f32 %v2520_v37, %v2581_v61 }
 0x223   :  { %v530_v39 = vadd.f32 %v526_v48, %v520_v56  ;;  %v584_v16 = vmul.f32 %v2484_v15, %v2526_v38  ;;  %v529_v23 = vadd.f32 %v525_v51, %v519_v19  ;;  %v585_v40 = vadd.f32 %v581_v60, %v575_v45 }
 0x224   :  { %463 = vrot.lane.b32.xlu0 %v456_v47, %s2260_s14  ;;  %459 = vrot.lane.b32.xlu1 %v454_v49, %s2260_s14  ;;  %v512_v36 = vadd.f32 %v508_v2, %v502_v63  ;;  %v582_v44 = vmul.f32 %v2484_v15, %v2490_v33  ;;  %v2682_v47 = vadd.f32 %v2440_v58, %v281_v6  ;;  %v2697_v51 = vstv %s2643_s15 }
 0x225   :  { %v285_v49 = vmul.f32 %v2528_v27, %v2398_v1  ;;  %v594_v57 = vmul.f32 %v2523_v26, %v2548_v42  ;;  %v576_v48 = vmul.f32 %v2482_v55, %v2506_v22  ;;  %v595_v45 = vadd.f32 %v591_v34, %v585_v40 }
 0x226   :  { %4181 = vst [vmem:[#allocation35_spill] sm:$0xff] %v2682_v47  ;;  %v522_v50 = vadd.f32 %v518_v62, %v512_v36  ;;  %v592_v58 = vmul.f32 %v2523_v26, %v2517_v25  ;;  %v588_v1 = vadd.f32 %v584_v16, %v578_v32  ;;  %v604_v27 = vmul.f32 %v2545_v41, %v2581_v61 }
 0x227   :  { %v602_v60 = vmul.f32 %v2545_v41, %v2578_v54  ;;  %v694_v2 = vmul.f32 %v2533_v28, %v2490_v33  ;;  %v605_v6 = vadd.f32 %v601_v17, %v595_v45  ;;  %v586_v63 = vadd.f32 %v582_v44, %v576_v48 }
 0x228   :  { %535 = vrot.lane.b32.xlu0 %v530_v39, %s2261_s17  ;;  %533 = vrot.lane.b32.xlu1 %v529_v23, %s2261_s17  ;;  %v532_v56 = vadd.f32 %v528_v11, %v522_v50  ;;  %v693_v19 = vmul.f32 %v2533_v28, %v2498_v20  ;;  %v2710_v34 = vadd.f32 %v2566_v59, %v285_v49  ;;  %v2725_v16 = vstv %s2671_s16  ;;  %s2027_s16 = sld [smem:[#allocation14 + $0x1]] }
 0x229   :  { %v598_v32 = vadd.f32 %v594_v57, %v588_v1  ;;  %v688_v62 = vmul.f32 %v2511_v24, %v2506_v22  ;;  %v704_v39 = vmul.f32 %v2616_v10, %v2517_v25  ;;  %v596_v17 = vadd.f32 %v592_v58, %v586_v63 }
 0x22a   :  { %4182 = vst [vmem:[#allocation36_spill] sm:$0xff] %v2710_v34  ;;  %v687_v59 = vmul.f32 %v2511_v24, %v2504_v21  ;;  %v703_v11 = vmul.f32 %v2616_v10, %v2514_v35  ;;  %v714_v36 = vmul.f32 %v2697_v51, %v2578_v54  ;;  %v769_v44 = vmul.f32 %v2646_v46, %v2498_v20 }
 0x22b   :  { %v608_v23 = vadd.f32 %v604_v27, %v598_v32  ;;  %v698_v40 = vadd.f32 %v694_v2, %v688_v62  ;;  %v606_v49 = vadd.f32 %v602_v60, %v596_v17  ;;  %v713_v48 = vmul.f32 %v2697_v51, %v2575_v53 }
 0x22c   :  { %609 = vrot.lane.b32.xlu0 %v605_v6, %s2262_s21  ;;  %539 = vrot.lane.b32.xlu1 %v532_v56, %s2261_s17  ;;  %v697_v57 = vadd.f32 %v693_v19, %v687_v59  ;;  %v695_v45 = vmul.f32 %v2533_v28, %v2635_v43  ;;  %v763_v58 = vmul.f32 %v2536_v29, %v2504_v21  ;;  %v2742_v27 = vstv %s2690_s0  ;;  %s2032_s0 = sld [smem:[#allocation12 + $0x2]] }
 0x22d   :  { %v708_v50 = vadd.f32 %v704_v39, %v698_v40  ;;  %v779_v1 = vmul.f32 %v2669_v7, %v2514_v35  ;;  %v689_v2 = vmul.f32 %v2511_v24, %v2538_v30  ;;  %v705_v6 = vmul.f32 %v2616_v10, %v2682_v47 }
 0x22e   :  { %v707_v60 = vadd.f32 %v703_v11, %v697_v57  ;;  %v2751_v56 = vstv %s2699_s18  ;;  %v773_v19 = vadd.f32 %v769_v44, %v763_v58  ;;  %v789_v32 = vmul.f32 %v2725_v16, %v2575_v53  ;;  %s2033_s18 = sld [smem:[#allocation14 + $0x2]] }
 0x22f   :  { %v718_v63 = vadd.f32 %v714_v36, %v708_v50  ;;  %v771_v62 = vmul.f32 %v2646_v46, %v2635_v43  ;;  %v699_v17 = vadd.f32 %v695_v45, %v689_v2  ;;  %v715_v59 = vmul.f32 %v2697_v51, %v2710_v34 }
 0x230   :  { %615 = vrot.lane.b32.xlu0 %v608_v23, %s2262_s21  ;;  %611 = vrot.lane.b32.xlu1 %v606_v49, %s2262_s21  ;;  %v717_v39 = vadd.f32 %v713_v48, %v707_v60  ;;  %v770_v11 = vmul.f32 %v2646_v46, %v2490_v33  ;;  %v783_v23 = vadd.f32 %v779_v1, %v773_v19  ;;  %v2766_v44 = vstv %s2716_s5 }
 0x231   :  { %v765_v40 = vmul.f32 %v2536_v29, %v2538_v30  ;;  %v781_v36 = vmul.f32 %v2669_v7, %v2682_v47  ;;  %v709_v49 = vadd.f32 %v705_v6, %v699_v17  ;;  %v764_v57 = vmul.f32 %v2536_v29, %v2506_v22 }
 0x232   :  { %v780_v48 = vmul.f32 %v2669_v7, %v2517_v25  ;;  %v2775_v45 = vstv %s2727_s22  ;;  %v793_v50 = vadd.f32 %v789_v32, %v783_v23  ;;  %v791_v1 = vmul.f32 %v2725_v16, %v2710_v34 }
 0x233   :  { %v775_v58 = vadd.f32 %v771_v62, %v765_v40  ;;  %v846_v60 = vmul.f32 %v2751_v56, %v2490_v33  ;;  %v719_v2 = vadd.f32 %v715_v59, %v709_v49  ;;  %v790_v6 = vmul.f32 %v2725_v16, %v2578_v54 }
 0x234   :  { %723 = vrot.lane.b32.xlu0 %v718_v63, %s2263_s23  ;;  %721 = vrot.lane.b32.xlu1 %v717_v39, %s2263_s23  ;;  %v774_v63 = vadd.f32 %v770_v11, %v764_v57  ;;  %v845_v19 = vmul.f32 %v2751_v56, %v2498_v20  ;;  %v840_v17 = vmul.f32 %v2742_v27, %v2506_v22 }
 0x235   :  { %v785_v39 = vadd.f32 %v781_v36, %v775_v58  ;;  %v856_v32 = vmul.f32 %v2766_v44, %v2517_v25  ;;  %v839_v59 = vmul.f32 %v2742_v27, %v2504_v21  ;;  %v855_v11 = vmul.f32 %v2766_v44, %v2514_v35 }
 0x236   :  { %v784_v62 = vadd.f32 %v780_v48, %v774_v63  ;;  %v850_v40 = vadd.f32 %v846_v60, %v840_v17  ;;  %v866_v36 = vmul.f32 %v2775_v45, %v2578_v54  ;;  %v354_v49 = vmul.f32 %v2454_v3, %v2635_v43 }
 0x237   :  { %v795_v23 = vadd.f32 %v791_v1, %v785_v39  ;;  %v849_v58 = vadd.f32 %v845_v19, %v839_v59  ;;  %v847_v48 = vmul.f32 %v2751_v56, %v2635_v43  ;;  %v348_v63 = vmul.f32 %v2452_v0, %v2538_v30 }
 0x238   :  { %797 = vrot.lane.b32.xlu0 %v793_v50, %s2264_s4  ;;  %725 = vrot.lane.b32.xlu1 %v719_v2, %s2263_s23  ;;  %v794_v57 = vadd.f32 %v790_v6, %v784_v62  ;;  %v865_v50 = vmul.f32 %v2775_v45, %v2575_v53  ;;  %v860_v2 = vadd.f32 %v856_v32, %v850_v40 }
 0x239   :  { %v364_v1 = vmul.f32 %v2466_v8, %v2682_v47  ;;  %v859_v3 = vadd.f32 %v855_v11, %v849_v58  ;;  %v841_v60 = vmul.f32 %v2742_v27, %v2538_v30  ;;  %v857_v6 = vmul.f32 %v2766_v44, %v2682_v47 }
 0x23a   :  { %v870_v19 = vadd.f32 %v866_v36, %v860_v2  ;;  %v358_v0 = vadd.f32 %v354_v49, %v348_v63  ;;  %v374_v8 = vmul.f32 %v2478_v14, %v2710_v34  ;;  %v507_v39 = vmul.f32 %v2476_v13, %v2635_v43 }
 0x23b   :  { %v869_v17 = vadd.f32 %v865_v50, %v859_v3  ;;  %v851_v32 = vadd.f32 %v847_v48, %v841_v60  ;;  %v867_v62 = vmul.f32 %v2775_v45, %v2710_v34  ;;  %v431_v59 = vmul.f32 %v2458_v5, %v2635_v43 }
 0x23c   :  { %801 = vrot.lane.b32.xlu0 %v795_v23, %s2264_s4  ;;  %799 = vrot.lane.b32.xlu1 %v794_v57, %s2264_s4  ;;  %v368_v11 = vadd.f32 %v364_v1, %v358_v0  ;;  %v501_v23 = vmul.f32 %v2468_v9, %v2538_v30  ;;  %v517_v40 = vmul.f32 %v2494_v18, %v2682_v47  ;;  %v914_v63 = vstv %s2807_s1 }
 0x23d   :  { %v861_v13 = vadd.f32 %v857_v6, %v851_v32  ;;  %v425_v14 = vmul.f32 %v2456_v4, %v2538_v30  ;;  %v441_v5 = vmul.f32 %v2474_v12, %v2682_v47  ;;  %v527_v18 = vmul.f32 %v2520_v37, %v2710_v34 }
 0x23e   :  { %v378_v9 = vadd.f32 %v374_v8, %v368_v11  ;;  %v511_v36 = vadd.f32 %v507_v39, %v501_v23  ;;  %v696_v49 = vmul.f32 %v2533_v28, %v2526_v38  ;;  %v451_v50 = vmul.f32 %v2480_v52, %v2710_v34 }
 0x23f   :  { %v871_v57 = vadd.f32 %v867_v62, %v861_v13  ;;  %v435_v58 = vadd.f32 %v431_v59, %v425_v14  ;;  %v583_v4 = vmul.f32 %v2484_v15, %v2635_v43  ;;  %v690_v48 = vmul.f32 %v2511_v24, %v2540_v31 }
 0x240   :  { %875 = vrot.lane.b32.xlu0 %v870_v19, %s2265_s20  ;;  %873 = vrot.lane.b32.xlu1 %v869_v17, %s2265_s20  ;;  %v521_v12 = vadd.f32 %v517_v40, %v511_v36  ;;  %v706_v2 = vmul.f32 %v2616_v10, %v2548_v42  ;;  %v577_v52 = vmul.f32 %v2482_v55, %v2538_v30  ;;  %v920_v28 = vstv %s2815_s9 }
 0x241   :  { %v445_v37 = vadd.f32 %v441_v5, %v435_v58  ;;  %v593_v15 = vmul.f32 %v2523_v26, %v2682_v47  ;;  %v700_v3 = vadd.f32 %v696_v49, %v690_v48  ;;  %v716_v24 = vmul.f32 %v2697_v51, %v2581_v61 }
 0x242   :  { %v531_v1 = vadd.f32 %v527_v18, %v521_v12  ;;  %v848_v10 = vmul.f32 %v2751_v56, %v2526_v38  ;;  %v587_v6 = vadd.f32 %v583_v4, %v577_v52  ;;  %v603_v19 = vmul.f32 %v2545_v41, %v2710_v34 }
 0x243   :  { %v455_v60 = vadd.f32 %v451_v50, %v445_v37  ;;  %v772_v55 = vmul.f32 %v2646_v46, %v2526_v38  ;;  %v710_v0 = vadd.f32 %v706_v2, %v700_v3  ;;  %v842_v26 = vmul.f32 %v2742_v27, %v2540_v31 }
 0x244   :  { %384 = vrot.lane.b32.xlu0 %v378_v9, %s2259_s12  ;;  %877 = vrot.lane.b32.xlu1 %v871_v57, %s2265_s20  ;;  %v858_v8 = vmul.f32 %v2766_v44, %v2548_v42  ;;  %v930_v39 = vstv %s2829_s19  ;;  %v597_v51 = vadd.f32 %v593_v15, %v587_v6  ;;  %v766_v56 = vmul.f32 %v2536_v29, %v2540_v31 }
 0x245   :  { %v782_v41 = vmul.f32 %v2669_v7, %v2548_v42  ;;  %v940_v46 = vstv %s2837_s8  ;;  %v720_v17 = vadd.f32 %v716_v24, %v710_v0  ;;  %v852_v32 = vadd.f32 %v848_v10, %v842_v26 }
 0x246   :  { %v868_v27 = vmul.f32 %v2775_v45, %v2581_v61  ;;  %v922_v44 = vmul.f32 %v920_v28, %v2490_v33  ;;  %v607_v62 = vadd.f32 %v603_v19, %v597_v51  ;;  %v776_v59 = vadd.f32 %v772_v55, %v766_v56 }
 0x247   :  { %v792_v11 = vmul.f32 %v2725_v16, %v2581_v61  ;;  %v921_v23 = vmul.f32 %v920_v28, %v2498_v20  ;;  %v862_v40 = vadd.f32 %v858_v8, %v852_v32  ;;  %v916_v29 = vmul.f32 %v914_v63, %v2506_v22 }
 0x248   :  { %537 = vrot.lane.b32.xlu0 %v531_v1, %s2261_s17  ;;  %461 = vrot.lane.b32.xlu1 %v455_v60, %s2260_s14  ;;  %v932_v7 = vmul.f32 %v930_v39, %v2517_v25  ;;  %v786_v13 = vadd.f32 %v782_v41, %v776_v59  ;;  %v915_v45 = vmul.f32 %v914_v63, %v2504_v21  ;;  %v388_v41 = vlaneseq  ;;  %v2933_v59 = vld [vmem:[#allocation8] sm:$0xf] }
 0x249   :  { %v931_v14 = vmul.f32 %v930_v39, %v2514_v35  ;;  %v872_v5 = vadd.f32 %v868_v27, %v862_v40  ;;  %v926_v9 = vadd.f32 %v922_v44, %v916_v29  ;;  %v942_v16 = vmul.f32 %v940_v46, %v2578_v54  ;;  %v2937_v40 = vld [vmem:[#allocation8 + $0x4] sm:$0xf] }
 0x24a   :  { %v941_v36 = vmul.f32 %v940_v46, %v2575_v53  ;;  %v796_v18 = vadd.f32 %v792_v11, %v786_v13  ;;  %v925_v49 = vadd.f32 %v921_v23, %v915_v45  ;;  %v924_v57 = vmul.f32 %v920_v28, %v2526_v38 }
 0x24b   :  { %v923_v58 = vmul.f32 %v920_v28, %v2635_v43  ;;  %v936_v50 = vadd.f32 %v932_v7, %v926_v9  ;;  %v918_v4 = vmul.f32 %v914_v63, %v2540_v31  ;;  %v934_v12 = vmul.f32 %v930_v39, %v2548_v42  ;;  %v2941_v7 = vld [vmem:[#allocation8 + $0x8] sm:$0xf] }
 0x24c   :  { %727 = vrot.lane.b32.xlu0 %v720_v17, %s2263_s23  ;;  %613 = vrot.lane.b32.xlu1 %v607_v62, %s2262_s21  ;;  %v935_v48 = vadd.f32 %v931_v14, %v925_v49  ;;  %v917_v2 = vmul.f32 %v914_v63, %v2538_v30  ;;  %v933_v37 = vmul.f32 %v930_v39, %v2682_v47  ;;  %v398_v32 = vshrl.u32 %v388_v41, 7  ;;  %v2955_v49 = vld [vmem:[#allocation8 + $0xc] sm:$0xf] }
 0x24d   :  { %v946_v52 = vadd.f32 %v942_v16, %v936_v50  ;;  %v944_v15 = vmul.f32 %v940_v46, %v2581_v61  ;;  %v928_v3 = vadd.f32 %v924_v57, %v918_v4  ;;  %v943_v24 = vmul.f32 %v940_v46, %v2710_v34 }
 0x24e   :  { %v945_v1 = vadd.f32 %v941_v36, %v935_v48  ;;  %v927_v28 = vadd.f32 %v923_v58, %v917_v2  ;;  %v2931_v62 = vsub.s32 1, %v398_v32  ;;  %v2935_v11 = vsub.s32 0, %v398_v32 }
 0x24f   :  { %v938_v10 = vadd.f32 %v934_v12, %v928_v3  ;;  %v656_v23 = vstv %s2003_s25  ;;  %v2939_v29 = vand.u32 127, %v388_v41  ;;  %v650_v45 = vstv %s2002_s24  ;;  %v2964_v12 = vld [vmem:[#allocation8 + $0x14] sm:$0xf] }
 0x250   :  { %879 = vrot.lane.b32.xlu0 %v872_v5, %s2265_s20  ;;  %803 = vrot.lane.b32.xlu1 %v796_v18, %s2264_s4  ;;  %v937_v60 = vadd.f32 %v933_v37, %v927_v28  ;;  %v666_v14 = vstv %s2004_s26  ;;  %v2945_v5 = vstv %s2005_s28  ;;  %v2951_v36 = vsub.s32 2, %v398_v32 }
 0x251   :  { %v948_v6 = vadd.f32 %v944_v15, %v938_v10  ;;  %v2953_v18 = vsub.s32 3, %v398_v32  ;;  %v657_v57 = vmul.f32 %v656_v23, %v2498_v20  ;;  %v658_v48 = vmul.f32 %v656_v23, %v2490_v33 }
 0x252   :  { %v947_v19 = vadd.f32 %v943_v24, %v937_v60  ;;  %v667_v15 = vmul.f32 %v666_v14, %v2514_v35  ;;  %vm465_vm0 = vcmp.lt.s32.totalorder %v2939_v29, 16  ;;  %v652_v10 = vmul.f32 %v650_v45, %v2506_v22 }
 0x253   :  { %4183 = vst [vmem:[#allocation37_spill] sm:$0xff] %v2953_v18  ;;  %v668_v60 = vmul.f32 %v666_v14, %v2517_v25  ;;  %vm617_vm1 = vcmp.lt.s32.totalorder %v2939_v29, 1  ;;  %v677_v32 = vmul.f32 %v2945_v5, %v2575_v53  ;;  %v678_v2 = vmul.f32 %v2945_v5, %v2578_v54 }
 0x254   :  { %951 = vrot.lane.b32.xlu0 %v946_v52, %s2266_s2  ;;  %949 = vrot.lane.b32.xlu1 %v945_v1, %s2266_s2  ;;  %v651_v52 = vmul.f32 %v650_v45, %v2504_v21  ;;  %v2973_v1 = vld [vmem:[#allocation8 + $0x18] sm:$0xf]  ;;  %vm390_vm2 = vcmp.lt.s32.totalorder %v2939_v29, 17  ;;  %vm729_vm3 = vcmp.lt.s32.totalorder %v2939_v29, 127  ;;  %v662_v58 = vadd.f32 %v658_v48, %v652_v10 }
 0x255   :  { %vm805_vm4 = vcmp.lt.s32.totalorder %v2939_v29, 113  ;;  %vm881_vm5 = vcmp.lt.s32.totalorder %v2939_v29, 112  ;;  %v659_v3 = vmul.f32 %v656_v23, %v2635_v43  ;;  %vm541_vm6 = vcmp.lt.s32.totalorder %v2939_v29, 15 }
 0x256   :  { %v661_v41 = vadd.f32 %v657_v57, %v651_v52  ;;  %v672_v48 = vadd.f32 %v668_v60, %v662_v58  ;;  %v653_v58 = vmul.f32 %v650_v45, %v2538_v30  ;;  %v669_v60 = vmul.f32 %v666_v14, %v2682_v47 }
 0x257   :  { %v654_v43 = vmul.f32 %v650_v45, %v2540_v31  ;;  %v680_v45 = vmul.f32 %v2945_v5, %v2581_v61  ;;  %v4185_v61 = vrot.slane %v2937_v40, %v2931_v62  ;;  %v4194_v33 = vrot.slane %v2941_v7, %v2935_v11 }
 0x258   :  { %955 = vrot.lane.b32.xlu0 %v948_v6, %s2266_s2  ;;  %953 = vrot.lane.b32.xlu1 %v947_v19, %s2266_s2  ;;  %v2986_v19 = vld [vmem:[#allocation8 + $0x1c] sm:$0xf]  ;;  %v671_v37 = vadd.f32 %v667_v15, %v661_v41  ;;  %v660_v41 = vmul.f32 %v656_v23, %v2526_v38  ;;  %v670_v15 = vmul.f32 %v666_v14, %v2548_v42  ;;  %vm957_vm7 = vcmp.lt.s32.totalorder %v2939_v29, 111 }
 0x259   :  { %v892_v28 = vrot.slane %v2986_v19, %v2935_v11  ;;  %v3030_v23 = vadd.f32 %v678_v2, %v672_v48  ;;  %v663_v38 = vadd.f32 %v659_v3, %v653_v58  ;;  %v3044_v2 = vld [vmem:[#allocation8 + $0x20] sm:$0xf] }
 0x25a   :  { %v3024_v50 = vadd.f32 %v677_v32, %v671_v37  ;;  %v664_v37 = vadd.f32 %v660_v41, %v654_v43  ;;  %v679_v32 = vmul.f32 %v2945_v5, %v2710_v34 }
 0x25b   :  { %v673_v48 = vadd.f32 %v669_v60, %v663_v38 }
 0x25c   :  { %v674_v41 = vadd.f32 %v670_v15, %v664_v37  ;;  %v4184_v15 = vrot.slane %v2937_v40, %v2935_v11 }
 0x25d   :  { %v3077_v58 = vadd.f32 %v679_v32, %v673_v48 }
 0x28e   :  { %v2907_v63 = vpop.permute.xlu0 %382  ;;  %v2909_v55 = vpop.permute.xlu1 %380 }
 0x28f   :  { %v393_v37 = vsel %vm390_vm2, %v2909_v55, %v2907_v63 }
 0x292   :  { %v2911_v0 = vpop.permute.xlu0 %457  ;;  %v2913_v26 = vpop.permute.xlu1 %386 }
 0x293   :  { %v394_v48 = vsel %vm390_vm2, %v2913_v26, %v2909_v55 }
 0x296   :  { %v2915_v8 = vpop.permute.xlu0 %463  ;;  %v2917_v39 = vpop.permute.xlu1 %459 }
 0x297   :  { %v469_v38 = vsel %vm465_vm0, %v2915_v8, %v2911_v0  ;;  %v468_v57 = vsel %vm465_vm0, %v2911_v0, %v2917_v39 }
 0x298   :  { %v493_v3 = vmul.f32 %v4184_v15, %v469_v38  ;;  %v494_v42 = vmul.f32 %v4185_v61, %v468_v57  ;;  %v4186_v38 = vrot.slane %v2955_v49, %v2935_v11  ;;  %v4188_v61 = vrot.slane %v2964_v12, %v2935_v11 }
 0x29a   :  { %v2919_v51 = vpop.permute.xlu0 %535  ;;  %v2921_v56 = vpop.permute.xlu1 %533 }
 0x29b   :  { %v544_v31 = vsel %vm541_vm6, %v2921_v56, %v2919_v51 }
 0x29e   :  { %v2923_v46 = vpop.permute.xlu0 %609  ;;  %v2925_v17 = vpop.permute.xlu1 %539 }
 0x29f   :  { %v545_v55 = vsel %vm541_vm6, %v2925_v17, %v2921_v56 }
 0x2a0   :  { %v569_v22 = vmul.f32 %v4194_v33, %v545_v55 }
 0x2a2   :  { %v2927_v27 = vpop.permute.xlu0 %615  ;;  %v2929_v44 = vpop.permute.xlu1 %611 }
 0x2a3   :  { %v621_v4 = vsel %vm617_vm1, %v2927_v27, %v2923_v46  ;;  %v620_v0 = vsel %vm617_vm1, %v2923_v46, %v2929_v44 }
 0x2a4   :  { %v645_v15 = vmul.f32 %v4186_v38, %v621_v4  ;;  %v4190_v4 = vrot.slane %v2933_v59, %v2931_v62 }
 0x2a6   :  { %v2943_v13 = vpop.permute.xlu0 %723  ;;  %v2947_v9 = vpop.permute.xlu1 %721  ;;  %v418_v38 = vmul.f32 %v4190_v4, %v393_v37  ;;  %v4195_v4 = vrot.slane %v2986_v19, %v2931_v62 }
 0x2a7   :  { %v732_v43 = vsel %vm729_vm3, %v2947_v9, %v2943_v13 }
 0x2a8   :  { %v757_v57 = vmul.f32 %v4188_v61, %v732_v43  ;;  %v4192_v43 = vrot.slane %v2964_v12, %v2931_v62 }
 0x2aa   :  { %v2980_v24 = vpop.permute.xlu0 %797  ;;  %v2984_v6 = vpop.permute.xlu1 %725  ;;  %v997_v55 = vadd.f32 %v757_v57, %v3024_v50 }
 0x2ab   :  { %v731_v46 = vsel %vm729_vm3, %v2943_v13, %v2984_v6  ;;  %v4187_v13 = vrot.slane %v2955_v49, %v2931_v62 }
 0x2ac   :  { %v758_v61 = vmul.f32 %v4192_v43, %v731_v46  ;;  %v684_v43 = vadd.f32 %v680_v45, %v674_v41  ;;  %v4198_v41 = vrot.slane %v2964_v12, %v2951_v36 }
 0x2ae   :  { %v3009_v10 = vpop.permute.xlu0 %801  ;;  %v3011_v16 = vpop.permute.xlu1 %799 }
 0x2af   :  { %v808_v32 = vsel %vm805_vm4, %v2980_v24, %v3011_v16  ;;  %v807_v37 = vsel %vm805_vm4, %v3011_v16, %v3009_v10  ;;  %v4196_v16 = vrot.slane %v2973_v1, %v2931_v62 }
 0x2b2   :  { %v876_v30 = vpop.permute.xlu0 %875  ;;  %v3036_v47 = vpop.permute.xlu1 %873 }
 0x2b3   :  { %v884_v60 = vsel %vm881_vm5, %v3036_v47, %v876_v30 }
 0x2b4   :  { %v909_v14 = vmul.f32 %v892_v28, %v884_v60  ;;  %v646_v28 = vmul.f32 %v4187_v13, %v620_v0  ;;  %v4189_v60 = vrot.slane %v2973_v1, %v2935_v11  ;;  %v4191_v0 = vrot.slane %v2933_v59, %v2935_v11 }
 0x2b6   :  { %v385_v52 = vpop.permute.xlu0 %384  ;;  %v878_v5 = vpop.permute.xlu1 %877  ;;  %v833_v34 = vmul.f32 %v4189_v60, %v808_v32  ;;  %v417_v13 = vmul.f32 %v4191_v0, %v394_v48  ;;  %v993_v32 = vadd.f32 %v645_v15, %v569_v22 }
 0x2b7   :  { %v883_v54 = vsel %vm881_vm5, %v876_v30, %v878_v5  ;;  %v4193_v30 = vrot.slane %v2941_v7, %v2931_v62  ;;  %v391_v50 = vsel %vm390_vm2, %v385_v52, %v2913_v26 }
 0x2b8   :  { %v1001_v48 = vadd.f32 %v909_v14, %v833_v34  ;;  %v989_v46 = vadd.f32 %v493_v3, %v417_v13  ;;  %v910_v0 = vmul.f32 %v4195_v4, %v883_v54  ;;  %v998_v34 = vadd.f32 %v758_v61, %v3030_v23 }
 0x2b9   :  { %v570_v60 = vmul.f32 %v4193_v30, %v544_v31  ;;  %v976_v31 = vrot.slane %v3044_v2, %v2951_v36  ;;  %v990_v30 = vadd.f32 %v494_v42, %v418_v38  ;;  %v834_v14 = vmul.f32 %v4196_v16, %v807_v37 }
 0x2ba   :  { %v538_v56 = vpop.permute.xlu0 %537  ;;  %v462_v25 = vpop.permute.xlu1 %461  ;;  %v1009_v22 = vadd.f32 %v1001_v48, %v997_v55  ;;  %v392_v23 = vsel %vm390_vm2, %v2907_v63, %v385_v52  ;;  %v4197_v63 = vrot.slane %v2941_v7, %v2951_v36  ;;  %v4202_v13 = vrot.slane %v2986_v19, %v2953_v18 }
 0x2bb   :  { %v994_v33 = vadd.f32 %v646_v28, %v570_v60  ;;  %v543_v54 = vsel %vm541_vm6, %v2919_v51, %v538_v56  ;;  %v1002_v3 = vadd.f32 %v910_v0, %v834_v14  ;;  %v542_v51 = vsel %vm541_vm6, %v538_v56, %v2925_v17 }
 0x2bc   :  { %v571_v52 = vmul.f32 %v4197_v63, %v543_v54  ;;  %v4201_v56 = vrot.slane %v2986_v19, %v2951_v36  ;;  %v4203_v61 = vrot.slane %v2937_v40, %v2951_v36  ;;  %v4205_v37 = vrot.slane %v2973_v1, %v2951_v36 }
 0x2bd   :  { %v4206_v19 = vrot.slane %v2973_v1, %v2953_v18  ;;  %v4207_v0 = vrot.slane %v2933_v59, %v2951_v36  ;;  %v4208_v55 = vrot.slane %v2941_v7, %v2953_v18 }
 0x2be   :  { %v728_v53 = vpop.permute.xlu0 %727  ;;  %v614_v35 = vpop.permute.xlu1 %613 }
 0x2bf   :  { %v730_v42 = vsel %vm729_vm3, %v2984_v6, %v728_v53  ;;  %v619_v45 = vsel %vm617_vm1, %v2929_v44, %v614_v35  ;;  %v466_v6 = vsel %vm465_vm0, %v462_v25, %v2915_v8  ;;  %v618_v26 = vsel %vm617_vm1, %v614_v35, %v2927_v27 }
 0x2c0   :  { %v467_v44 = vsel %vm465_vm0, %v2917_v39, %v462_v25  ;;  %v733_v17 = vsel %vm729_vm3, %v728_v53, %v2947_v9  ;;  %v759_v8 = vmul.f32 %v4198_v41, %v730_v42  ;;  %v4199_v35 = vrot.slane %v2955_v49, %v2951_v36 }
 0x2c1   :  { %v4200_v39 = vrot.slane %v2955_v49, %v2953_v18  ;;  %v4204_v49 = vrot.slane %v2964_v12, %v2953_v18  ;;  %v572_v16 = vmul.f32 %v4208_v55, %v542_v51  ;;  %v4209_v12 = vrot.slane %v2937_v40, %v2953_v18 }
 0x2c2   :  { %v880_v15 = vpop.permute.xlu0 %879  ;;  %v804_v28 = vpop.permute.xlu1 %803  ;;  %v647_v27 = vmul.f32 %v4199_v35, %v619_v45  ;;  %v999_v54 = vadd.f32 %v759_v8, %v3077_v58  ;;  %v1010_v51 = vadd.f32 %v1002_v3, %v998_v34  ;;  %v4211_v58 = vrot.slane %v3044_v2, %v2935_v11 }
 0x2c3   :  { %v882_v57 = vsel %vm881_vm5, %v878_v5, %v880_v15  ;;  %v885_v25 = vsel %vm881_vm5, %v880_v15, %v3036_v47  ;;  %v806_v53 = vsel %vm805_vm4, %v3009_v10, %v804_v28  ;;  %v648_v9 = vmul.f32 %v4200_v39, %v618_v26 }
 0x2c4   :  { %v911_v38 = vmul.f32 %v4201_v56, %v882_v57  ;;  %v912_v5 = vmul.f32 %v4202_v13, %v885_v25  ;;  %v809_v47 = vsel %vm805_vm4, %v804_v28, %v2980_v24  ;;  %v495_v10 = vmul.f32 %v4203_v61, %v467_v44 }
 0x2c5   :  { %v760_v60 = vmul.f32 %v4204_v49, %v733_v17  ;;  %v835_v48 = vmul.f32 %v4205_v37, %v806_v53  ;;  %v836_v4 = vmul.f32 %v4206_v19, %v809_v47  ;;  %v419_v24 = vmul.f32 %v4207_v0, %v392_v23 }
 0x2c6   :  { %v496_v14 = vmul.f32 %v4209_v12, %v466_v6  ;;  %v952_v42 = vpop.permute.xlu0 %951  ;;  %v950_v45 = vpop.permute.xlu1 %949  ;;  %v995_v26 = vadd.f32 %v647_v27, %v571_v52  ;;  %v1005_v17 = vadd.f32 %v993_v32, %v989_v46  ;;  %v4210_v23 = vrot.slane %v2933_v59, %v2953_v18 }
 0x2c7   :  { %v1003_v63 = vadd.f32 %v911_v38, %v835_v48  ;;  %v1004_v1 = vadd.f32 %v912_v5, %v836_v4  ;;  %v960_v44 = vsel %vm957_vm7, %v950_v45, %v952_v42  ;;  %v996_v41 = vadd.f32 %v648_v9, %v572_v16 }
 0x2c8   :  { %v420_v7 = vmul.f32 %v4210_v23, %v391_v50  ;;  %v991_v15 = vadd.f32 %v495_v10, %v419_v24  ;;  %v1000_v40 = vadd.f32 %v760_v60, %v684_v43  ;;  %v985_v8 = vmul.f32 %v4211_v58, %v960_v44 }
 0x2c9   :  { %v1011_v6 = vadd.f32 %v1003_v63, %v999_v54  ;;  %v1006_v52 = vadd.f32 %v994_v33, %v990_v30  ;;  %v1013_v35 = vadd.f32 %v1009_v22, %v1005_v17  ;;  %v4212_v22 = vrot.slane %v3044_v2, %v2953_v18 }
 0x2ca   :  { %v992_v28 = vadd.f32 %v496_v14, %v420_v7  ;;  %v956_v27 = vpop.permute.xlu0 %955  ;;  %v954_v57 = vpop.permute.xlu1 %953  ;;  %v1007_v25 = vadd.f32 %v995_v26, %v991_v15  ;;  %v1012_v32 = vadd.f32 %v1004_v1, %v1000_v40  ;;  %v4213_v39 = vrot.slane %v3044_v2, %v2931_v62 }
 0x2cb   :  { %v961_v59 = vsel %vm957_vm7, %v956_v27, %v950_v45  ;;  %v958_v46 = vsel %vm957_vm7, %v954_v57, %v956_v27  ;;  %v1014_v43 = vadd.f32 %v1010_v51, %v1006_v52  ;;  %v959_v50 = vsel %vm957_vm7, %v952_v42, %v954_v57 }
 0x2cc   :  { %v1008_v34 = vadd.f32 %v996_v41, %v992_v28  ;;  %v987_v30 = vmul.f32 %v976_v31, %v958_v46  ;;  %v1017_v33 = vadd.f32 %v1013_v35, %v985_v8  ;;  %v988_v3 = vmul.f32 %v4212_v22, %v961_v59 }
 0x2cd   :  { %v1015_v53 = vadd.f32 %v1011_v6, %v1007_v25  ;;  %v986_v9 = vmul.f32 %v4213_v39, %v959_v50  ;;  %v1021_v56 = vstv %s4100_s6  ;;  %s1044_s6 = sld [smem:[#allocation12]]  ;;  %v1074_v51 = vstv %s1045_s11  ;;  %v1026_v39 = vld [vmem:[#allocation10] sm:$0xf] }
 0x2ce   :  { %v1016_v38 = vadd.f32 %v1012_v32, %v1008_v34  ;;  %v3272_v47 = vadd.f32 %v1021_v56, %v1017_v33 }
 0x2cf   :  { %v1018_v13 = vadd.f32 %v1014_v43, %v986_v9  ;;  %v1019_v5 = vadd.f32 %v1015_v53, %v987_v30  ;;  %v1028_v9 = vld [vmem:[#allocation10 + $0x4] sm:$0xf] }
 0x2d0   :  { %4214 = vst [vmem:[#allocation38_spill] sm:$0xff] %v3272_v47  ;;  %v1020_v31 = vadd.f32 %v1016_v38, %v988_v3  ;;  %v1034_v3 = vld [vmem:[#allocation10 + $0x10] sm:$0xf]  ;;  %v1030_v38 = vld [vmem:[#allocation10 + $0x8] sm:$0xf] }
 0x2d1   :  { %v3274_v61 = vadd.f32 %v1021_v56, %v1018_v13  ;;  %v3276_v10 = vadd.f32 %v1021_v56, %v1019_v5  ;;  %v3382_v13 = vrot.slane %v1034_v3, %v2931_v62 }
 0x2d2   :  { %v3280_v60 = vadd.f32 %v1021_v56, %v1020_v31  ;;  %v3379_v56 = vrot.slane %v1034_v3, %v2935_v11 }
 0x2d3   :  { %4215 = vst [vmem:[#allocation39_spill] sm:$0xff] %v3274_v61  ;;  %4216 = vst [vmem:[#allocation40_spill] sm:$0xff] %v3276_v10  ;;  %v1046_v49 = vadd.f32 %v3274_v61, %v3272_v47  ;;  %v1068_v17 = vstv %s1044_s6 }
 0x2d4   :  { %4217 = vst [vmem:[#allocation41_spill] sm:$0xff] %v3280_v60  ;;  %4218 = vst [vmem:[#allocation42_spill] sm:$0xff] %v3379_v56 }
 0x2d5   :  { %v1047_v2 = vadd.f32 %v1046_v49, %v3276_v10  ;;  %4219 = vst [vmem:[#allocation43_spill] sm:$0xff] %v3382_v13  ;;  %v3389_v49 = vrot.slane %v1034_v3, %v2951_v36 }
 0x2d7   :  { %v1048_v37 = vadd.f32 %v1047_v2, %v3280_v60  ;;  %4220 = vst [vmem:[#allocation44_spill] sm:$0xff] %v3389_v49  ;;  %v3392_v2 = vrot.slane %v1034_v3, %v2953_v18 }
 0x2d9   :  { %1049 = vadd.xlane.f32.xlu1 %v1048_v37  ;;  %4221 = vst [vmem:[#allocation45_spill] sm:$0xff] %v3392_v2  ;;  %v1032_v37 = vld [vmem:[#allocation10 + $0xc] sm:$0xf] }
 0x362   :  { %v1050_v48 = vpop.xlane.xlu1 %1049 }
 0x363   :  { %v1051_v19 = vmul.f32 0.001953125, %v1050_v48  ;;  %v3395_v48 = vrot.slane %v1026_v39, %v2931_v62 }
 0x365   :  { %v1052_v4 = vsub.f32 %v3272_v47, %v1051_v19  ;;  %v1053_v0 = vsub.f32 %v3274_v61, %v1051_v19  ;;  %v1054_v24 = vsub.f32 %v3276_v10, %v1051_v19  ;;  %v1055_v55 = vsub.f32 %v3280_v60, %v1051_v19 }
 0x366   :  { %v3398_v19 = vrot.slane %v1026_v39, %v2935_v11 }
 0x367   :  { %v1056_v16 = vmul.f32 %v1052_v4, %v1052_v4  ;;  %v1057_v12 = vmul.f32 %v1053_v0, %v1053_v0  ;;  %v1058_v14 = vmul.f32 %v1054_v24, %v1054_v24  ;;  %v1059_v42 = vmul.f32 %v1055_v55, %v1055_v55 }
 0x368   :  { %4222 = vst [vmem:[#allocation46_spill] sm:$0xff] %v3398_v19 }
 0x369   :  { %v1060_v54 = vadd.f32 %v1057_v12, %v1056_v16  ;;  %v3407_v16 = vrot.slane %v1030_v38, %v2931_v62  ;;  %v3410_v12 = vrot.slane %v1030_v38, %v2935_v11 }
 0x36b   :  { %v1061_v45 = vadd.f32 %v1060_v54, %v1058_v14  ;;  %4225 = vst [vmem:[#allocation49_spill] sm:$0xff] %v3410_v12  ;;  %v1040_v54 = vld [vmem:[#allocation10 + $0x1c] sm:$0xf] }
 0x36c   :  { %v3504_v10 = vrot.slane %v1040_v54, %v2951_v36 }
 0x36d   :  { %v1062_v26 = vadd.f32 %v1061_v45, %v1059_v42  ;;  %v3417_v42 = vrot.slane %v1032_v37, %v2931_v62 }
 0x36e   :  { %4236 = vst [vmem:[#allocation60_spill] sm:$0xff] %v3504_v10 }
 0x36f   :  { %1063 = vadd.xlane.f32.xlu0 %v1062_v26 }
 0x3f8   :  { %v1064_v63 = vpop.xlane.xlu0 %1063 }
 0x3f9   :  { %v1065_v1 = vmul.f32 0.001953125, %v1064_v63 }
 0x3fb   :  { %v1066_v44 = vadd.f32 1e-05, %v1065_v1 }
 0x3fd   :  { %2068 = vrsqrt.f32 %v1066_v44 }
 0x40a   :  { %v2069_v23 = vpop.eup %2068 }
 0x40b   :  { %v1069_v7 = vmul.f32 %v2069_v23, %v1068_v17  ;;  %v3433_v17 = vrot.slane %v1032_v37, %v2935_v11 }
 0x40d   :  { %v1070_v41 = vmul.f32 %v1069_v7, %v1052_v4  ;;  %v1071_v15 = vmul.f32 %v1069_v7, %v1053_v0  ;;  %v1073_v40 = vmul.f32 %v1069_v7, %v1055_v55  ;;  %v1072_v52 = vmul.f32 %v1069_v7, %v1054_v24  ;;  %v1036_v0 = vld [vmem:[#allocation10 + $0x14] sm:$0xf]  ;;  %v1038_v24 = vld [vmem:[#allocation10 + $0x18] sm:$0xf]  ;;  %4228 = vst [vmem:[#allocation52_spill] sm:$0xff] %v3433_v17 }
 0x40e   :  { %v3401_v4 = vrot.slane %v1028_v9, %v2931_v62  ;;  %v3404_v55 = vrot.slane %v1028_v9, %v2935_v11  ;;  %v3436_v23 = vrot.slane %v1036_v0, %v2935_v11  ;;  %v3439_v7 = vrot.slane %v1036_v0, %v2931_v62 }
 0x40f   :  { %v3288_v6 = vadd.f32 %v1074_v51, %v1070_v41  ;;  %v3290_v58 = vadd.f32 %v1074_v51, %v1071_v15  ;;  %v3296_v8 = vadd.f32 %v1074_v51, %v1073_v40  ;;  %v1077_v28 = vadd.f32 %v1074_v51, %v1072_v52 }
 0x410   :  { %4223 = vst [vmem:[#allocation47_spill] sm:$0xff] %v3401_v4  ;;  %4224 = vst [vmem:[#allocation48_spill] sm:$0xff] %v3404_v55  ;;  %v3442_v51 = vrot.slane %v1038_v24, %v2935_v11  ;;  %v3445_v41 = vrot.slane %v1038_v24, %v2931_v62  ;;  %v3448_v15 = vrot.slane %v1040_v54, %v2935_v11 }
 0x411   :  { %1081 = vrot.lane.b32.xlu1 %v3290_v58, %s2259_s12  ;;  %1079 = vrot.lane.b32.xlu0 %v3288_v6, %s2259_s12  ;;  %v3414_v14 = vmul.f32 %v3379_v56, %v3288_v6  ;;  %v3421_v45 = vmul.f32 %v3382_v13, %v3290_v58  ;;  %v3426_v1 = vmul.f32 %v3389_v49, %v1077_v28 }
 0x412   :  { %v3430_v44 = vmul.f32 %v3392_v2, %v3296_v8  ;;  %4229 = vst [vmem:[#allocation53_spill] sm:$0xff] %v3439_v7  ;;  %4230 = vst [vmem:[#allocation54_spill] sm:$0xff] %v3442_v51  ;;  %v3451_v40 = vrot.slane %v1040_v54, %v2931_v62  ;;  %v3463_v52 = vrot.slane %v1028_v9, %v2953_v18 }
 0x413   :  { %4226 = vst [vmem:[#allocation50_spill] sm:$0xff] %v3426_v1  ;;  %4231 = vst [vmem:[#allocation55_spill] sm:$0xff] %v3448_v15  ;;  %v3478_v2 = vrot.slane %v1032_v37, %v2951_v36  ;;  %v3484_v49 = vrot.slane %v1036_v0, %v2951_v36  ;;  %v3487_v13 = vrot.slane %v1036_v0, %v2953_v18  ;;  %v3536_v1 = vstv %s4101_s7  ;;  %s2026_s7 = sld [smem:[#allocation12 + $0x1]] }
 0x414   :  { %4227 = vst [vmem:[#allocation51_spill] sm:$0xff] %v3430_v44  ;;  %4232 = vst [vmem:[#allocation56_spill] sm:$0xff] %v3463_v52  ;;  %v3490_v56 = vrot.slane %v1038_v24, %v2951_v36  ;;  %v3493_v60 = vrot.slane %v1038_v24, %v2953_v18  ;;  %v3507_v0 = vrot.slane %v1040_v54, %v2953_v18  ;;  %v3547_v52 = vld [vmem:[#allocation10 + $0x20] sm:$0xf] }
 0x415   :  { %1085 = vrot.lane.b32.xlu1 %v3296_v8, %s2259_s12  ;;  %1116 = vrot.lane.b32.xlu0 %v3288_v6, %s2260_s14  ;;  %4238 = vst [vmem:[#allocation62_spill] sm:$0xff] %v3536_v1 }
 0x416   :  { %4234 = vst [vmem:[#allocation58_spill] sm:$0xff] %v3490_v56  ;;  %4235 = vst [vmem:[#allocation59_spill] sm:$0xff] %v3493_v60 }
 0x417   :  { %4237 = vst [vmem:[#allocation61_spill] sm:$0xff] %v3507_v0 }
 0x419   :  { %1118 = vrot.lane.b32.xlu1 %v3290_v58, %s2260_s14  ;;  %1122 = vrot.lane.b32.xlu0 %v3296_v8, %s2260_s14 }
 0x41d   :  { %1153 = vrot.lane.b32.xlu1 %v3288_v6, %s2261_s17  ;;  %1155 = vrot.lane.b32.xlu0 %v3290_v58, %s2261_s17 }
 0x421   :  { %1159 = vrot.lane.b32.xlu1 %v3296_v8, %s2261_s17  ;;  %1190 = vrot.lane.b32.xlu0 %v3288_v6, %s2262_s21 }
 0x425   :  { %1192 = vrot.lane.b32.xlu1 %v3290_v58, %s2262_s21  ;;  %1196 = vrot.lane.b32.xlu0 %v3296_v8, %s2262_s21 }
 0x429   :  { %1252 = vrot.lane.b32.xlu1 %v3288_v6, %s2263_s23  ;;  %1254 = vrot.lane.b32.xlu0 %v3290_v58, %s2263_s23 }
 0x42d   :  { %1256 = vrot.lane.b32.xlu1 %v1077_v28, %s2263_s23  ;;  %1289 = vrot.lane.b32.xlu0 %v3288_v6, %s2264_s4 }
 0x431   :  { %1291 = vrot.lane.b32.xlu1 %v3290_v58, %s2264_s4  ;;  %1293 = vrot.lane.b32.xlu0 %v1077_v28, %s2264_s4 }
 0x435   :  { %1326 = vrot.lane.b32.xlu1 %v3288_v6, %s2265_s20  ;;  %1328 = vrot.lane.b32.xlu0 %v3290_v58, %s2265_s20 }
 0x439   :  { %1330 = vrot.lane.b32.xlu1 %v1077_v28, %s2265_s20  ;;  %1083 = vrot.lane.b32.xlu0 %v1077_v28, %s2259_s12 }
 0x43d   :  { %1120 = vrot.lane.b32.xlu1 %v1077_v28, %s2260_s14  ;;  %1157 = vrot.lane.b32.xlu0 %v1077_v28, %s2261_s17 }
 0x441   :  { %1194 = vrot.lane.b32.xlu1 %v1077_v28, %s2262_s21  ;;  %1258 = vrot.lane.b32.xlu0 %v3296_v8, %s2263_s23 }
 0x445   :  { %1295 = vrot.lane.b32.xlu1 %v3296_v8, %s2264_s4  ;;  %1332 = vrot.lane.b32.xlu0 %v3296_v8, %s2265_s20 }
 0x449   :  { %1363 = vrot.lane.b32.xlu1 %v3288_v6, %s2266_s2  ;;  %1365 = vrot.lane.b32.xlu0 %v3290_v58, %s2266_s2  ;;  %v3454_v6 = vrot.slane %v1026_v39, %v2951_v36  ;;  %v3457_v58 = vrot.slane %v1026_v39, %v2953_v18  ;;  %v3475_v39 = vrot.slane %v1030_v38, %v2953_v18 }
 0x44b   :  { %4233 = vst [vmem:[#allocation57_spill] sm:$0xff] %v3475_v39 }
 0x44d   :  { %1367 = vrot.lane.b32.xlu1 %v1077_v28, %s2266_s2  ;;  %1369 = vrot.lane.b32.xlu0 %v3296_v8, %s2266_s2  ;;  %v3460_v8 = vrot.slane %v1028_v9, %v2951_v36  ;;  %v3466_v28 = vrot.slane %v1030_v38, %v2951_v36  ;;  %v3481_v9 = vrot.slane %v1032_v37, %v2953_v18 }
 0x483   :  { %v3350_v35 = vpop.permute.xlu1 %1081  ;;  %v3352_v27 = vpop.permute.xlu0 %1079 }
 0x484   :  { %v1089_v54 = vsel %vm390_vm2, %v3352_v27, %v3350_v35 }
 0x485   :  { %v1113_v39 = vmul.f32 %v3395_v48, %v1089_v54 }
 0x487   :  { %v3354_v57 = vpop.permute.xlu1 %1085  ;;  %v3356_v25 = vpop.permute.xlu0 %1116 }
 0x488   :  { %v1090_v24 = vsel %vm390_vm2, %v3354_v57, %v3352_v27 }
 0x489   :  { %v1112_v60 = vmul.f32 %v3398_v19, %v1090_v24 }
 0x48b   :  { %v3358_v32 = vpop.permute.xlu1 %1118  ;;  %v3360_v59 = vpop.permute.xlu0 %1122 }
 0x48c   :  { %v1127_v38 = vsel %vm465_vm0, %v3360_v59, %v3356_v25  ;;  %v1126_v61 = vsel %vm465_vm0, %v3356_v25, %v3358_v32 }
 0x48d   :  { %v1149_v0 = vmul.f32 %v3404_v55, %v1127_v38  ;;  %v1150_v56 = vmul.f32 %v3401_v4, %v1126_v61 }
 0x48f   :  { %v3362_v46 = vpop.permute.xlu1 %1153  ;;  %v3364_v34 = vpop.permute.xlu0 %1155  ;;  %v1401_v54 = vadd.f32 %v1150_v56, %v1113_v39 }
 0x490   :  { %v1163_v38 = vsel %vm541_vm6, %v3362_v46, %v3364_v34 }
 0x493   :  { %v3366_v43 = vpop.permute.xlu1 %1159  ;;  %v3368_v50 = vpop.permute.xlu0 %1190 }
 0x494   :  { %v1164_v37 = vsel %vm541_vm6, %v3366_v43, %v3362_v46  ;;  %v3565_v46 = vrot.slane %v3547_v52, %v2935_v11 }
 0x495   :  { %v1186_v27 = vmul.f32 %v3410_v12, %v1164_v37 }
 0x496   :  { %4239 = vst [vmem:[#allocation63_spill] sm:$0xff] %v3565_v46 }
 0x497   :  { %v3370_v30 = vpop.permute.xlu1 %1192  ;;  %v3372_v33 = vpop.permute.xlu0 %1196 }
 0x498   :  { %v1201_v3 = vsel %vm617_vm1, %v3372_v33, %v3368_v50  ;;  %v1200_v18 = vsel %vm617_vm1, %v3368_v50, %v3370_v30 }
 0x499   :  { %v1223_v47 = vmul.f32 %v3433_v17, %v1201_v3  ;;  %v1224_v12 = vmul.f32 %v3417_v42, %v1200_v18  ;;  %v1187_v18 = vmul.f32 %v3407_v16, %v1163_v38 }
 0x49b   :  { %v3374_v22 = vpop.permute.xlu1 %1252  ;;  %v3376_v53 = vpop.permute.xlu0 %1254  ;;  %v1405_v11 = vadd.f32 %v1224_v12, %v1187_v18  ;;  %v4242_v18 = vld [vmem:[#allocation57_spill] sm:$0xff] }
 0x49c   :  { %v1262_v25 = vsel %vm729_vm3, %v3374_v22, %v3376_v53 }
 0x49d   :  { %v1285_v55 = vmul.f32 %v3436_v23, %v1262_v25 }
 0x49f   :  { %v3384_v5 = vpop.permute.xlu1 %1256  ;;  %v3386_v31 = vpop.permute.xlu0 %1289 }
 0x4a0   :  { %v1261_v50 = vsel %vm729_vm3, %v3376_v53, %v3384_v5  ;;  %v1404_v53 = vadd.f32 %v1223_v47, %v1186_v27  ;;  %v3578_v27 = vrot.slane %v3547_v52, %v2951_v36 }
 0x4a1   :  { %v1286_v24 = vmul.f32 %v3439_v7, %v1261_v50 }
 0x4a2   :  { %4241 = vst [vmem:[#allocation65_spill] sm:$0xff] %v3578_v27 }
 0x4a3   :  { %v1292_v26 = vpop.permute.xlu1 %1291  ;;  %v3423_v63 = vpop.permute.xlu0 %1293  ;;  %v1409_v50 = vadd.f32 %v1286_v24, %v3421_v45 }
 0x4a4   :  { %v1299_v10 = vsel %vm805_vm4, %v3386_v31, %v1292_v26  ;;  %v1298_v47 = vsel %vm805_vm4, %v1292_v26, %v3423_v63 }
 0x4a5   :  { %v1322_v61 = vmul.f32 %v3442_v51, %v1299_v10 }
 0x4a7   :  { %v3472_v20 = vpop.permute.xlu1 %1326  ;;  %v1329_v21 = vpop.permute.xlu0 %1328 }
 0x4a8   :  { %v1336_v44 = vsel %vm881_vm5, %v3472_v20, %v1329_v21 }
 0x4a9   :  { %v1359_v37 = vmul.f32 %v3448_v15, %v1336_v44  ;;  %v1400_v44 = vadd.f32 %v1149_v0, %v1112_v60  ;;  %v1408_v0 = vadd.f32 %v1285_v55, %v3414_v14 }
 0x4ab   :  { %v1331_v3 = vpop.permute.xlu1 %1330  ;;  %v1084_v17 = vpop.permute.xlu0 %1083  ;;  %v1412_v25 = vadd.f32 %v1359_v37, %v1322_v61  ;;  %v1416_v60 = vadd.f32 %v1404_v53, %v1400_v44 }
 0x4ac   :  { %v1335_v1 = vsel %vm881_vm5, %v1329_v21, %v1331_v3  ;;  %v3573_v21 = vrot.slane %v3547_v52, %v2931_v62  ;;  %v1088_v26 = vsel %vm390_vm2, %v3350_v35, %v1084_v17  ;;  %v1323_v62 = vmul.f32 %v3445_v41, %v1298_v47 }
 0x4ad   :  { %v1360_v10 = vmul.f32 %v3451_v40, %v1335_v1  ;;  %v1420_v45 = vadd.f32 %v1412_v25, %v1408_v0  ;;  %v1087_v39 = vsel %vm390_vm2, %v1084_v17, %v3354_v57  ;;  %v4243_v25 = vld [vmem:[#allocation58_spill] sm:$0xff]  ;;  %v4244_v0 = vld [vmem:[#allocation59_spill] sm:$0xff] }
 0x4ae   :  { %4240 = vst [vmem:[#allocation64_spill] sm:$0xff] %v3573_v21  ;;  %v1115_v44 = vmul.f32 %v3457_v58, %v1087_v39 }
 0x4af   :  { %v1121_v4 = vpop.permute.xlu1 %1120  ;;  %v1158_v19 = vpop.permute.xlu0 %1157 }
 0x4b0   :  { %v1125_v56 = vsel %vm465_vm0, %v3358_v32, %v1121_v4  ;;  %v1162_v36 = vsel %vm541_vm6, %v3364_v34, %v1158_v19  ;;  %v1413_v34 = vadd.f32 %v1360_v10, %v1323_v62 }
 0x4b1   :  { %v1151_v38 = vmul.f32 %v3460_v8, %v1125_v56  ;;  %v1188_v37 = vmul.f32 %v3466_v28, %v1162_v36  ;;  %v4246_v36 = vld [vmem:[#allocation60_spill] sm:$0xff] }
 0x4b3   :  { %v1195_v12 = vpop.permute.xlu1 %1194  ;;  %v1259_v1 = vpop.permute.xlu0 %1258 }
 0x4b4   :  { %v1198_v55 = vsel %vm617_vm1, %v1195_v12, %v3372_v33  ;;  %v1199_v35 = vsel %vm617_vm1, %v3370_v30, %v1195_v12  ;;  %v1260_v14 = vsel %vm729_vm3, %v3384_v5, %v1259_v1  ;;  %v1263_v32 = vsel %vm729_vm3, %v1259_v1, %v3374_v22  ;;  %v4247_v12 = vld [vmem:[#allocation61_spill] sm:$0xff] }
 0x4b5   :  { %v1114_v33 = vmul.f32 %v3454_v6, %v1088_v26  ;;  %v1124_v30 = vsel %vm465_vm0, %v1121_v4, %v3360_v59  ;;  %v1161_v5 = vsel %vm541_vm6, %v1158_v19, %v3366_v43  ;;  %v1225_v22 = vmul.f32 %v3478_v2, %v1199_v35 }
 0x4b6   :  { %v1226_v53 = vmul.f32 %v3481_v9, %v1198_v55  ;;  %v1287_v57 = vmul.f32 %v3484_v49, %v1260_v14  ;;  %v1288_v17 = vmul.f32 %v3487_v13, %v1263_v32  ;;  %v1189_v47 = vmul.f32 %v4242_v18, %v1161_v5  ;;  %v4248_v14 = vld [vmem:[#allocation50_spill] sm:$0xff] }
 0x4b7   :  { %v1296_v24 = vpop.permute.xlu1 %1295  ;;  %v1333_v61 = vpop.permute.xlu0 %1332  ;;  %v1406_v56 = vadd.f32 %v1225_v22, %v1188_v37  ;;  %v1402_v55 = vadd.f32 %v1151_v38, %v1114_v33  ;;  %v1424_v37 = vadd.f32 %v1420_v45, %v1416_v60  ;;  %v4252_v60 = vld [vmem:[#allocation62_spill] sm:$0xff] }
 0x4b8   :  { %v1297_v59 = vsel %vm805_vm4, %v3423_v63, %v1296_v24  ;;  %v1300_v43 = vsel %vm805_vm4, %v1296_v24, %v3386_v31  ;;  %v1334_v19 = vsel %vm881_vm5, %v1331_v3, %v1333_v61  ;;  %v1337_v4 = vsel %vm881_vm5, %v1333_v61, %v3472_v20  ;;  %v4245_v63 = vld [vmem:[#allocation56_spill] sm:$0xff]  ;;  %v4249_v24 = vld [vmem:[#allocation51_spill] sm:$0xff] }
 0x4b9   :  { %v1324_v10 = vmul.f32 %v4243_v25, %v1297_v59  ;;  %v1325_v26 = vmul.f32 %v4244_v0, %v1300_v43  ;;  %v1152_v62 = vmul.f32 %v4245_v63, %v1124_v30  ;;  %v1361_v31 = vmul.f32 %v4246_v36, %v1334_v19  ;;  %v4250_v19 = vld [vmem:[#allocation37_spill] sm:$0xff]  ;;  %v4262_v63 = vld [vmem:[#allocation47_spill] sm:$0xff] }
 0x4ba   :  { %v1362_v1 = vmul.f32 %v4247_v12, %v1337_v4  ;;  %v1421_v3 = vadd.f32 %v1413_v34, %v1409_v50  ;;  %v1407_v35 = vadd.f32 %v1226_v53, %v1189_v47  ;;  %v1410_v20 = vadd.f32 %v1287_v57, %v4248_v14  ;;  %v4263_v25 = vld [vmem:[#allocation43_spill] sm:$0xff] }
 0x4bb   :  { %v1364_v32 = vpop.permute.xlu1 %1363  ;;  %v1366_v39 = vpop.permute.xlu0 %1365  ;;  %v1411_v5 = vadd.f32 %v1288_v17, %v4249_v24  ;;  %v1414_v61 = vadd.f32 %v1361_v31, %v1324_v10  ;;  %v1417_v30 = vadd.f32 %v1405_v11, %v1401_v54  ;;  %v3645_v50 = vrot.slane %v3547_v52, %v4250_v19 }
 0x4bc   :  { %v1415_v59 = vadd.f32 %v1362_v1, %v1325_v26  ;;  %v1373_v43 = vsel %vm957_vm7, %v1364_v32, %v1366_v39  ;;  %v1403_v34 = vadd.f32 %v1152_v62, %v1115_v44  ;;  %v1418_v33 = vadd.f32 %v1406_v56, %v1402_v55 }
 0x4bd   :  { %v1396_v22 = vmul.f32 %v3565_v46, %v1373_v43  ;;  %4251 = vst [vmem:[#allocation57_spill] sm:$0xff] %v3645_v50  ;;  %v1422_v38 = vadd.f32 %v1414_v61, %v1410_v20  ;;  %v1425_v17 = vadd.f32 %v1421_v3, %v1417_v30 }
 0x4be   :  { %v1423_v53 = vadd.f32 %v1415_v59, %v1411_v5  ;;  %v1419_v10 = vadd.f32 %v1407_v35, %v1403_v34 }
 0x4bf   :  { %v1428_v57 = vadd.f32 %v1424_v37, %v1396_v22  ;;  %v1368_v4 = vpop.permute.xlu1 %1367  ;;  %v1370_v47 = vpop.permute.xlu0 %1369  ;;  %v1426_v54 = vadd.f32 %v1422_v38, %v1418_v33 }
 0x4c0   :  { %v1372_v26 = vsel %vm957_vm7, %v1366_v39, %v1368_v4  ;;  %v1371_v11 = vsel %vm957_vm7, %v1368_v4, %v1370_v47  ;;  %v1374_v44 = vsel %vm957_vm7, %v1370_v47, %v1364_v32  ;;  %v1427_v56 = vadd.f32 %v1423_v53, %v1419_v10 }
 0x4c1   :  { %v1433_v45 = vadd.f32 %v4252_v60, %v1428_v57  ;;  %v1397_v52 = vmul.f32 %v3573_v21, %v1372_v26  ;;  %v1398_v62 = vmul.f32 %v3578_v27, %v1371_v11  ;;  %v1399_v31 = vmul.f32 %v3645_v50, %v1374_v44  ;;  %v4253_v57 = vld [vmem:[#allocation38_spill] sm:$0xff]  ;;  %v4255_v26 = vld [vmem:[#allocation40_spill] sm:$0xff] }
 0x4c3   :  { %v2022_v1 = vmul.f32 -1.442695, %v1433_v45  ;;  %v1429_v3 = vadd.f32 %v1425_v17, %v1397_v52  ;;  %v1430_v55 = vadd.f32 %v1426_v54, %v1398_v62  ;;  %v1431_v35 = vadd.f32 %v1427_v56, %v1399_v31  ;;  %v4254_v17 = vld [vmem:[#allocation39_spill] sm:$0xff]  ;;  %v4256_v45 = vld [vmem:[#allocation41_spill] sm:$0xff] }
 0x4c5   :  { %2070 = vpow2.f32 %v2022_v1  ;;  %v1434_v14 = vadd.f32 %v4252_v60, %v1429_v3  ;;  %v1435_v20 = vadd.f32 %v4252_v60, %v1430_v55  ;;  %v1436_v39 = vadd.f32 %v4252_v60, %v1431_v35  ;;  %v4260_v60 = vld [vmem:[#allocation49_spill] sm:$0xff] }
 0x4c7   :  { %v2023_v24 = vmul.f32 -1.442695, %v1434_v14  ;;  %v2024_v5 = vmul.f32 -1.442695, %v1435_v20  ;;  %v2025_v61 = vmul.f32 -1.442695, %v1436_v39 }
 0x4c9   :  { %2072 = vpow2.f32 %v2023_v24 }
 0x4ca   :  { %2074 = vpow2.f32 %v2024_v5 }
 0x4cb   :  { %2076 = vpow2.f32 %v2025_v61 }
 0x4d2   :  { %v2071_v32 = vpop.eup %2070 }
 0x4d3   :  { %v1449_v59 = vadd.f32 1.0, %v2071_v32 }
 0x4d5   :  { %2078 = vrcp.f32 %v1449_v59 }
 0x4d6   :  { %v2073_v43 = vpop.eup %2072 }
 0x4d7   :  { %v2075_v30 = vpop.eup %2074  ;;  %v1450_v22 = vadd.f32 1.0, %v2073_v43 }
 0x4d8   :  { %v2077_v37 = vpop.eup %2076  ;;  %v1451_v19 = vadd.f32 1.0, %v2075_v30 }
 0x4d9   :  { %2080 = vrcp.f32 %v1450_v22  ;;  %v1452_v34 = vadd.f32 1.0, %v2077_v37  ;;  %v1489_v22 = vstv %s2026_s7 }
 0x4da   :  { %2082 = vrcp.f32 %v1451_v19 }
 0x4db   :  { %2084 = vrcp.f32 %v1452_v34  ;;  %v1495_v34 = vstv %s2027_s16 }
 0x4e2   :  { %v2079_v33 = vpop.eup %2078 }
 0x4e3   :  { %v1461_v4 = vadd.f32 %v2079_v33, %v4253_v57  ;;  %v4258_v57 = vld [vmem:[#allocation42_spill] sm:$0xff] }
 0x4e6   :  { %v2081_v38 = vpop.eup %2080 }
 0x4e7   :  { %v2083_v53 = vpop.eup %2082  ;;  %v1462_v47 = vadd.f32 %v2081_v38, %v4254_v17 }
 0x4e8   :  { %v2085_v10 = vpop.eup %2084  ;;  %v1463_v54 = vadd.f32 %v2083_v53, %v4255_v26 }
 0x4e9   :  { %v1467_v11 = vadd.f32 %v1462_v47, %v1461_v4  ;;  %v1464_v52 = vadd.f32 %v2085_v10, %v4256_v45 }
 0x4eb   :  { %v1468_v44 = vadd.f32 %v1467_v11, %v1463_v54 }
 0x4ed   :  { %v1469_v62 = vadd.f32 %v1468_v44, %v1464_v52 }
 0x4ef   :  { %1470 = vadd.xlane.f32.xlu1 %v1469_v62 }
 0x578   :  { %v1471_v56 = vpop.xlane.xlu1 %1470 }
 0x579   :  { %v1472_v31 = vmul.f32 0.001953125, %v1471_v56 }
 0x57b   :  { %v1473_v1 = vsub.f32 %v1461_v4, %v1472_v31  ;;  %v1474_v3 = vsub.f32 %v1462_v47, %v1472_v31  ;;  %v1475_v55 = vsub.f32 %v1463_v54, %v1472_v31  ;;  %v1476_v35 = vsub.f32 %v1464_v52, %v1472_v31 }
 0x57d   :  { %v1477_v14 = vmul.f32 %v1473_v1, %v1473_v1  ;;  %v1478_v20 = vmul.f32 %v1474_v3, %v1474_v3  ;;  %v1479_v39 = vmul.f32 %v1475_v55, %v1475_v55  ;;  %v1480_v5 = vmul.f32 %v1476_v35, %v1476_v35 }
 0x57f   :  { %v1481_v24 = vadd.f32 %v1478_v20, %v1477_v14 }
 0x581   :  { %v1482_v61 = vadd.f32 %v1481_v24, %v1479_v39 }
 0x583   :  { %v1483_v32 = vadd.f32 %v1482_v61, %v1480_v5 }
 0x585   :  { %1484 = vadd.xlane.f32.xlu0 %v1483_v32 }
 0x60e   :  { %v1485_v59 = vpop.xlane.xlu0 %1484 }
 0x60f   :  { %v1486_v43 = vmul.f32 0.001953125, %v1485_v59 }
 0x611   :  { %v1487_v30 = vadd.f32 1e-05, %v1486_v43 }
 0x613   :  { %2086 = vrsqrt.f32 %v1487_v30 }
 0x620   :  { %v2087_v37 = vpop.eup %2086 }
 0x621   :  { %v1490_v19 = vmul.f32 %v2087_v37, %v1489_v22 }
 0x623   :  { %v1491_v33 = vmul.f32 %v1490_v19, %v1473_v1  ;;  %v1492_v38 = vmul.f32 %v1490_v19, %v1474_v3  ;;  %v1494_v53 = vmul.f32 %v1490_v19, %v1476_v35  ;;  %v1493_v54 = vmul.f32 %v1490_v19, %v1475_v55 }
 0x625   :  { %v3664_v4 = vadd.f32 %v1495_v34, %v1491_v33  ;;  %v3666_v47 = vadd.f32 %v1495_v34, %v1492_v38  ;;  %v3672_v10 = vadd.f32 %v1495_v34, %v1494_v53  ;;  %v3698_v11 = vadd.f32 %v1495_v34, %v1493_v54  ;;  %v4257_v53 = vld [vmem:[#allocation52_spill] sm:$0xff] }
 0x627   :  { %1502 = vrot.lane.b32.xlu1 %v3666_v47, %s2259_s12  ;;  %1500 = vrot.lane.b32.xlu0 %v3664_v4, %s2259_s12  ;;  %v1564_v50 = vmul.f32 %v3664_v4, %v4258_v57 }
 0x62b   :  { %1506 = vrot.lane.b32.xlu1 %v3672_v10, %s2259_s12  ;;  %1516 = vrot.lane.b32.xlu0 %v3664_v4, %s2260_s14 }
 0x62f   :  { %1518 = vrot.lane.b32.xlu1 %v3666_v47, %s2260_s14  ;;  %1522 = vrot.lane.b32.xlu0 %v3672_v10, %s2260_s14 }
 0x633   :  { %1532 = vrot.lane.b32.xlu1 %v3664_v4, %s2261_s17  ;;  %1534 = vrot.lane.b32.xlu0 %v3666_v47, %s2261_s17 }
 0x637   :  { %1538 = vrot.lane.b32.xlu1 %v3672_v10, %s2261_s17  ;;  %1548 = vrot.lane.b32.xlu0 %v3664_v4, %s2262_s21 }
 0x63b   :  { %1550 = vrot.lane.b32.xlu1 %v3666_v47, %s2262_s21  ;;  %1554 = vrot.lane.b32.xlu0 %v3672_v10, %s2262_s21 }
 0x63f   :  { %1568 = vrot.lane.b32.xlu1 %v3664_v4, %s2263_s23  ;;  %1570 = vrot.lane.b32.xlu0 %v3666_v47, %s2263_s23 }
 0x643   :  { %1572 = vrot.lane.b32.xlu1 %v3698_v11, %s2263_s23  ;;  %1584 = vrot.lane.b32.xlu0 %v3664_v4, %s2264_s4 }
 0x647   :  { %1586 = vrot.lane.b32.xlu1 %v3666_v47, %s2264_s4  ;;  %1588 = vrot.lane.b32.xlu0 %v3698_v11, %s2264_s4 }
 0x64b   :  { %1600 = vrot.lane.b32.xlu1 %v3664_v4, %s2265_s20  ;;  %1602 = vrot.lane.b32.xlu0 %v3666_v47, %s2265_s20 }
 0x64f   :  { %1604 = vrot.lane.b32.xlu1 %v3698_v11, %s2265_s20  ;;  %1504 = vrot.lane.b32.xlu0 %v3698_v11, %s2259_s12 }
 0x653   :  { %1520 = vrot.lane.b32.xlu1 %v3698_v11, %s2260_s14  ;;  %1536 = vrot.lane.b32.xlu0 %v3698_v11, %s2261_s17 }
 0x657   :  { %1552 = vrot.lane.b32.xlu1 %v3698_v11, %s2262_s21  ;;  %1574 = vrot.lane.b32.xlu0 %v3672_v10, %s2263_s23 }
 0x65b   :  { %1590 = vrot.lane.b32.xlu1 %v3672_v10, %s2264_s4  ;;  %1606 = vrot.lane.b32.xlu0 %v3672_v10, %s2265_s20 }
 0x65f   :  { %1616 = vrot.lane.b32.xlu1 %v3664_v4, %s2266_s2  ;;  %1618 = vrot.lane.b32.xlu0 %v3666_v47, %s2266_s2 }
 0x663   :  { %1620 = vrot.lane.b32.xlu1 %v3698_v11, %s2266_s2  ;;  %1622 = vrot.lane.b32.xlu0 %v3672_v10, %s2266_s2 }
 0x699   :  { %v3736_v52 = vpop.permute.xlu1 %1502  ;;  %v1501_v44 = vpop.permute.xlu0 %1500 }
 0x69a   :  { %v1510_v26 = vsel %vm390_vm2, %v1501_v44, %v3736_v52 }
 0x69d   :  { %v3738_v62 = vpop.permute.xlu1 %1506  ;;  %v1517_v56 = vpop.permute.xlu0 %1516 }
 0x69e   :  { %v1511_v33 = vsel %vm390_vm2, %v3738_v62, %v1501_v44 }
 0x6a1   :  { %v1519_v31 = vpop.permute.xlu1 %1518  ;;  %v3740_v1 = vpop.permute.xlu0 %1522 }
 0x6a2   :  { %v1527_v19 = vsel %vm465_vm0, %v3740_v1, %v1517_v56  ;;  %v1526_v38 = vsel %vm465_vm0, %v1517_v56, %v1519_v31 }
 0x6a3   :  { %v1529_v4 = vmul.f32 %v1526_v38, %v4262_v63 }
 0x6a5   :  { %v1533_v3 = vpop.permute.xlu1 %1532  ;;  %v1535_v55 = vpop.permute.xlu0 %1534 }
 0x6a6   :  { %v1542_v57 = vsel %vm541_vm6, %v1533_v3, %v1535_v55 }
 0x6a9   :  { %v3742_v35 = vpop.permute.xlu1 %1538  ;;  %v1549_v14 = vpop.permute.xlu0 %1548 }
 0x6aa   :  { %v1543_v34 = vsel %vm541_vm6, %v3742_v35, %v1533_v3 }
 0x6ab   :  { %v1544_v46 = vmul.f32 %v1543_v34, %v4260_v60  ;;  %v1513_v60 = vmul.f32 %v1510_v26, %v3395_v48 }
 0x6ad   :  { %v1551_v20 = vpop.permute.xlu1 %1550  ;;  %v1555_v39 = vpop.permute.xlu0 %1554  ;;  %v1633_v26 = vadd.f32 %v1529_v4, %v1513_v60 }
 0x6ae   :  { %v1559_v30 = vsel %vm617_vm1, %v1555_v39, %v1549_v14  ;;  %v1558_v17 = vsel %vm617_vm1, %v1549_v14, %v1551_v20  ;;  %v4261_v14 = vld [vmem:[#allocation46_spill] sm:$0xff] }
 0x6af   :  { %v1560_v54 = vmul.f32 %v1559_v30, %v4257_v53  ;;  %v4259_v30 = vld [vmem:[#allocation48_spill] sm:$0xff]  ;;  %v1512_v36 = vmul.f32 %v1511_v33, %v4261_v14  ;;  %v1565_v33 = vmul.f32 %v3666_v47, %v4263_v25 }
 0x6b0   :  { %v1528_v53 = vmul.f32 %v1527_v19, %v4259_v30  ;;  %v1561_v19 = vmul.f32 %v1558_v17, %v3417_v42  ;;  %v1545_v17 = vmul.f32 %v1542_v57, %v3407_v16 }
 0x6b1   :  { %v1569_v24 = vpop.permute.xlu1 %1568  ;;  %v1571_v5 = vpop.permute.xlu0 %1570  ;;  %v1636_v30 = vadd.f32 %v1560_v54, %v1544_v46 }
 0x6b2   :  { %v1578_v27 = vsel %vm729_vm3, %v1569_v24, %v1571_v5 }
 0x6b3   :  { %v1580_v34 = vmul.f32 %v1578_v27, %v3436_v23  ;;  %v4264_v27 = vld [vmem:[#allocation44_spill] sm:$0xff] }
 0x6b5   :  { %v1573_v61 = vpop.permute.xlu1 %1572  ;;  %v3744_v32 = vpop.permute.xlu0 %1584 }
 0x6b6   :  { %v1577_v12 = vsel %vm729_vm3, %v1571_v5, %v1573_v61 }
 0x6b7   :  { %v1581_v38 = vmul.f32 %v1577_v12, %v3439_v7 }
 0x6b9   :  { %v1587_v59 = vpop.permute.xlu1 %1586  ;;  %v3746_v43 = vpop.permute.xlu0 %1588  ;;  %v1641_v57 = vadd.f32 %v1581_v38, %v1565_v33 }
 0x6ba   :  { %v1594_v44 = vsel %vm805_vm4, %v3744_v32, %v1587_v59  ;;  %v1593_v46 = vsel %vm805_vm4, %v1587_v59, %v3746_v43 }
 0x6bb   :  { %v1596_v14 = vmul.f32 %v1594_v44, %v3442_v51  ;;  %v1637_v44 = vadd.f32 %v1561_v19, %v1545_v17  ;;  %v1640_v51 = vadd.f32 %v1580_v34, %v1564_v50  ;;  %v1597_v59 = vmul.f32 %v1593_v46, %v3445_v41  ;;  %v4267_v46 = vld [vmem:[#allocation59_spill] sm:$0xff] }
 0x6bd   :  { %v3750_v22 = vpop.permute.xlu1 %1600  ;;  %v1603_v37 = vpop.permute.xlu0 %1602 }
 0x6be   :  { %v1610_v45 = vsel %vm881_vm5, %v3750_v22, %v1603_v37 }
 0x6bf   :  { %v1612_v0 = vmul.f32 %v1610_v45, %v3448_v15  ;;  %v1632_v45 = vadd.f32 %v1528_v53, %v1512_v36  ;;  %v4265_v15 = vld [vmem:[#allocation45_spill] sm:$0xff] }
 0x6c0   :  { %v1567_v12 = vmul.f32 %v3672_v10, %v4265_v15 }
 0x6c1   :  { %v1605_v56 = vpop.permute.xlu1 %1604  ;;  %v1505_v21 = vpop.permute.xlu0 %1504  ;;  %v1644_v54 = vadd.f32 %v1612_v0, %v1596_v14  ;;  %v1648_v7 = vadd.f32 %v1636_v30, %v1632_v45  ;;  %v4266_v45 = vld [vmem:[#allocation58_spill] sm:$0xff] }
 0x6c2   :  { %v1609_v5 = vsel %vm881_vm5, %v1603_v37, %v1605_v56  ;;  %v1566_v37 = vmul.f32 %v3698_v11, %v4264_v27  ;;  %v1509_v36 = vsel %vm390_vm2, %v3736_v52, %v1505_v21 }
 0x6c3   :  { %v1613_v47 = vmul.f32 %v1609_v5, %v3451_v40  ;;  %v1652_v14 = vadd.f32 %v1644_v54, %v1640_v51 }
 0x6c5   :  { %v1521_v3 = vpop.permute.xlu1 %1520  ;;  %v1537_v63 = vpop.permute.xlu0 %1536  ;;  %v1645_v4 = vadd.f32 %v1613_v47, %v1597_v59  ;;  %v4269_v59 = vld [vmem:[#allocation60_spill] sm:$0xff] }
 0x6c6   :  { %v1525_v11 = vsel %vm465_vm0, %v1519_v31, %v1521_v3  ;;  %v1541_v0 = vsel %vm541_vm6, %v1535_v55, %v1537_v63  ;;  %v1508_v31 = vsel %vm390_vm2, %v1505_v21, %v3738_v62  ;;  %v1514_v55 = vmul.f32 %v1509_v36, %v3454_v6 }
 0x6c7   :  { %v1546_v51 = vmul.f32 %v1541_v0, %v3466_v28  ;;  %v1515_v38 = vmul.f32 %v1508_v31, %v3457_v58 }
 0x6c9   :  { %v1553_v60 = vpop.permute.xlu1 %1552  ;;  %v1575_v53 = vpop.permute.xlu0 %1574 }
 0x6ca   :  { %v1556_v10 = vsel %vm617_vm1, %v1553_v60, %v1555_v39  ;;  %v1557_v50 = vsel %vm617_vm1, %v1551_v20, %v1553_v60  ;;  %v1576_v52 = vsel %vm729_vm3, %v1573_v61, %v1575_v53  ;;  %v1579_v30 = vsel %vm729_vm3, %v1575_v53, %v1569_v24 }
 0x6cb   :  { %v1524_v39 = vsel %vm465_vm0, %v1521_v3, %v3740_v1  ;;  %v1530_v20 = vmul.f32 %v1525_v11, %v3460_v8  ;;  %v1540_v61 = vsel %vm541_vm6, %v1537_v63, %v3742_v35  ;;  %v1562_v24 = vmul.f32 %v1557_v50, %v3478_v2  ;;  %v4270_v11 = vld [vmem:[#allocation61_spill] sm:$0xff] }
 0x6cc   :  { %v1563_v19 = vmul.f32 %v1556_v10, %v3481_v9  ;;  %v1582_v21 = vmul.f32 %v1576_v52, %v3484_v49  ;;  %v1583_v62 = vmul.f32 %v1579_v30, %v3487_v13  ;;  %v1547_v3 = vmul.f32 %v1540_v61, %v4242_v18 }
 0x6cd   :  { %v1591_v34 = vpop.permute.xlu1 %1590  ;;  %v1607_v5 = vpop.permute.xlu0 %1606  ;;  %v1638_v36 = vadd.f32 %v1562_v24, %v1546_v51  ;;  %v1634_v60 = vadd.f32 %v1530_v20, %v1514_v55  ;;  %v1656_v24 = vadd.f32 %v1652_v14, %v1648_v7 }
 0x6ce   :  { %v1592_v1 = vsel %vm805_vm4, %v3746_v43, %v1591_v34  ;;  %v1595_v63 = vsel %vm805_vm4, %v1591_v34, %v3744_v32  ;;  %v1608_v35 = vsel %vm881_vm5, %v1605_v56, %v1607_v5  ;;  %v1611_v33 = vsel %vm881_vm5, %v1607_v5, %v3750_v22  ;;  %v4268_v43 = vld [vmem:[#allocation56_spill] sm:$0xff]  ;;  %v4271_v5 = vld [vmem:[#allocation63_spill] sm:$0xff] }
 0x6cf   :  { %v1598_v17 = vmul.f32 %v1592_v1, %v4266_v45  ;;  %v1599_v54 = vmul.f32 %v1595_v63, %v4267_v46  ;;  %v1531_v47 = vmul.f32 %v1524_v39, %v4268_v43  ;;  %v1614_v32 = vmul.f32 %v1608_v35, %v4269_v59 }
 0x6d0   :  { %v1615_v0 = vmul.f32 %v1611_v33, %v4270_v11  ;;  %v1653_v56 = vadd.f32 %v1645_v4, %v1641_v57  ;;  %v1639_v53 = vadd.f32 %v1563_v19, %v1547_v3  ;;  %v1642_v10 = vadd.f32 %v1582_v21, %v1566_v37  ;;  %v4274_v33 = vld [vmem:[#allocation65_spill] sm:$0xff] }
 0x6d1   :  { %v1617_v22 = vpop.permute.xlu1 %1616  ;;  %v1619_v50 = vpop.permute.xlu0 %1618  ;;  %v1643_v52 = vadd.f32 %v1583_v62, %v1567_v12  ;;  %v1646_v30 = vadd.f32 %v1614_v32, %v1598_v17  ;;  %v1649_v34 = vadd.f32 %v1637_v44, %v1633_v26  ;;  %v1635_v51 = vadd.f32 %v1531_v47, %v1515_v38  ;;  %v4272_v26 = vld [vmem:[#allocation62_spill] sm:$0xff]  ;;  %v4273_v62 = vld [vmem:[#allocation64_spill] sm:$0xff]  ;;  %v4275_v17 = vld [vmem:[#allocation57_spill] sm:$0xff] }
 0x6d2   :  { %v1647_v31 = vadd.f32 %v1615_v0, %v1599_v54  ;;  %v1626_v61 = vsel %vm957_vm7, %v1617_v22, %v1619_v50  ;;  %v1650_v1 = vadd.f32 %v1638_v36, %v1634_v60 }
 0x6d3   :  { %v1628_v39 = vmul.f32 %v1626_v61, %v4271_v5  ;;  %v1654_v63 = vadd.f32 %v1646_v30, %v1642_v10  ;;  %v1657_v55 = vadd.f32 %v1653_v56, %v1649_v34  ;;  %v1651_v20 = vadd.f32 %v1639_v53, %v1635_v51 }
 0x6d4   :  { %v1655_v35 = vadd.f32 %v1647_v31, %v1643_v52 }
 0x6d5   :  { %v1660_v57 = vadd.f32 %v1656_v24, %v1628_v39  ;;  %v1621_v4 = vpop.permute.xlu1 %1620  ;;  %v1623_v37 = vpop.permute.xlu0 %1622  ;;  %v1658_v19 = vadd.f32 %v1654_v63, %v1650_v1 }
 0x6d6   :  { %v1625_v12 = vsel %vm957_vm7, %v1619_v50, %v1621_v4  ;;  %v1624_v21 = vsel %vm957_vm7, %v1621_v4, %v1623_v37  ;;  %v1627_v14 = vsel %vm957_vm7, %v1623_v37, %v1617_v22  ;;  %v1659_v3 = vadd.f32 %v1655_v35, %v1651_v20 }
 0x6d7   :  { %v1664_v44 = vadd.f32 %v1660_v57, %v4272_v26  ;;  %v1629_v7 = vmul.f32 %v1625_v12, %v4273_v62  ;;  %v1630_v38 = vmul.f32 %v1624_v21, %v4274_v33  ;;  %v1631_v54 = vmul.f32 %v1627_v14, %v4275_v17  ;;  %v4276_v57 = vld [vmem:[#allocation38_spill] sm:$0xff]  ;;  %v4278_v12 = vld [vmem:[#allocation40_spill] sm:$0xff] }
 0x6d9   :  { %v2028_v47 = vmul.f32 -1.442695, %v1664_v44  ;;  %v1661_v36 = vadd.f32 %v1657_v55, %v1629_v7  ;;  %v1662_v32 = vadd.f32 %v1658_v19, %v1630_v38  ;;  %v1663_v0 = vadd.f32 %v1659_v3, %v1631_v54  ;;  %v4277_v55 = vld [vmem:[#allocation39_spill] sm:$0xff]  ;;  %v4279_v44 = vld [vmem:[#allocation41_spill] sm:$0xff] }
 0x6db   :  { %2088 = vpow2.f32 %v2028_v47  ;;  %v1665_v56 = vadd.f32 %v1661_v36, %v4272_v26  ;;  %v1666_v60 = vadd.f32 %v1662_v32, %v4272_v26  ;;  %v1667_v53 = vadd.f32 %v1663_v0, %v4272_v26 }
 0x6dd   :  { %v2029_v10 = vmul.f32 -1.442695, %v1665_v56  ;;  %v2030_v50 = vmul.f32 -1.442695, %v1666_v60  ;;  %v2031_v52 = vmul.f32 -1.442695, %v1667_v53 }
 0x6df   :  { %2090 = vpow2.f32 %v2029_v10 }
 0x6e0   :  { %2092 = vpow2.f32 %v2030_v50 }
 0x6e1   :  { %2094 = vpow2.f32 %v2031_v52 }
 0x6e8   :  { %v2089_v22 = vpop.eup %2088 }
 0x6e9   :  { %v1680_v30 = vadd.f32 1.0, %v2089_v22 }
 0x6eb   :  { %2096 = vrcp.f32 %v1680_v30 }
 0x6ec   :  { %v2091_v31 = vpop.eup %2090 }
 0x6ed   :  { %v2093_v61 = vpop.eup %2092  ;;  %v1681_v34 = vadd.f32 1.0, %v2091_v31 }
 0x6ee   :  { %v2095_v39 = vpop.eup %2094  ;;  %v1682_v24 = vadd.f32 1.0, %v2093_v61 }
 0x6ef   :  { %2098 = vrcp.f32 %v1681_v34  ;;  %v1683_v51 = vadd.f32 1.0, %v2095_v39  ;;  %v1720_v34 = vstv %s2032_s0 }
 0x6f0   :  { %2100 = vrcp.f32 %v1682_v24 }
 0x6f1   :  { %2102 = vrcp.f32 %v1683_v51  ;;  %v1726_v51 = vstv %s2033_s18 }
 0x6f8   :  { %v2097_v1 = vpop.eup %2096 }
 0x6f9   :  { %v1692_v4 = vadd.f32 %v2097_v1, %v4276_v57  ;;  %v4281_v57 = vld [vmem:[#allocation42_spill] sm:$0xff] }
 0x6fc   :  { %v2099_v63 = vpop.eup %2098 }
 0x6fd   :  { %v2101_v35 = vpop.eup %2100  ;;  %v1693_v37 = vadd.f32 %v2099_v63, %v4277_v55 }
 0x6fe   :  { %v2103_v20 = vpop.eup %2102  ;;  %v1694_v19 = vadd.f32 %v2101_v35, %v4278_v12 }
 0x6ff   :  { %v1698_v21 = vadd.f32 %v1693_v37, %v1692_v4  ;;  %v1695_v7 = vadd.f32 %v2103_v20, %v4279_v44 }
 0x701   :  { %v1699_v14 = vadd.f32 %v1698_v21, %v1694_v19 }
 0x703   :  { %v1700_v38 = vadd.f32 %v1699_v14, %v1695_v7 }
 0x705   :  { %1701 = vadd.xlane.f32.xlu1 %v1700_v38 }
 0x78e   :  { %v1702_v3 = vpop.xlane.xlu1 %1701 }
 0x78f   :  { %v1703_v54 = vmul.f32 0.001953125, %v1702_v3 }
 0x791   :  { %v1704_v47 = vsub.f32 %v1692_v4, %v1703_v54  ;;  %v1705_v36 = vsub.f32 %v1693_v37, %v1703_v54  ;;  %v1706_v32 = vsub.f32 %v1694_v19, %v1703_v54  ;;  %v1707_v0 = vsub.f32 %v1695_v7, %v1703_v54 }
 0x793   :  { %v1708_v56 = vmul.f32 %v1704_v47, %v1704_v47  ;;  %v1709_v60 = vmul.f32 %v1705_v36, %v1705_v36  ;;  %v1710_v53 = vmul.f32 %v1706_v32, %v1706_v32  ;;  %v1711_v50 = vmul.f32 %v1707_v0, %v1707_v0 }
 0x795   :  { %v1712_v10 = vadd.f32 %v1709_v60, %v1708_v56 }
 0x797   :  { %v1713_v52 = vadd.f32 %v1712_v10, %v1710_v53 }
 0x799   :  { %v1714_v22 = vadd.f32 %v1713_v52, %v1711_v50 }
 0x79b   :  { %1715 = vadd.xlane.f32.xlu0 %v1714_v22 }
 0x824   :  { %v1716_v30 = vpop.xlane.xlu0 %1715 }
 0x825   :  { %v1717_v31 = vmul.f32 0.001953125, %v1716_v30 }
 0x827   :  { %v1718_v61 = vadd.f32 1e-05, %v1717_v31 }
 0x829   :  { %2104 = vrsqrt.f32 %v1718_v61 }
 0x836   :  { %v2105_v39 = vpop.eup %2104 }
 0x837   :  { %v1721_v24 = vmul.f32 %v2105_v39, %v1720_v34 }
 0x839   :  { %v1722_v1 = vmul.f32 %v1721_v24, %v1704_v47  ;;  %v1723_v63 = vmul.f32 %v1721_v24, %v1705_v36  ;;  %v1724_v35 = vmul.f32 %v1721_v24, %v1706_v32  ;;  %v1725_v4 = vmul.f32 %v1721_v24, %v1707_v0 }
 0x83b   :  { %v3876_v37 = vadd.f32 %v1726_v51, %v1722_v1  ;;  %v3878_v20 = vadd.f32 %v1726_v51, %v1723_v63  ;;  %v3884_v19 = vadd.f32 %v1726_v51, %v1724_v35  ;;  %v3886_v21 = vadd.f32 %v1726_v51, %v1725_v4  ;;  %v4280_v51 = vld [vmem:[#allocation47_spill] sm:$0xff] }
 0x83d   :  { %1733 = vrot.lane.b32.xlu1 %v3878_v20, %s2259_s12  ;;  %1731 = vrot.lane.b32.xlu0 %v3876_v37, %s2259_s12 }
 0x841   :  { %1735 = vrot.lane.b32.xlu1 %v3884_v19, %s2259_s12  ;;  %1737 = vrot.lane.b32.xlu0 %v3886_v21, %s2259_s12  ;;  %s2267_s12 = smov [#allocation15]  }
 0x845   :  { %1747 = vrot.lane.b32.xlu1 %v3876_v37, %s2260_s14  ;;  %1749 = vrot.lane.b32.xlu0 %v3878_v20, %s2260_s14 }
 0x849   :  { %1751 = vrot.lane.b32.xlu1 %v3884_v19, %s2260_s14  ;;  %1753 = vrot.lane.b32.xlu0 %v3886_v21, %s2260_s14  ;;  %s1964_s14 = sshll.u32 %s2267_s12, 4  ;;  %s1965_s14 = int_to_ptr.vmem [resolvable:$true] %s1964_s14 }
 0x84a   :  { %p2223_p3 = scmp.lt.s32.totalorder %s1965_s14, %s1965_s14 }
 0x84d   :  { %1763 = vrot.lane.b32.xlu1 %v3876_v37, %s2261_s17  ;;  %1765 = vrot.lane.b32.xlu0 %v3878_v20, %s2261_s17 }
 0x851   :  { %1767 = vrot.lane.b32.xlu1 %v3884_v19, %s2261_s17  ;;  %1769 = vrot.lane.b32.xlu0 %v3886_v21, %s2261_s17  ;;  %s2218_s17 = scalar_lea.vmem %s1965_s14, 2048 }
 0x852   :  { %p2219_p2 = scmp.ne.s32.totalorder %s1965_s14, %s2218_s17  ;;  %p2224_p4 = scmp.lt.s32.totalorder %s2218_s17, %s2218_s17 }
 0x854   :  { %p2225_p5 = por %p2224_p4, %p2223_p3 }
 0x855   :  { %1779 = vrot.lane.b32.xlu1 %v3876_v37, %s2262_s21  ;;  %1781 = vrot.lane.b32.xlu0 %v3878_v20, %s2262_s21 }
 0x856   :  { %p2226_p6 = pnand %p2225_p5, %p2219_p2 }
 0x859   :  { %1783 = vrot.lane.b32.xlu1 %v3884_v19, %s2262_s21  ;;  %1785 = vrot.lane.b32.xlu0 %v3886_v21, %s2262_s21 }
 0x85d   :  { %1799 = vrot.lane.b32.xlu1 %v3876_v37, %s2263_s23  ;;  %1801 = vrot.lane.b32.xlu0 %v3878_v20, %s2263_s23 }
 0x861   :  { %1803 = vrot.lane.b32.xlu1 %v3884_v19, %s2263_s23  ;;  %1805 = vrot.lane.b32.xlu0 %v3886_v21, %s2263_s23 }
 0x865   :  { %1815 = vrot.lane.b32.xlu1 %v3876_v37, %s2264_s4  ;;  %1817 = vrot.lane.b32.xlu0 %v3878_v20, %s2264_s4 }
 0x869   :  { %1819 = vrot.lane.b32.xlu1 %v3884_v19, %s2264_s4  ;;  %1821 = vrot.lane.b32.xlu0 %v3886_v21, %s2264_s4 }
 0x86d   :  { %1831 = vrot.lane.b32.xlu1 %v3876_v37, %s2265_s20  ;;  %1833 = vrot.lane.b32.xlu0 %v3878_v20, %s2265_s20 }
 0x871   :  { %1835 = vrot.lane.b32.xlu1 %v3884_v19, %s2265_s20  ;;  %1837 = vrot.lane.b32.xlu0 %v3886_v21, %s2265_s20 }
 0x875   :  { %1847 = vrot.lane.b32.xlu1 %v3876_v37, %s2266_s2  ;;  %1849 = vrot.lane.b32.xlu0 %v3878_v20, %s2266_s2 }
 0x879   :  { %1851 = vrot.lane.b32.xlu1 %v3884_v19, %s2266_s2  ;;  %1853 = vrot.lane.b32.xlu0 %v3886_v21, %s2266_s2 }
 0x8af   :  { %v1734_v7 = vpop.permute.xlu1 %1733  ;;  %v1732_v14 = vpop.permute.xlu0 %1731 }
 0x8b0   :  { %v1741_v24 = vsel %vm390_vm2, %v1732_v14, %v1734_v7 }
 0x8b3   :  { %v1736_v38 = vpop.permute.xlu1 %1735  ;;  %v1738_v3 = vpop.permute.xlu0 %1737 }
 0x8b4   :  { %v1740_v44 = vsel %vm390_vm2, %v1734_v7, %v1736_v38  ;;  %v1739_v12 = vsel %vm390_vm2, %v1736_v38, %v1738_v3  ;;  %v1742_v55 = vsel %vm390_vm2, %v1738_v3, %v1732_v14  ;;  %v3978_v7 = vmul.f32 %v3886_v21, %v4265_v15  ;;  %v4282_v3 = vld [vmem:[#allocation48_spill] sm:$0xff] }
 0x8b7   :  { %v1748_v54 = vpop.permute.xlu1 %1747  ;;  %v1750_v47 = vpop.permute.xlu0 %1749 }
 0x8b8   :  { %v1757_v61 = vsel %vm465_vm0, %v1748_v54, %v1750_v47 }
 0x8b9   :  { %v1760_v1 = vmul.f32 %v1757_v61, %v4280_v51  ;;  %v1795_v61 = vmul.f32 %v3876_v37, %v4281_v57  ;;  %v1745_v37 = vmul.f32 %v1740_v44, %v3454_v6 }
 0x8bb   :  { %v1752_v36 = vpop.permute.xlu1 %1751  ;;  %v1754_v32 = vpop.permute.xlu0 %1753 }
 0x8bc   :  { %v1756_v63 = vsel %vm465_vm0, %v1750_v47, %v1752_v36  ;;  %v1755_v35 = vsel %vm465_vm0, %v1752_v36, %v1754_v32  ;;  %v1758_v4 = vsel %vm465_vm0, %v1754_v32, %v1748_v54  ;;  %v1744_v47 = vmul.f32 %v1741_v24, %v3395_v48 }
 0x8bd   :  { %v3970_v36 = vmul.f32 %v3878_v20, %v4263_v25  ;;  %v3974_v54 = vmul.f32 %v3884_v19, %v4264_v27  ;;  %v1761_v14 = vmul.f32 %v1756_v63, %v3460_v8  ;;  %v1759_v57 = vmul.f32 %v1758_v4, %v4282_v3  ;;  %v4283_v20 = vld [vmem:[#allocation46_spill] sm:$0xff]  ;;  %v4285_v4 = vld [vmem:[#allocation52_spill] sm:$0xff] }
 0x8be   :  { %v1762_v48 = vmul.f32 %v1755_v35, %v4268_v43  ;;  %v1743_v27 = vmul.f32 %v1742_v55, %v4283_v20  ;;  %v1746_v19 = vmul.f32 %v1739_v12, %v3457_v58  ;;  %v3988_v24 = vadd.f32 %v1760_v1, %v1744_v47  ;;  %v4287_v20 = vld [vmem:[#allocation55_spill] sm:$0xff] }
 0x8bf   :  { %v1764_v0 = vpop.permute.xlu1 %1763  ;;  %v1766_v56 = vpop.permute.xlu0 %1765 }
 0x8c0   :  { %v1773_v15 = vsel %vm541_vm6, %v1764_v0, %v1766_v56  ;;  %v1863_v1 = vadd.f32 %v1759_v57, %v1743_v27  ;;  %v1866_v63 = vadd.f32 %v1762_v48, %v1746_v19 }
 0x8c3   :  { %v1768_v60 = vpop.permute.xlu1 %1767  ;;  %v1770_v53 = vpop.permute.xlu0 %1769 }
 0x8c4   :  { %v1772_v8 = vsel %vm541_vm6, %v1766_v56, %v1768_v60  ;;  %v1774_v43 = vsel %vm541_vm6, %v1770_v53, %v1764_v0  ;;  %v1771_v6 = vsel %vm541_vm6, %v1768_v60, %v1770_v53  ;;  %v1865_v56 = vadd.f32 %v1761_v14, %v1745_v37  ;;  %v4284_v53 = vld [vmem:[#allocation49_spill] sm:$0xff]  ;;  %v4286_v37 = vld [vmem:[#allocation54_spill] sm:$0xff] }
 0x8c5   :  { %v1777_v60 = vmul.f32 %v1772_v8, %v3466_v28 }
 0x8c7   :  { %v1780_v10 = vpop.permute.xlu1 %1779  ;;  %v1782_v50 = vpop.permute.xlu0 %1781 }
 0x8c8   :  { %v1789_v25 = vsel %vm617_vm1, %v1780_v10, %v1782_v50 }
 0x8c9   :  { %v1792_v55 = vmul.f32 %v1789_v25, %v3417_v42  ;;  %v1775_v42 = vmul.f32 %v1774_v43, %v4284_v53 }
 0x8cb   :  { %v1784_v52 = vpop.permute.xlu1 %1783  ;;  %v1786_v22 = vpop.permute.xlu0 %1785 }
 0x8cc   :  { %v1788_v21 = vsel %vm617_vm1, %v1782_v50, %v1784_v52  ;;  %v1790_v58 = vsel %vm617_vm1, %v1786_v22, %v1780_v10  ;;  %v1787_v0 = vsel %vm617_vm1, %v1784_v52, %v1786_v22  ;;  %v1776_v50 = vmul.f32 %v1773_v15, %v3407_v16 }
 0x8cd   :  { %v1793_v35 = vmul.f32 %v1788_v21, %v3478_v2  ;;  %v1778_v10 = vmul.f32 %v1771_v6, %v4242_v18  ;;  %v1791_v47 = vmul.f32 %v1790_v58, %v4285_v4  ;;  %v1794_v52 = vmul.f32 %v1787_v0, %v3481_v9 }
 0x8ce   :  { %v1868_v57 = vadd.f32 %v1792_v55, %v1776_v50 }
 0x8cf   :  { %v1800_v30 = vpop.permute.xlu1 %1799  ;;  %v1802_v31 = vpop.permute.xlu0 %1801  ;;  %v1869_v25 = vadd.f32 %v1793_v35, %v1777_v60  ;;  %v1867_v19 = vadd.f32 %v1791_v47, %v1775_v42 }
 0x8d0   :  { %v1809_v12 = vsel %vm729_vm3, %v1800_v30, %v1802_v31 }
 0x8d1   :  { %v1811_v3 = vmul.f32 %v1809_v12, %v3436_v23  ;;  %v1879_v0 = vadd.f32 %v1867_v19, %v1863_v1 }
 0x8d3   :  { %v1804_v34 = vpop.permute.xlu1 %1803  ;;  %v1806_v39 = vpop.permute.xlu0 %1805  ;;  %v1871_v15 = vadd.f32 %v1811_v3, %v1795_v61  ;;  %v1880_v3 = vadd.f32 %v1868_v57, %v3988_v24 }
 0x8d4   :  { %v1808_v16 = vsel %vm729_vm3, %v1802_v31, %v1804_v34  ;;  %v1807_v28 = vsel %vm729_vm3, %v1804_v34, %v1806_v39  ;;  %v1810_v18 = vsel %vm729_vm3, %v1806_v39, %v1800_v30  ;;  %v4288_v30 = vld [vmem:[#allocation53_spill] sm:$0xff] }
 0x8d5   :  { %v1812_v39 = vmul.f32 %v1808_v16, %v4288_v30  ;;  %v1814_v8 = vmul.f32 %v1810_v18, %v3487_v13 }
 0x8d7   :  { %v1816_v38 = vpop.permute.xlu1 %1815  ;;  %v1818_v32 = vpop.permute.xlu0 %1817  ;;  %v1874_v60 = vadd.f32 %v1814_v8, %v3978_v7 }
 0x8d8   :  { %v1825_v14 = vsel %vm805_vm4, %v1816_v38, %v1818_v32 }
 0x8d9   :  { %v1827_v31 = vmul.f32 %v1825_v14, %v4286_v37 }
 0x8db   :  { %v1820_v44 = vpop.permute.xlu1 %1819  ;;  %v1822_v51 = vpop.permute.xlu0 %1821 }
 0x8dc   :  { %v1824_v23 = vsel %vm805_vm4, %v1818_v32, %v1820_v44  ;;  %v1823_v48 = vsel %vm805_vm4, %v1820_v44, %v1822_v51  ;;  %v1826_v34 = vsel %vm805_vm4, %v1822_v51, %v1816_v38  ;;  %v1813_v32 = vmul.f32 %v1807_v28, %v3484_v49 }
 0x8dd   :  { %v1828_v43 = vmul.f32 %v1824_v23, %v3445_v41  ;;  %v1829_v21 = vmul.f32 %v1823_v48, %v4266_v45  ;;  %v1830_v12 = vmul.f32 %v1826_v34, %v4267_v46  ;;  %v1870_v51 = vadd.f32 %v1794_v52, %v1778_v10 }
 0x8de   :  { %v1872_v46 = vadd.f32 %v1812_v39, %v3970_v36  ;;  %v1873_v50 = vadd.f32 %v1813_v32, %v3974_v54 }
 0x8df   :  { %v1832_v22 = vpop.permute.xlu1 %1831  ;;  %v1834_v2 = vpop.permute.xlu0 %1833  ;;  %v1882_v54 = vadd.f32 %v1870_v51, %v1866_v63 }
 0x8e0   :  { %v1841_v9 = vsel %vm881_vm5, %v1832_v22, %v1834_v2 }
 0x8e1   :  { %v1843_v27 = vmul.f32 %v1841_v9, %v4287_v20 }
 0x8e3   :  { %v1875_v6 = vadd.f32 %v1843_v27, %v1827_v31  ;;  %v1836_v55 = vpop.permute.xlu1 %1835  ;;  %v1838_v58 = vpop.permute.xlu0 %1837 }
 0x8e4   :  { %v1840_v38 = vsel %vm881_vm5, %v1834_v2, %v1836_v55  ;;  %v1839_v61 = vsel %vm881_vm5, %v1836_v55, %v1838_v58  ;;  %v1842_v49 = vsel %vm881_vm5, %v1838_v58, %v1832_v22  ;;  %v4291_v58 = vld [vmem:[#allocation22_spill] sm:$0xff] }
 0x8e5   :  { %v1883_v44 = vadd.f32 %v1875_v6, %v1871_v15  ;;  %v1844_v13 = vmul.f32 %v1840_v38, %v3451_v40  ;;  %v1845_v41 = vmul.f32 %v1839_v61, %v4269_v59  ;;  %v1846_v45 = vmul.f32 %v1842_v49, %v4270_v11  ;;  %v4290_v6 = vld [vmem:[#allocation23_spill] sm:$0xff]  ;;  %v4292_v38 = vld [vmem:[#allocation25_spill] sm:$0xff] }
 0x8e6   :  { %v1881_v40 = vadd.f32 %v1869_v25, %v1865_v56  ;;  %v4293_v49 = vld [vmem:[#allocation31_spill] sm:$0xff] }
 0x8e7   :  { %v1876_v53 = vadd.f32 %v1844_v13, %v1828_v43  ;;  %v1877_v42 = vadd.f32 %v1845_v41, %v1829_v21  ;;  %v1878_v35 = vadd.f32 %v1846_v45, %v1830_v12  ;;  %v1848_v4 = vpop.permute.xlu1 %1847  ;;  %v1850_v47 = vpop.permute.xlu0 %1849  ;;  %v1887_v11 = vadd.f32 %v1883_v44, %v1879_v0  ;;  %v4294_v45 = vld [vmem:[#allocation39_spill] sm:$0xff] }
 0x8e8   :  { %v1857_v59 = vsel %vm957_vm7, %v1848_v4, %v1850_v47 }
 0x8e9   :  { %v1884_v10 = vadd.f32 %v1876_v53, %v1872_v46  ;;  %v1885_v1 = vadd.f32 %v1877_v42, %v1873_v50  ;;  %v1886_v14 = vadd.f32 %v1878_v35, %v1874_v60  ;;  %v1859_v36 = vmul.f32 %v1857_v59, %v4271_v5  ;;  %v4295_v46 = vld [vmem:[#allocation40_spill] sm:$0xff]  ;;  %v4297_v42 = vld [vmem:[#allocation21_spill] sm:$0xff] }
 0x8ea   :  { %v4296_v60 = vld [vmem:[#allocation24_spill] sm:$0xff]  ;;  %v4300_v59 = vld [vmem:[#allocation41_spill] sm:$0xff] }
 0x8eb   :  { %v1891_v52 = vadd.f32 %v1887_v11, %v1859_v36  ;;  %v1852_v7 = vpop.permute.xlu1 %1851  ;;  %v1888_v16 = vadd.f32 %v1884_v10, %v1880_v3  ;;  %v1889_v28 = vadd.f32 %v1885_v1, %v1881_v40  ;;  %v1854_v22 = vpop.permute.xlu0 %1853  ;;  %v1890_v24 = vadd.f32 %v1886_v14, %v1882_v54  ;;  %v4299_v3 = vld [vmem:[#allocation32_spill] sm:$0xff]  ;;  %v4302_v14 = vld [vmem:[#allocation34_spill] sm:$0xff]  ;;  %v4303_v54 = vld [vmem:[#allocation35_spill] sm:$0xff] }
 0x8ec   :  { %v1856_v2 = vsel %vm957_vm7, %v1850_v47, %v1852_v7  ;;  %v1855_v56 = vsel %vm957_vm7, %v1852_v7, %v1854_v22  ;;  %v1858_v57 = vsel %vm957_vm7, %v1854_v22, %v1848_v4  ;;  %v4298_v4 = vld [vmem:[#allocation26_spill] sm:$0xff]  ;;  %v4301_v10 = vld [vmem:[#allocation28_spill] sm:$0xff] }
 0x8ed   :  { %v1895_v18 = vadd.f32 %v1891_v52, %v4272_v26  ;;  %v1860_v5 = vmul.f32 %v1856_v2, %v4273_v62  ;;  %v1861_v63 = vmul.f32 %v1855_v56, %v4274_v33  ;;  %v1862_v23 = vmul.f32 %v1858_v57, %v4275_v17  ;;  %v4304_v7 = vld [vmem:[#allocation36_spill] sm:$0xff]  ;;  %v4306_v2 = vld [vmem:[#allocation27_spill] sm:$0xff]  ;;  %v4307_v56 = vld [vmem:[#allocation30_spill] sm:$0xff] }
 0x8ef   :  { %v2034_v48 = vmul.f32 -1.442695, %v1895_v18  ;;  %v1892_v9 = vadd.f32 %v1888_v16, %v1860_v5  ;;  %v1893_v25 = vadd.f32 %v1889_v28, %v1861_v63  ;;  %v1894_v37 = vadd.f32 %v1890_v24, %v1862_v23  ;;  %v4305_v28 = vld [vmem:[#allocation29_spill] sm:$0xff] }
 0x8f0   :  { %v4308_v18 = vld [vmem:[#allocation33_spill] sm:$0xff] }
 0x8f1   :  { %2106 = vpow2.f32 %v2034_v48  ;;  %v1896_v31 = vadd.f32 %v1892_v9, %v4272_v26  ;;  %v1897_v34 = vadd.f32 %v1893_v25, %v4272_v26  ;;  %v1898_v29 = vadd.f32 %v1894_v37, %v4272_v26  ;;  %v4289_v26 = vld [vmem:[#allocation38_spill] sm:$0xff] }
 0x8f3   :  { %v2035_v20 = vmul.f32 -1.442695, %v1896_v31  ;;  %v2036_v27 = vmul.f32 -1.442695, %v1897_v34  ;;  %v2037_v19 = vmul.f32 -1.442695, %v1898_v29 }
 0x8f5   :  { %2108 = vpow2.f32 %v2035_v20 }
 0x8f6   :  { %2110 = vpow2.f32 %v2036_v27 }
 0x8f7   :  { %2112 = vpow2.f32 %v2037_v19 }
 0x8fe   :  { %v2107_v62 = vpop.eup %2106 }
 0x8ff   :  { %v1911_v33 = vadd.f32 1.0, %v2107_v62 }
 0x901   :  { %2114 = vrcp.f32 %v1911_v33 }
 0x902   :  { %v2109_v17 = vpop.eup %2108 }
 0x903   :  { %v2111_v15 = vpop.eup %2110  ;;  %v1912_v30 = vadd.f32 1.0, %v2109_v17 }
 0x904   :  { %v2113_v39 = vpop.eup %2112  ;;  %v1913_v32 = vadd.f32 1.0, %v2111_v15 }
 0x905   :  { %2116 = vrcp.f32 %v1912_v30  ;;  %v1914_v8 = vadd.f32 1.0, %v2113_v39 }
 0x906   :  { %2118 = vrcp.f32 %v1913_v32 }
 0x907   :  { %2120 = vrcp.f32 %v1914_v8 }
 0x90e   :  { %v2115_v43 = vpop.eup %2114 }
 0x90f   :  { %v1923_v21 = vadd.f32 %v2115_v43, %v4289_v26 }
 0x911   :  { %v1927_v55 = vmul.f32 %v1923_v21, %v4290_v6  ;;  %v1931_v12 = vmul.f32 %v1923_v21, %v4291_v58  ;;  %v1935_v61 = vmul.f32 %v1923_v21, %v4292_v38  ;;  %v1939_v44 = vmul.f32 %v1923_v21, %v4293_v49 }
 0x912   :  { %v2117_v13 = vpop.eup %2116 }
 0x913   :  { %v2119_v41 = vpop.eup %2118  ;;  %1943 = vst [vmem:[#allocation15] sm:$0xff] %v1927_v55  ;;  %1947 = vst [vmem:[#allocation15 + $0x20] sm:$0xff] %v1931_v12  ;;  %v1924_v51 = vadd.f32 %v2117_v13, %v4294_v45 }
 0x914   :  { %1951 = vst [vmem:[#allocation15 + $0x40] sm:$0xff] %v1935_v61  ;;  %1955 = vst [vmem:[#allocation15 + $0x60] sm:$0xff] %v1939_v44  ;;  %v2121_v0 = vpop.eup %2120  ;;  %v1925_v50 = vadd.f32 %v2119_v41, %v4295_v46 }
 0x915   :  { %v1928_v53 = vmul.f32 %v1924_v51, %v4296_v60  ;;  %v1932_v35 = vmul.f32 %v1924_v51, %v4297_v42  ;;  %v1936_v47 = vmul.f32 %v1924_v51, %v4298_v4  ;;  %v1940_v40 = vmul.f32 %v1924_v51, %v4299_v3 }
 0x916   :  { %v1926_v11 = vadd.f32 %v2121_v0, %v4300_v59  ;;  %v1929_v1 = vmul.f32 %v1925_v50, %v4301_v10  ;;  %v1933_v36 = vmul.f32 %v1925_v50, %v4302_v14  ;;  %v1937_v52 = vmul.f32 %v1925_v50, %v4303_v54 }
 0x917   :  { %1944 = vst [vmem:[#allocation15 + $0x8] sm:$0xff] %v1928_v53  ;;  %1948 = vst [vmem:[#allocation15 + $0x28] sm:$0xff] %v1932_v35  ;;  %v1941_v16 = vmul.f32 %v1925_v50, %v4304_v7 }
 0x918   :  { %1952 = vst [vmem:[#allocation15 + $0x48] sm:$0xff] %v1936_v47  ;;  %1956 = vst [vmem:[#allocation15 + $0x68] sm:$0xff] %v1940_v40  ;;  %v1930_v22 = vmul.f32 %v1926_v11, %v4305_v28  ;;  %v1934_v24 = vmul.f32 %v1926_v11, %v4306_v2  ;;  %v1938_v57 = vmul.f32 %v1926_v11, %v4307_v56 }
 0x919   :  { %v1942_v5 = vmul.f32 %v1926_v11, %v4308_v18  ;;  %1945 = vst [vmem:[#allocation15 + $0x10] sm:$0xff] %v1929_v1  ;;  %1949 = vst [vmem:[#allocation15 + $0x30] sm:$0xff] %v1933_v36 }
 0x91a   :  { %1953 = vst [vmem:[#allocation15 + $0x50] sm:$0xff] %v1937_v52  ;;  %1957 = vst [vmem:[#allocation15 + $0x70] sm:$0xff] %v1941_v16 }
 0x91b   :  { %1946 = vst [vmem:[#allocation15 + $0x18] sm:$0xff] %v1930_v22  ;;  %1950 = vst [vmem:[#allocation15 + $0x38] sm:$0xff] %v1934_v24 }
 0x91c   :  { %1954 = vst [vmem:[#allocation15 + $0x58] sm:$0xff] %v1938_v57  ;;  %1958 = vst [vmem:[#allocation15 + $0x78] sm:$0xff] %v1942_v5 }
 0x91d   :  { %2229 = shalt.err (!%p2226_p6)
}
 0x91e   :  { %1970 = dma.vmem_to_hbm [thread:$0]  %s1965_s14, 2048, %s4104_s10, [#allocation6], %s2253_s3, %s2253_s3, %s2254_s27  }
 0x91f   :  { %2246 = dma.done.wait [#allocation6], 2048  }
 0x920   :  { %2247 = vsyncadd [#allocation6], 4294965248 }
 0x921   :  { %1974 = vsyncpa [#allocation5], 1 }
 0x922   :  { %1975 = vsyncpa [#allocation9], 1 }
 0x923   :  { %1976 = vsyncpa [#allocation6], 1 }
 0x924   :  { %1977 = vsyncpa [#allocation7], 1 }
 0x925   :  { %1978 = vsyncpa [#allocation13], 1 }

</bundles_post_ra>
